<compile_context>
chip_gen: v6e
topology: v6e:2x2x1
jax: 0.10.0
libtpu: 0.0.40
codegen_flags: <defaults>
</compile_context>

<pallas_src>
import functools

import jax
import jax.numpy as jnp
from jax.experimental import pallas as pl
from jax.experimental.pallas import tpu as pltpu


INPUT_SIZE_PROT = 1024
INPUT_SIZE_COMP = 196
HIDDEN_PROT = 32


def _round_up(x, m):
    return (x + m - 1) // m * m


def pcnet_kernel(
    xp_ref, xc_ref,              # [TB, 1024] f32, [TB, 196] f32  (cast to bf16 in-kernel)
    wp_ref, bp_ref,              # fc_prot: [1024, 32] bf16, [1, 32] f32
    w1a_ref, w1b_ref, b1_ref,    # fc_lin1: [32, 1024] bf16, [196, 1024] bf16, [1, 1024] f32
    w2_ref, b2_ref,              # fc_lin2: [1024, 1024] bf16, [1, 1024] f32
    w3_ref, b3_ref,              # fc_lin3: [1024, 512] bf16, [1, 512] f32
    w4t_ref, b4_ref,             # fc_lin4 (transposed): [1, 512] bf16, [1, 1] f32
    out_ref,                     # [TB, 2] f32 (col 0: relu(z), col 1: sigmoid(z))
):
    f32 = jnp.float32
    bf16 = jnp.bfloat16

    # Cast activations to bf16 on the VPU (no wrapper pre-pass).
    xp = xp_ref[...].astype(bf16)
    xc = xc_ref[...].astype(bf16)

    # h_prot = relu(fc_prot(x_prot))
    h_prot = jnp.dot(xp, wp_ref[...], preferred_element_type=f32) + bp_ref[...]
    h_prot = jnp.maximum(h_prot, 0.0)

    # cat((h_prot, x_comp), 1) @ W1 == h_prot @ W1[:32] + x_comp @ W1[32:]   (dropout = id)
    h1 = (jnp.dot(h_prot.astype(bf16), w1a_ref[...], preferred_element_type=f32)
          + jnp.dot(xc, w1b_ref[...], preferred_element_type=f32)
          + b1_ref[...])
    h1 = jnp.maximum(h1, 0.0)

    # relu(fc_lin2(.))   (dropout = id)
    h2 = jnp.dot(h1.astype(bf16), w2_ref[...], preferred_element_type=f32) + b2_ref[...]
    h2 = jnp.maximum(h2, 0.0)

    # relu(fc_lin3(.))
    h3 = jnp.dot(h2.astype(bf16), w3_ref[...], preferred_element_type=f32) + b3_ref[...]
    h3 = jnp.maximum(h3, 0.0)

    # fc_lin4 has N=1: VPU multiply + XLU cross-lane reduce instead of the MXU.
    w4_row = w4t_ref[...].astype(f32)                                 # [1, 512]
    z = jnp.sum(h3 * w4_row, axis=-1, keepdims=True) + b4_ref[...]    # [TB, 1]

    # Dense 2-lane output: col 0 <- relu head, col 1 <- sigmoid head.
    col = jax.lax.broadcasted_iota(jnp.int32, out_ref.shape, 1)       # [TB, 2]
    out_ref[...] = jnp.where(
        col == 0, jnp.maximum(z, 0.0), jax.nn.sigmoid(z)
    ).astype(out_ref.dtype)


def _const_spec(shape):
    # Weight/bias block: full array, same block for every batch tile (stays in VMEM).
    return pl.BlockSpec(shape, lambda i: (0, 0))


_PARAM_ORDER = ("wp", "bp", "w1a", "w1b", "b1", "w2", "b2", "w3", "b3", "w4t", "b4")


@functools.partial(jax.jit, static_argnames=("batch_tile",))
def pcnet_forward(x_prot, x_comp, params, batch_tile=512):
    """Full PcNet forward in one Pallas kernel, gridded over the batch."""
    B = x_prot.shape[0]

    # Adaptive batch tile: single exact tile for small batches; otherwise a
    # 128-multiple tile so every block keeps (8,128)-aligned, unmasked stores.
    n_tiles = -(-B // batch_tile)
    if n_tiles == 1:
        TB = _round_up(max(B, 1), 8)
    else:
        TB = _round_up(-(-B // n_tiles), 128)
    B_pad = n_tiles * TB

    # Pad ONLY the batch remainder (common case: no copy at all).
    if B_pad != B:
        xp = jnp.pad(x_prot, ((0, B_pad - B), (0, 0)))
        xc = jnp.pad(x_comp, ((0, B_pad - B), (0, 0)))
    else:
        xp, xc = x_prot, x_comp

    in_specs = [
        pl.BlockSpec((TB, INPUT_SIZE_PROT), lambda i: (i, 0)),
        pl.BlockSpec((TB, INPUT_SIZE_COMP), lambda i: (i, 0)),
    ] + [_const_spec(params[k].shape) for k in _PARAM_ORDER]

    out_specs = pl.BlockSpec((TB, 2), lambda i: (i, 0))
    out_shape = jax.ShapeDtypeStruct((B_pad, 2), jnp.float32)

    # Megacore: batch-parallel split only when the batch is large enough that
    # duplicating the ~3.6 MB weight read per TensorCore is amortized.
    dims = ("parallel",) if B >= 2048 else ("arbitrary",)

    slab = pl.pallas_call(
        pcnet_kernel,
        grid=(n_tiles,),
        in_specs=in_specs,
        out_specs=out_specs,
        out_shape=out_shape,
        compiler_params=pltpu.CompilerParams(
            dimension_semantics=dims,
            vmem_limit_bytes=48 << 20,   # ~2x headroom over TB=512 working set; < 64 MiB/TC (v7x)
        ),
    )(xp, xc, *(params[k] for k in _PARAM_ORDER))

    return slab[:B, 0:1], slab[:B, 1:2]


def init_params(key, input_size_prot=1024, input_size_comp=196, hidden_size_prot=32):
    """PyTorch-Linear-style init; all weight prep (bf16 cast, [in,out] layout,
    fc_lin1 split, fc_lin4 transpose) happens ONCE here — nothing per call."""
    def linear(key, fan_in, fan_out):
        kw, kb = jax.random.split(key)
        bound = 1.0 / jnp.sqrt(jnp.float32(fan_in))
        w = jax.random.uniform(kw, (fan_in, fan_out), jnp.float32, -bound, bound)
        b = jax.random.uniform(kb, (1, fan_out), jnp.float32, -bound, bound)
        return w.astype(jnp.bfloat16), b   # weights bf16, biases f32

    k = jax.random.split(key, 5)
    wp, bp = linear(k[0], input_size_prot, hidden_size_prot)
    w1, b1 = linear(k[1], hidden_size_prot + input_size_comp, 1024)
    w2, b2 = linear(k[2], 1024, 1024)
    w3, b3 = linear(k[3], 1024, 512)
    w4, b4 = linear(k[4], 512, 1)
    return {
        "wp": wp, "bp": bp,
        # split fc_lin1 weight: rows [0:32] multiply h_prot, rows [32:228] multiply x_comp
        "w1a": w1[:hidden_size_prot, :], "w1b": w1[hidden_size_prot:, :], "b1": b1,
        "w2": w2, "b2": b2,
        "w3": w3, "b3": b3,
        "w4t": w4.T, "b4": b4,   # fc_lin4 stored as a [1, 512] row for the VPU reduce
    }


def pcnet_reference(x_prot, x_comp, p):
    """Pure-JAX reference mirroring the kernel's bf16-storage numerics."""
    f32, bf16 = jnp.float32, jnp.bfloat16
    up = lambda a: a.astype(f32)

    xp = up(x_prot.astype(bf16))
    xc = up(x_comp.astype(bf16))
    h = jnp.maximum(xp @ up(p["wp"]) + p["bp"], 0.0)
    h = jnp.maximum(up(h.astype(bf16)) @ up(p["w1a"]) + xc @ up(p["w1b"]) + p["b1"], 0.0)
    h = jnp.maximum(up(h.astype(bf16)) @ up(p["w2"]) + p["b2"], 0.0)
    h = jnp.maximum(up(h.astype(bf16)) @ up(p["w3"]) + p["b3"], 0.0)
    z = jnp.sum(h * up(p["w4t"]), axis=-1, keepdims=True) + p["b4"]
    return jnp.maximum(z, 0.0), jax.nn.sigmoid(z)


if __name__ == "__main__":
    key = jax.random.PRNGKey(0)
    k_prot, k_comp, k_params = jax.random.split(key, 3)

    B = 8
    x_prot = jax.random.normal(k_prot, (B, INPUT_SIZE_PROT), jnp.float32)
    x_comp = jax.random.normal(k_comp, (B, INPUT_SIZE_COMP), jnp.float32)
    params = init_params(k_params)

    out1, out2 = jax.block_until_ready(pcnet_forward(x_prot, x_comp, params))

    ref1, ref2 = pcnet_reference(x_prot, x_comp, params)
    assert out1.shape == (B, 1) and out2.shape == (B, 1)
    assert jnp.allclose(out1, ref1, atol=2e-3, rtol=2e-3)
    assert jnp.allclose(out2, ref2, atol=2e-3, rtol=2e-3)

    print("KERNEL_OK")
</pallas_src>

<mosaic_0001>
module attributes {stable_mosaic.version = 11 : i64} {
  func.func @pcnet_kernel(%arg0: i32, %arg1: memref<8x1024xf32, #tpu.memory_space<vmem>>, %arg2: memref<8x196xf32, #tpu.memory_space<vmem>>, %arg3: memref<1024x32xbf16, #tpu.memory_space<vmem>>, %arg4: memref<1x32xf32, #tpu.memory_space<vmem>>, %arg5: memref<32x1024xbf16, #tpu.memory_space<vmem>>, %arg6: memref<196x1024xbf16, #tpu.memory_space<vmem>>, %arg7: memref<1x1024xf32, #tpu.memory_space<vmem>>, %arg8: memref<1024x1024xbf16, #tpu.memory_space<vmem>>, %arg9: memref<1x1024xf32, #tpu.memory_space<vmem>>, %arg10: memref<1024x512xbf16, #tpu.memory_space<vmem>>, %arg11: memref<1x512xf32, #tpu.memory_space<vmem>>, %arg12: memref<1x512xbf16, #tpu.memory_space<vmem>>, %arg13: memref<1x1xf32, #tpu.memory_space<vmem>>, %arg14: memref<8x2xf32, #tpu.memory_space<vmem>>) attributes {dimension_semantics = [#tpu.dimension_semantics<arbitrary>], iteration_bounds = array<i64: 1>, scalar_prefetch = 0 : i64, scratch_operands = 0 : i64, tpu.core_type = #tpu.core_type<tc>, window_params = [{transform_indices = @transform_0, window_bounds = array<i64: 8, 1024>}, {transform_indices = @transform_1, window_bounds = array<i64: 8, 196>}, {pipeline_mode = #tpu.pipeline_mode<synchronous>, transform_indices = @transform_2, window_bounds = array<i64: 1024, 32>}, {pipeline_mode = #tpu.pipeline_mode<synchronous>, transform_indices = @transform_3, window_bounds = array<i64: 1, 32>}, {pipeline_mode = #tpu.pipeline_mode<synchronous>, transform_indices = @transform_4, window_bounds = array<i64: 32, 1024>}, {pipeline_mode = #tpu.pipeline_mode<synchronous>, transform_indices = @transform_5, window_bounds = array<i64: 196, 1024>}, {pipeline_mode = #tpu.pipeline_mode<synchronous>, transform_indices = @transform_6, window_bounds = array<i64: 1, 1024>}, {pipeline_mode = #tpu.pipeline_mode<synchronous>, transform_indices = @transform_7, window_bounds = array<i64: 1024, 1024>}, {pipeline_mode = #tpu.pipeline_mode<synchronous>, transform_indices = @transform_8, window_bounds = array<i64: 1, 1024>}, {pipeline_mode = #tpu.pipeline_mode<synchronous>, transform_indices = @transform_9, window_bounds = array<i64: 1024, 512>}, {pipeline_mode = #tpu.pipeline_mode<synchronous>, transform_indices = @transform_10, window_bounds = array<i64: 1, 512>}, {pipeline_mode = #tpu.pipeline_mode<synchronous>, transform_indices = @transform_11, window_bounds = array<i64: 1, 512>}, {pipeline_mode = #tpu.pipeline_mode<synchronous>, transform_indices = @transform_12, window_bounds = array<i64: 1, 1>}, {transform_indices = @transform_13, window_bounds = array<i64: 8, 2>}]} {
    %c0 = arith.constant 0 : index
    %c0_0 = arith.constant 0 : index
    %0 = vector.load %arg1[%c0, %c0_0] : memref<8x1024xf32, #tpu.memory_space<vmem>>, vector<8x1024xf32>
    %1 = arith.truncf %0 : vector<8x1024xf32> to vector<8x1024xbf16>
    %c0_1 = arith.constant 0 : index
    %c0_2 = arith.constant 0 : index
    %2 = vector.load %arg2[%c0_1, %c0_2] : memref<8x196xf32, #tpu.memory_space<vmem>>, vector<8x196xf32>
    %3 = arith.truncf %2 : vector<8x196xf32> to vector<8x196xbf16>
    %c0_3 = arith.constant 0 : index
    %c0_4 = arith.constant 0 : index
    %4 = vector.load %arg3[%c0_3, %c0_4] : memref<1024x32xbf16, #tpu.memory_space<vmem>>, vector<1024x32xbf16>
    %cst = arith.constant dense<0.000000e+00> : vector<8x32xf32>
    %5 = tpu.matmul %1, %4, %cst {dimension_numbers = #tpu.dot_dimension_numbers<[1], [0], [0], [1], [0, 0, 1, 1], [], []>} : vector<8x1024xbf16>, vector<1024x32xbf16>, vector<8x32xf32> -> vector<8x32xf32>
    %c0_5 = arith.constant 0 : index
    %c0_6 = arith.constant 0 : index
    %6 = vector.load %arg4[%c0_5, %c0_6] : memref<1x32xf32, #tpu.memory_space<vmem>>, vector<1x32xf32>
    %7 = vector.broadcast %6 : vector<1x32xf32> to vector<8x32xf32>
    %8 = arith.addf %5, %7 : vector<8x32xf32>
    %cst_7 = arith.constant 0.000000e+00 : f32
    %9 = vector.broadcast %cst_7 : f32 to vector<8x32xf32>
    %10 = arith.maximumf %8, %9 : vector<8x32xf32>
    %11 = arith.truncf %10 : vector<8x32xf32> to vector<8x32xbf16>
    %c0_8 = arith.constant 0 : index
    %c0_9 = arith.constant 0 : index
    %12 = vector.load %arg5[%c0_8, %c0_9] : memref<32x1024xbf16, #tpu.memory_space<vmem>>, vector<32x1024xbf16>
    %cst_10 = arith.constant dense<0.000000e+00> : vector<8x1024xf32>
    %13 = tpu.matmul %11, %12, %cst_10 {dimension_numbers = #tpu.dot_dimension_numbers<[1], [0], [0], [1], [0, 0, 1, 1], [], []>} : vector<8x32xbf16>, vector<32x1024xbf16>, vector<8x1024xf32> -> vector<8x1024xf32>
    %c0_11 = arith.constant 0 : index
    %c0_12 = arith.constant 0 : index
    %14 = vector.load %arg6[%c0_11, %c0_12] : memref<196x1024xbf16, #tpu.memory_space<vmem>>, vector<196x1024xbf16>
    %cst_13 = arith.constant dense<0.000000e+00> : vector<8x1024xf32>
    %15 = tpu.matmul %3, %14, %cst_13 {dimension_numbers = #tpu.dot_dimension_numbers<[1], [0], [0], [1], [0, 0, 1, 1], [], []>} : vector<8x196xbf16>, vector<196x1024xbf16>, vector<8x1024xf32> -> vector<8x1024xf32>
    %16 = arith.addf %13, %15 : vector<8x1024xf32>
    %c0_14 = arith.constant 0 : index
    %c0_15 = arith.constant 0 : index
    %17 = vector.load %arg7[%c0_14, %c0_15] : memref<1x1024xf32, #tpu.memory_space<vmem>>, vector<1x1024xf32>
    %18 = vector.broadcast %17 : vector<1x1024xf32> to vector<8x1024xf32>
    %19 = arith.addf %16, %18 : vector<8x1024xf32>
    %cst_16 = arith.constant 0.000000e+00 : f32
    %20 = vector.broadcast %cst_16 : f32 to vector<8x1024xf32>
    %21 = arith.maximumf %19, %20 : vector<8x1024xf32>
    %22 = arith.truncf %21 : vector<8x1024xf32> to vector<8x1024xbf16>
    %c0_17 = arith.constant 0 : index
    %c0_18 = arith.constant 0 : index
    %23 = vector.load %arg8[%c0_17, %c0_18] : memref<1024x1024xbf16, #tpu.memory_space<vmem>>, vector<1024x1024xbf16>
    %cst_19 = arith.constant dense<0.000000e+00> : vector<8x1024xf32>
    %24 = tpu.matmul %22, %23, %cst_19 {dimension_numbers = #tpu.dot_dimension_numbers<[1], [0], [0], [1], [0, 0, 1, 1], [], []>} : vector<8x1024xbf16>, vector<1024x1024xbf16>, vector<8x1024xf32> -> vector<8x1024xf32>
    %c0_20 = arith.constant 0 : index
    %c0_21 = arith.constant 0 : index
    %25 = vector.load %arg9[%c0_20, %c0_21] : memref<1x1024xf32, #tpu.memory_space<vmem>>, vector<1x1024xf32>
    %26 = vector.broadcast %25 : vector<1x1024xf32> to vector<8x1024xf32>
    %27 = arith.addf %24, %26 : vector<8x1024xf32>
    %cst_22 = arith.constant 0.000000e+00 : f32
    %28 = vector.broadcast %cst_22 : f32 to vector<8x1024xf32>
    %29 = arith.maximumf %27, %28 : vector<8x1024xf32>
    %30 = arith.truncf %29 : vector<8x1024xf32> to vector<8x1024xbf16>
    %c0_23 = arith.constant 0 : index
    %c0_24 = arith.constant 0 : index
    %31 = vector.load %arg10[%c0_23, %c0_24] : memref<1024x512xbf16, #tpu.memory_space<vmem>>, vector<1024x512xbf16>
    %cst_25 = arith.constant dense<0.000000e+00> : vector<8x512xf32>
    %32 = tpu.matmul %30, %31, %cst_25 {dimension_numbers = #tpu.dot_dimension_numbers<[1], [0], [0], [1], [0, 0, 1, 1], [], []>} : vector<8x1024xbf16>, vector<1024x512xbf16>, vector<8x512xf32> -> vector<8x512xf32>
    %c0_26 = arith.constant 0 : index
    %c0_27 = arith.constant 0 : index
    %33 = vector.load %arg11[%c0_26, %c0_27] : memref<1x512xf32, #tpu.memory_space<vmem>>, vector<1x512xf32>
    %34 = vector.broadcast %33 : vector<1x512xf32> to vector<8x512xf32>
    %35 = arith.addf %32, %34 : vector<8x512xf32>
    %cst_28 = arith.constant 0.000000e+00 : f32
    %36 = vector.broadcast %cst_28 : f32 to vector<8x512xf32>
    %37 = arith.maximumf %35, %36 : vector<8x512xf32>
    %c0_29 = arith.constant 0 : index
    %c0_30 = arith.constant 0 : index
    %38 = vector.load %arg12[%c0_29, %c0_30] : memref<1x512xbf16, #tpu.memory_space<vmem>>, vector<1x512xbf16>
    %39 = arith.extf %38 : vector<1x512xbf16> to vector<1x512xf32>
    %40 = vector.broadcast %39 : vector<1x512xf32> to vector<8x512xf32>
    %41 = arith.mulf %37, %40 : vector<8x512xf32>
    %cst_31 = arith.constant dense<0.000000e+00> : vector<8xf32>
    %42 = vector.multi_reduction <add>, %41, %cst_31 [1] : vector<8x512xf32> to vector<8xf32>
    %43 = vector.shape_cast %42 : vector<8xf32> to vector<8x1xf32>
    %c0_32 = arith.constant 0 : index
    %c0_33 = arith.constant 0 : index
    %44 = vector.load %arg13[%c0_32, %c0_33] : memref<1x1xf32, #tpu.memory_space<vmem>>, vector<1x1xf32>
    %45 = vector.broadcast %44 : vector<1x1xf32> to vector<8x1xf32>
    %46 = arith.addf %43, %45 : vector<8x1xf32>
    %47 = tpu.iota {dimensions = array<i32: 1>} : vector<8x2xi32>
    %c0_i32 = arith.constant 0 : i32
    %48 = vector.broadcast %c0_i32 : i32 to vector<8x2xi32>
    %49 = arith.cmpi eq, %47, %48 : vector<8x2xi32>
    %cst_34 = arith.constant 0.000000e+00 : f32
    %50 = vector.broadcast %cst_34 : f32 to vector<8x1xf32>
    %51 = arith.maximumf %46, %50 : vector<8x1xf32>
    %52 = arith.negf %46 : vector<8x1xf32>
    %53 = math.exp %52 : vector<8x1xf32>
    %cst_35 = arith.constant 1.000000e+00 : f32
    %54 = vector.broadcast %cst_35 : f32 to vector<8x1xf32>
    %55 = arith.addf %54, %53 : vector<8x1xf32>
    %56 = arith.divf %54, %55 : vector<8x1xf32>
    %57 = vector.shape_cast %51 : vector<8x1xf32> to vector<8x1xf32>
    %58 = vector.broadcast %57 : vector<8x1xf32> to vector<8x2xf32>
    %59 = vector.shape_cast %56 : vector<8x1xf32> to vector<8x1xf32>
    %60 = vector.broadcast %59 : vector<8x1xf32> to vector<8x2xf32>
    %61 = arith.select %49, %58, %60 : vector<8x2xi1>, vector<8x2xf32>
    %c0_36 = arith.constant 0 : index
    %c0_37 = arith.constant 0 : index
    %62 = vector.load %arg14[%c0_36, %c0_37] : memref<8x2xf32, #tpu.memory_space<vmem>>, vector<8x2xf32>
    tpu.vector_store %arg14[%c0_36, %c0_37], %61 {strides = array<i32>} : memref<8x2xf32, #tpu.memory_space<vmem>>, vector<8x2xf32>,
    return
  }
  func.func @transform_0(%arg0: i32) -> (i32, i32) {
    %c0_i32 = arith.constant 0 : i32
    %c0_i32_0 = arith.constant 0 : i32
    return %arg0, %c0_i32 : i32, i32
  }
  func.func @transform_1(%arg0: i32) -> (i32, i32) {
    %c0_i32 = arith.constant 0 : i32
    %c0_i32_0 = arith.constant 0 : i32
    return %arg0, %c0_i32 : i32, i32
  }
  func.func @transform_2(%arg0: i32) -> (i32, i32) {
    %c0_i32 = arith.constant 0 : i32
    %c0_i32_0 = arith.constant 0 : i32
    %c0_i32_1 = arith.constant 0 : i32
    return %c0_i32, %c0_i32_0 : i32, i32
  }
  func.func @transform_3(%arg0: i32) -> (i32, i32) {
    %c0_i32 = arith.constant 0 : i32
    %c0_i32_0 = arith.constant 0 : i32
    %c0_i32_1 = arith.constant 0 : i32
    return %c0_i32, %c0_i32_0 : i32, i32
  }
  func.func @transform_4(%arg0: i32) -> (i32, i32) {
    %c0_i32 = arith.constant 0 : i32
    %c0_i32_0 = arith.constant 0 : i32
    %c0_i32_1 = arith.constant 0 : i32
    return %c0_i32, %c0_i32_0 : i32, i32
  }
  func.func @transform_5(%arg0: i32) -> (i32, i32) {
    %c0_i32 = arith.constant 0 : i32
    %c0_i32_0 = arith.constant 0 : i32
    %c0_i32_1 = arith.constant 0 : i32
    return %c0_i32, %c0_i32_0 : i32, i32
  }
  func.func @transform_6(%arg0: i32) -> (i32, i32) {
    %c0_i32 = arith.constant 0 : i32
    %c0_i32_0 = arith.constant 0 : i32
    %c0_i32_1 = arith.constant 0 : i32
    return %c0_i32, %c0_i32_0 : i32, i32
  }
  func.func @transform_7(%arg0: i32) -> (i32, i32) {
    %c0_i32 = arith.constant 0 : i32
    %c0_i32_0 = arith.constant 0 : i32
    %c0_i32_1 = arith.constant 0 : i32
    return %c0_i32, %c0_i32_0 : i32, i32
  }
  func.func @transform_8(%arg0: i32) -> (i32, i32) {
    %c0_i32 = arith.constant 0 : i32
    %c0_i32_0 = arith.constant 0 : i32
    %c0_i32_1 = arith.constant 0 : i32
    return %c0_i32, %c0_i32_0 : i32, i32
  }
  func.func @transform_9(%arg0: i32) -> (i32, i32) {
    %c0_i32 = arith.constant 0 : i32
    %c0_i32_0 = arith.constant 0 : i32
    %c0_i32_1 = arith.constant 0 : i32
    return %c0_i32, %c0_i32_0 : i32, i32
  }
  func.func @transform_10(%arg0: i32) -> (i32, i32) {
    %c0_i32 = arith.constant 0 : i32
    %c0_i32_0 = arith.constant 0 : i32
    %c0_i32_1 = arith.constant 0 : i32
    return %c0_i32, %c0_i32_0 : i32, i32
  }
  func.func @transform_11(%arg0: i32) -> (i32, i32) {
    %c0_i32 = arith.constant 0 : i32
    %c0_i32_0 = arith.constant 0 : i32
    %c0_i32_1 = arith.constant 0 : i32
    return %c0_i32, %c0_i32_0 : i32, i32
  }
  func.func @transform_12(%arg0: i32) -> (i32, i32) {
    %c0_i32 = arith.constant 0 : i32
    %c0_i32_0 = arith.constant 0 : i32
    %c0_i32_1 = arith.constant 0 : i32
    return %c0_i32, %c0_i32_0 : i32, i32
  }
  func.func @transform_13(%arg0: i32) -> (i32, i32) {
    %c0_i32 = arith.constant 0 : i32
    %c0_i32_0 = arith.constant 0 : i32
    return %arg0, %c0_i32 : i32, i32
  }
}

</mosaic_0001>

<bundles_post_ra>
// kernel: pcnet_forward.1
= control target key start
LH: loop header
LB: loop body
LE: loop exit
PB: predicated region body
PF: predicated region fallthrough
CT: control target
= control target key end

     0   :  { %s10189_s0 = inlined_call_operand.hbm [shape: f32[8,1024], index: 0, kind: input, shape index: {}]   ;;  %s10190_s1 = inlined_call_operand.hbm [shape: f32[8,196], index: 1, kind: input, shape index: {}]   ;;  %s10191_s2 = inlined_call_operand.vmem [shape: bf16[1024,32], index: 2, kind: input, shape index: {}]   ;;  %s10192_s3 = inlined_call_operand.hbm [shape: f32[1,32], index: 3, kind: input, shape index: {}]   ;;  %s10193_s4 = inlined_call_operand.hbm [shape: bf16[32,1024], index: 4, kind: input, shape index: {}]   ;;  %s10194_s5 = inlined_call_operand.hbm [shape: bf16[196,1024], index: 5, kind: input, shape index: {}]   ;;  %s10195_s6 = inlined_call_operand.hbm [shape: f32[1,1024], index: 6, kind: input, shape index: {}]   ;;  %s10196_s7 = inlined_call_operand.hbm [shape: bf16[1024,1024], index: 7, kind: input, shape index: {}]   ;;  %s10197_s8 = inlined_call_operand.hbm [shape: f32[1,1024], index: 8, kind: input, shape index: {}]   ;;  %s10198_s9 = inlined_call_operand.hbm [shape: bf16[1024,512], index: 9, kind: input, shape index: {}]   ;;  %s10199_s10 = inlined_call_operand.hbm [shape: f32[1,512], index: 10, kind: input, shape index: {}]   ;;  %s10200_s11 = inlined_call_operand.hbm [shape: bf16[1,512], index: 11, kind: input, shape index: {}]   ;;  %s10201_s12 = inlined_call_operand.<no memory space> [shape: f32[1,1], index: 12, kind: input, shape index: {}]   ;;  %s10202_s13 = inlined_call_operand.vmem [shape: f32[8,2], index: 13, kind: output, shape index: {}]  }
   0x1   :  { %v18_v0 = vstv %s10201_s12 }
   0x2   :  { %19 = vst [vmem:[#allocation2] sm:$0x1] %v18_v0 }
   0x3   :  { %20 = vsyncpa [#allocation4], 0 }
   0x4   :  { %21 = vsyncpa [#allocation6], 0 }
   0x5   :  { %22 = vsyncpa [#allocation9], 0 }
   0x6   :  { %23 = vsyncpa [#allocation12], 0 }
   0x7   :  { %24 = vsyncpa [#allocation15], 0 }
   0x8   :  { %25 = vsyncpa [#allocation18], 0  ;;  %s9537_s27 = smov [#allocation5]   ;;  %s9538_s29 = smov [#allocation8]  }
   0x9   :  { %s42_s28 = sshll.u32 %s9537_s27, 4  ;;  %s63_s30 = sshll.u32 %s9538_s29, 4  ;;  %s43_s28 = int_to_ptr.vmem [resolvable:$true] %s42_s28  ;;  %s64_s30 = int_to_ptr.vmem [resolvable:$true] %s63_s30 }
   0xa   :  { %s9313_s14 = scalar_lea.vmem %s43_s28, 256  ;;  %p9318_p1 = scmp.lt.s32.totalorder %s43_s28, %s43_s28 }
   0xb   :  { %p9314_p0 = scmp.ne.s32.totalorder %s43_s28, %s9313_s14  ;;  %p9319_p2 = scmp.lt.s32.totalorder %s9313_s14, %s9313_s14 }
   0xd   :  { %p9320_p3 = por %p9319_p2, %p9318_p1 }
   0xf   :  { %p9321_p4 = pnand %p9320_p3, %p9314_p0 }
  0x11   :  { %9324 = shalt.err (!%p9321_p4)
}
  0x12   :  { %45 = dma.hbm_to_vmem [thread:$0]  %s10190_s1, 256, %s43_s28, [#allocation6]  }
  0x13   :  { %s9333_s16 = scalar_lea.vmem %s64_s30, 2048  ;;  %p9338_p6 = scmp.lt.s32.totalorder %s64_s30, %s64_s30 }
  0x14   :  { %p9334_p5 = scmp.ne.s32.totalorder %s64_s30, %s9333_s16  ;;  %p9339_p7 = scmp.lt.s32.totalorder %s9333_s16, %s9333_s16 }
  0x16   :  { %p9340_p8 = por %p9339_p7, %p9338_p6 }
  0x18   :  { %p9341_p9 = pnand %p9340_p8, %p9334_p5 }
  0x1a   :  { %9344 = shalt.err (!%p9341_p9)
}
  0x1b   :  { %s9539_s17 = smov 512   ;;  %s9540_s18 = smov 32  }
  0x1c   :  { %69 = dma.hbm_to_vmem [thread:$0]  %s10193_s4, 2048, %s64_s30, [#allocation9], %s9539_s17, %s9539_s17, %s9540_s18  }
  0x1d   :  { %s9541_s21 = smov [#allocation11]   ;;  %s9542_s23 = smov [#allocation14]  }
  0x1e   :  { %s88_s22 = sshll.u32 %s9541_s21, 4  ;;  %s110_s1 = sshll.u32 %s9542_s23, 4  ;;  %s89_s22 = int_to_ptr.vmem [resolvable:$true] %s88_s22  ;;  %s111_s1 = int_to_ptr.vmem [resolvable:$true] %s110_s1 }
  0x1f   :  { %s9353_s24 = scalar_lea.vmem %s89_s22, 128  ;;  %p9358_p11 = scmp.lt.s32.totalorder %s89_s22, %s89_s22 }
  0x20   :  { %p9354_p10 = scmp.ne.s32.totalorder %s89_s22, %s9353_s24  ;;  %p9359_p12 = scmp.lt.s32.totalorder %s9353_s24, %s9353_s24 }
  0x22   :  { %p9360_p13 = por %p9359_p12, %p9358_p11 }
  0x24   :  { %p9361_p0 = pnand %p9360_p13, %p9354_p10 }
  0x26   :  { %9364 = shalt.err (!%p9361_p0)
}
  0x27   :  { %91 = dma.hbm_to_vmem [thread:$0]  %s10195_s6, 128, %s89_s22, [#allocation12]  }
  0x28   :  { %s9373_s27 = scalar_lea.vmem %s111_s1, 128  ;;  %p9378_p2 = scmp.lt.s32.totalorder %s111_s1, %s111_s1 }
  0x29   :  { %p9374_p1 = scmp.ne.s32.totalorder %s111_s1, %s9373_s27  ;;  %p9379_p3 = scmp.lt.s32.totalorder %s9373_s27, %s9373_s27 }
  0x2b   :  { %p9380_p4 = por %p9379_p3, %p9378_p2 }
  0x2d   :  { %p9381_p5 = pnand %p9380_p4, %p9374_p1 }
  0x2f   :  { %9384 = shalt.err (!%p9381_p5)
}
  0x30   :  { %113 = dma.hbm_to_vmem [thread:$0]  %s10197_s8, 128, %s111_s1, [#allocation15]  }
  0x31   :  { %s9543_s29 = smov [#allocation17]   ;;  %s9544_s14 = smov [#allocation3]  }
  0x32   :  { %s132_s30 = sshll.u32 %s9543_s29, 4  ;;  %s32_s12 = sshll.u32 %s9544_s14, 4  ;;  %s133_s30 = int_to_ptr.vmem [resolvable:$true] %s132_s30  ;;  %s33_s12 = int_to_ptr.vmem [resolvable:$true] %s32_s12 }
  0x33   :  { %s9393_s15 = scalar_lea.vmem %s133_s30, 64  ;;  %p9398_p7 = scmp.lt.s32.totalorder %s133_s30, %s133_s30 }
  0x34   :  { %p9394_p6 = scmp.ne.s32.totalorder %s133_s30, %s9393_s15  ;;  %p9399_p8 = scmp.lt.s32.totalorder %s9393_s15, %s9393_s15 }
  0x36   :  { %p9400_p9 = por %p9399_p8, %p9398_p7 }
  0x38   :  { %p9401_p10 = pnand %p9400_p9, %p9394_p6 }
  0x3a   :  { %9404 = shalt.err (!%p9401_p10)
}
  0x3b   :  { %135 = dma.hbm_to_vmem [thread:$0]  %s10199_s10, 64, %s133_s30, [#allocation18]  }
  0x3c   :  { %s9413_s19 = scalar_lea.vmem %s33_s12, 1024  ;;  %p9418_p12 = scmp.lt.s32.totalorder %s33_s12, %s33_s12 }
  0x3d   :  { %p9414_p11 = scmp.ne.s32.totalorder %s33_s12, %s9413_s19  ;;  %p9419_p13 = scmp.lt.s32.totalorder %s9413_s19, %s9413_s19 }
  0x3f   :  { %p9420_p0 = por %p9419_p13, %p9418_p12 }
  0x41   :  { %p9421_p1 = pnand %p9420_p0, %p9414_p11 }
  0x43   :  { %9424 = shalt.err (!%p9421_p1)
}
  0x44   :  { %35 = dma.hbm_to_vmem [thread:$0]  %s10189_s0, 1024, %s33_s12, [#allocation4]  }
  0x45   :  { %s9545_s21 = smov [#allocation7]   ;;  %s9546_s23 = smov [#allocation10]  }
  0x46   :  { %s54_s22 = sshll.u32 %s9545_s21, 4  ;;  %s75_s1 = sshll.u32 %s9546_s23, 4  ;;  %s55_s22 = int_to_ptr.vmem [resolvable:$true] %s54_s22  ;;  %s76_s1 = int_to_ptr.vmem [resolvable:$true] %s75_s1 }
  0x47   :  { %s9433_s24 = scalar_lea.vmem %s55_s22, 16  ;;  %s9437_s10 = scalar_lea.vmem %s55_s22, 32 }
  0x48   :  { %p9434_p2 = scmp.ne.s32.totalorder %s55_s22, %s9433_s24  ;;  %p9438_p3 = scmp.lt.s32.totalorder %s55_s22, %s55_s22 }
  0x49   :  { %p9439_p4 = scmp.lt.s32.totalorder %s9437_s10, %s9433_s24 }
  0x4b   :  { %p9440_p5 = por %p9439_p4, %p9438_p3 }
  0x4d   :  { %p9441_p6 = pnand %p9440_p5, %p9434_p2 }
  0x4f   :  { %9444 = shalt.err (!%p9441_p6)
}
  0x50   :  { %57 = dma.hbm_to_vmem [thread:$0]  %s10192_s3, 16, %s55_s22, [#allocation6]  }
  0x51   :  { %s9453_s27 = scalar_lea.vmem %s76_s1, 12800  ;;  %p9458_p8 = scmp.lt.s32.totalorder %s76_s1, %s76_s1 }
  0x52   :  { %p9454_p7 = scmp.ne.s32.totalorder %s76_s1, %s9453_s27  ;;  %p9459_p9 = scmp.lt.s32.totalorder %s9453_s27, %s9453_s27 }
  0x54   :  { %p9460_p10 = por %p9459_p9, %p9458_p8 }
  0x56   :  { %p9461_p11 = pnand %p9460_p10, %p9454_p7 }
  0x58   :  { %9464 = shalt.err (!%p9461_p11)
}
  0x59   :  { %81 = dma.hbm_to_vmem [thread:$0]  %s10194_s5, 12800, %s76_s1, [#allocation9], %s9539_s17, %s9539_s17, %s9540_s18  }
  0x5a   :  { %s9547_s28 = smov [#allocation13]   ;;  %s9548_s30 = smov [#allocation16]  }
  0x5b   :  { %s97_s29 = sshll.u32 %s9547_s28, 4  ;;  %s119_s14 = sshll.u32 %s9548_s30, 4  ;;  %s98_s29 = int_to_ptr.vmem [resolvable:$true] %s97_s29  ;;  %s120_s14 = int_to_ptr.vmem [resolvable:$true] %s119_s14 }
  0x5c   :  { %s9473_s3 = scalar_lea.vmem %s98_s29, 65536  ;;  %p9478_p13 = scmp.lt.s32.totalorder %s98_s29, %s98_s29 }
  0x5d   :  { %p9474_p12 = scmp.ne.s32.totalorder %s98_s29, %s9473_s3  ;;  %p9479_p0 = scmp.lt.s32.totalorder %s9473_s3, %s9473_s3 }
  0x5f   :  { %p9480_p1 = por %p9479_p0, %p9478_p13 }
  0x61   :  { %p9481_p2 = pnand %p9480_p1, %p9474_p12 }
  0x63   :  { %9484 = shalt.err (!%p9481_p2)
}
  0x64   :  { %103 = dma.hbm_to_vmem [thread:$0]  %s10196_s7, 65536, %s98_s29, [#allocation12], %s9539_s17, %s9539_s17, %s9540_s18  }
  0x65   :  { %s9493_s5 = scalar_lea.vmem %s120_s14, 32768  ;;  %p9498_p4 = scmp.lt.s32.totalorder %s120_s14, %s120_s14 }
  0x66   :  { %p9494_p3 = scmp.ne.s32.totalorder %s120_s14, %s9493_s5  ;;  %p9499_p5 = scmp.lt.s32.totalorder %s9493_s5, %s9493_s5 }
  0x68   :  { %p9500_p6 = por %p9499_p5, %p9498_p4 }
  0x6a   :  { %p9501_p7 = pnand %p9500_p6, %p9494_p3 }
  0x6c   :  { %9504 = shalt.err (!%p9501_p7)
}
  0x6d   :  { %s9549_s6 = smov 256   ;;  %s9550_s16 = smov 16  }
  0x6e   :  { %125 = dma.hbm_to_vmem [thread:$0]  %s10198_s9, 32768, %s120_s14, [#allocation15], %s9549_s6, %s9549_s6, %s9550_s16  }
  0x6f   :  { %s9551_s20 = smov [#allocation19]  }
  0x70   :  { %s142_s21 = sshll.u32 %s9551_s20, 4  ;;  %s143_s21 = int_to_ptr.vmem [resolvable:$true] %s142_s21 }
  0x71   :  { %s9513_s22 = scalar_lea.vmem %s143_s21, 64  ;;  %p9518_p9 = scmp.lt.s32.totalorder %s143_s21, %s143_s21 }
  0x72   :  { %p9514_p8 = scmp.ne.s32.totalorder %s143_s21, %s9513_s22  ;;  %p9519_p10 = scmp.lt.s32.totalorder %s9513_s22, %s9513_s22 }
  0x74   :  { %p9520_p11 = por %p9519_p10, %p9518_p9 }
  0x76   :  { %p9521_p12 = pnand %p9520_p11, %p9514_p8 }
  0x78   :  { %9524 = shalt.err (!%p9521_p12)
}
  0x79   :  { %145 = dma.hbm_to_vmem [thread:$0]  %s10200_s11, 64, %s143_s21, [#allocation18]  }
  0x7a   :  { %9525 = dma.done.wait [#allocation4], 1024  }
  0x7b   :  { %9526 = vsyncadd [#allocation4], 4294966272 }
  0x7c   :  { %9527 = dma.done.wait [#allocation6], 272  }
  0x7d   :  { %9528 = vsyncadd [#allocation6], 4294967024 }
  0x7e   :  { %9529 = dma.done.wait [#allocation9], 14848  }
  0x7f   :  { %9530 = vsyncadd [#allocation9], 4294952448 }
  0x80   :  { %9531 = dma.done.wait [#allocation12], 65664  }
  0x81   :  { %9532 = vsyncadd [#allocation12], 4294901632 }
  0x82   :  { %9533 = dma.done.wait [#allocation15], 32896  }
  0x83   :  { %9534 = vsyncadd [#allocation15], 4294934400 }
  0x84   :  { %9535 = dma.done.wait [#allocation18], 128  }
  0x85   :  { %9536 = vsyncadd [#allocation18], 4294967168  ;;  %v8844_v1 = vld [vmem:[%s10191_s2 + $0x78] sm:$0xff]   ;;  %v8848_v5 = vld [vmem:[%s10191_s2 + $0x70] sm:$0xff]   ;;  %vm1499_vm0 = vcmask 556032   ;;  %vm1503_vm1 = vcmask 1041408  }
  0x86   :  { %v8845_v2 = vld [vmem:[%s10191_s2 + $0xf8] sm:$0xff]   ;;  %8738 = vmatprep.subr.bf16.mxu0 %v8844_v1  ;;  %v8849_v6 = vld [vmem:[%s10191_s2 + $0xf0] sm:$0xff]   ;;  %v8852_v9 = vld [vmem:[%s10191_s2 + $0x68] sm:$0xff]   ;;  %vm1772_vm2 = vcmask 261120   ;;  %vm7759_vm4 = vcmask 15360  }
  0x87   :  { %v8846_v3 = vld [vmem:[%s10191_s2 + $0x38] sm:$0xff]   ;;  %8760 = vmatprep.subr.bf16.mxu1 %v8845_v2  ;;  %v8850_v7 = vld [vmem:[%s10191_s2 + $0x30] sm:$0xff]   ;;  %v8853_v10 = vld [vmem:[%s10191_s2 + $0xe8] sm:$0xff]  }
  0x88   :  { %v8847_v4 = vld [vmem:[%s10191_s2 + $0xb8] sm:$0xff]   ;;  %8739 = vmatpush3.bf16.msra.mxu0 %v8846_v3  ;;  %v8851_v8 = vld [vmem:[%s10191_s2 + $0xb0] sm:$0xff]   ;;  %v8854_v11 = vld [vmem:[%s10191_s2 + $0x28] sm:$0xff]  }
  0x89   :  { %8761 = vmatpush3.bf16.msra.mxu1 %v8847_v4  ;;  %8740 = vmatprep.subr.bf16.mxu0 %v8848_v5  ;;  %v8855_v12 = vld [vmem:[%s10191_s2 + $0xa8] sm:$0xff]   ;;  %v8856_v13 = vld [vmem:[%s10191_s2 + $0x60] sm:$0xff]   ;;  %v8860_v17 = vld [vmem:[%s10191_s2 + $0x58] sm:$0xff]  }
  0x8a   :  { %8762 = vmatprep.subr.bf16.mxu1 %v8849_v6  ;;  %v8857_v14 = vld [vmem:[%s10191_s2 + $0xe0] sm:$0xff]   ;;  %v8861_v18 = vld [vmem:[%s10191_s2 + $0xd8] sm:$0xff]   ;;  %v8864_v21 = vld [vmem:[%s10191_s2 + $0x50] sm:$0xff]  }
  0x8b   :  { %v8858_v15 = vld [vmem:[%s10191_s2 + $0x20] sm:$0xff]   ;;  %v8862_v19 = vld [vmem:[%s10191_s2 + $0x18] sm:$0xff]   ;;  %v8865_v22 = vld [vmem:[%s10191_s2 + $0xd0] sm:$0xff]  }
  0x8c   :  { %8741 = vmatpush3.bf16.msra.mxu0 %v8850_v7  ;;  %v8859_v16 = vld [vmem:[%s10191_s2 + $0xa0] sm:$0xff]   ;;  %v8863_v20 = vld [vmem:[%s10191_s2 + $0x98] sm:$0xff]   ;;  %v8866_v23 = vld [vmem:[%s10191_s2 + $0x10] sm:$0xff]  }
  0x8d   :  { %8763 = vmatpush3.bf16.msra.mxu1 %v8851_v8  ;;  %8742 = vmatprep.subr.bf16.mxu0 %v8852_v9  ;;  %v8867_v24 = vld [vmem:[%s10191_s2 + $0x90] sm:$0xff]   ;;  %v8868_v25 = vld [vmem:[%s10191_s2 + $0x48] sm:$0xff]   ;;  %v8872_v29 = vld [vmem:[%s10191_s2 + $0x40] sm:$0xff]  }
  0x8e   :  { %8764 = vmatprep.subr.bf16.mxu1 %v8853_v10  ;;  %v8869_v26 = vld [vmem:[%s10191_s2 + $0xc8] sm:$0xff]   ;;  %v8873_v30 = vld [vmem:[%s10191_s2 + $0xc0] sm:$0xff]   ;;  %v184_v39 = vld [vmem:[#allocation3 + $0x10] sm:$0xff] }
  0x8f   :  { %v8870_v27 = vld [vmem:[%s10191_s2 + $0x8] sm:$0xff]   ;;  %v8874_v31 = vld [vmem:[%s10191_s2] sm:$0xff]   ;;  %v192_v40 = vpack.c.bf16 %v184_v39, %v184_v39  ;;  %v8876_v41 = vld [vmem:[%s10191_s2 + $0x178] sm:$0xff]  }
  0x90   :  { %8743 = vmatpush3.bf16.msra.mxu0 %v8854_v11  ;;  %v8871_v28 = vld [vmem:[%s10191_s2 + $0x88] sm:$0xff]   ;;  %v8875_v32 = vld [vmem:[%s10191_s2 + $0x80] sm:$0xff]   ;;  %v8877_v42 = vld [vmem:[%s10191_s2 + $0x1f8] sm:$0xff]  }
  0x91   :  { %8765 = vmatpush3.bf16.msra.mxu1 %v8855_v12  ;;  %8744 = vmatprep.subr.bf16.mxu0 %v8856_v13  ;;  %v183_v33 = vld [vmem:[#allocation3 + $0x8] sm:$0xff]  ;;  %v185_v34 = vld [vmem:[#allocation3 + $0x18] sm:$0xff]  ;;  %v182_v35 = vld [vmem:[#allocation3] sm:$0xff] }
  0x92   :  { %8766 = vmatprep.subr.bf16.mxu1 %v8857_v14  ;;  %v191_v36 = vpack.c.bf16 %v183_v33, %v183_v33  ;;  %v193_v37 = vpack.c.bf16 %v185_v34, %v185_v34  ;;  %v190_v38 = vpack.c.bf16 %v182_v35, %v182_v35  ;;  %v8878_v43 = vld [vmem:[%s10191_s2 + $0x138] sm:$0xff]   ;;  %v8880_v45 = vld [vmem:[%s10191_s2 + $0x170] sm:$0xff]   ;;  %v8884_v49 = vld [vmem:[%s10191_s2 + $0x168] sm:$0xff]  }
  0x93   :  { %v8879_v44 = vld [vmem:[%s10191_s2 + $0x1b8] sm:$0xff]   ;;  %v8881_v46 = vld [vmem:[%s10191_s2 + $0x1f0] sm:$0xff]   ;;  %v8885_v50 = vld [vmem:[%s10191_s2 + $0x1e8] sm:$0xff]  }
  0x94   :  { %8745 = vmatpush3.bf16.msra.mxu0 %v8858_v15  ;;  %753 = vmatprep.mubr.bf16.mxu0 %v191_v36  ;;  %v8882_v47 = vld [vmem:[%s10191_s2 + $0x130] sm:$0xff]   ;;  %v8886_v51 = vld [vmem:[%s10191_s2 + $0x128] sm:$0xff]   ;;  %v8888_v53 = vld [vmem:[%s10191_s2 + $0x160] sm:$0xff]  }
  0x95   :  { %8767 = vmatpush3.bf16.msra.mxu1 %v8859_v16  ;;  %8746 = vmatprep.subr.bf16.mxu0 %v8860_v17  ;;  %v8883_v48 = vld [vmem:[%s10191_s2 + $0x1b0] sm:$0xff]   ;;  %v8887_v52 = vld [vmem:[%s10191_s2 + $0x1a8] sm:$0xff]   ;;  %v8889_v54 = vld [vmem:[%s10191_s2 + $0x1e0] sm:$0xff]  }
  0x96   :  { %8768 = vmatprep.subr.bf16.mxu1 %v8861_v18  ;;  %793 = vmatprep.mubr.bf16.mxu1 %v193_v37  ;;  %v8890_v55 = vld [vmem:[%s10191_s2 + $0x120] sm:$0xff]   ;;  %v8892_v57 = vld [vmem:[%s10191_s2 + $0x158] sm:$0xff]   ;;  %v8896_v61 = vld [vmem:[%s10191_s2 + $0x150] sm:$0xff]  }
  0x97   :  { %v8891_v56 = vld [vmem:[%s10191_s2 + $0x1a0] sm:$0xff]   ;;  %v8893_v58 = vld [vmem:[%s10191_s2 + $0x1d8] sm:$0xff]   ;;  %v8897_v62 = vld [vmem:[%s10191_s2 + $0x1d0] sm:$0xff]  }
  0x98   :  { %8747 = vmatpush3.bf16.msra.mxu0 %v8862_v19  ;;  %v8894_v59 = vld [vmem:[%s10191_s2 + $0x118] sm:$0xff]   ;;  %v8898_v63 = vld [vmem:[%s10191_s2 + $0x110] sm:$0xff]   ;;  %v8900_v1 = vld [vmem:[%s10191_s2 + $0x148] sm:$0xff]  }
  0x99   :  { %8769 = vmatpush3.bf16.msra.mxu1 %v8863_v20  ;;  %8748 = vmatprep.subr.bf16.mxu0 %v8864_v21  ;;  %v8895_v60 = vld [vmem:[%s10191_s2 + $0x198] sm:$0xff]   ;;  %v8899_v0 = vld [vmem:[%s10191_s2 + $0x190] sm:$0xff]   ;;  %v8901_v2 = vld [vmem:[%s10191_s2 + $0x1c8] sm:$0xff]  }
  0x9a   :  { %8770 = vmatprep.subr.bf16.mxu1 %v8865_v22  ;;  %v8902_v3 = vld [vmem:[%s10191_s2 + $0x108] sm:$0xff]   ;;  %v8904_v5 = vld [vmem:[%s10191_s2 + $0x140] sm:$0xff]   ;;  %v188_v14 = vld [vmem:[#allocation3 + $0x30] sm:$0xff] }
  0x9b   :  { %v8903_v4 = vld [vmem:[%s10191_s2 + $0x188] sm:$0xff]   ;;  %v8905_v6 = vld [vmem:[%s10191_s2 + $0x1c0] sm:$0xff]   ;;  %v955_v15 = vld [vmem:[#allocation10 + $0x1c0] sm:$0xff]  ;;  %v196_v17 = vpack.c.bf16 %v188_v14, %v188_v14 }
  0x9c   :  { %8749 = vmatpush3.bf16.msra.mxu0 %v8866_v23  ;;  %v8906_v7 = vld [vmem:[%s10191_s2 + $0x100] sm:$0xff]   ;;  %v187_v9 = vld [vmem:[#allocation3 + $0x28] sm:$0xff]  ;;  %v959_v18 = vld [vmem:[#allocation10 + $0x1e0] sm:$0xff] }
  0x9d   :  { %8771 = vmatpush3.bf16.msra.mxu1 %v8867_v24  ;;  %8750 = vmatprep.subr.bf16.mxu0 %v8868_v25  ;;  %v8907_v8 = vld [vmem:[%s10191_s2 + $0x180] sm:$0xff]   ;;  %v195_v11 = vpack.c.bf16 %v187_v9, %v187_v9  ;;  %v7892_v21 = vcombine.low %v955_v15, %v959_v18  ;;  %v7893_v22 = vcombine.high %v955_v15, %v959_v18  ;;  %v947_v24 = vld [vmem:[#allocation10 + $0x180] sm:$0xff] }
  0x9e   :  { %8772 = vmatprep.subr.bf16.mxu1 %v8869_v26  ;;  %v189_v10 = vld [vmem:[#allocation3 + $0x38] sm:$0xff]  ;;  %v186_v13 = vld [vmem:[#allocation3 + $0x20] sm:$0xff]  ;;  %v995_v14 = vld [vmem:[#allocation10 + $0x300] sm:$0x33] }
  0x9f   :  { %v197_v12 = vpack.c.bf16 %v189_v10, %v189_v10  ;;  %v194_v16 = vpack.c.bf16 %v186_v13, %v186_v13  ;;  %v956_v19 = vld [vmem:[#allocation10 + $0x1c8] sm:$0xff]  ;;  %v951_v25 = vld [vmem:[#allocation10 + $0x1a0] sm:$0xff] }
  0xa0   :  { %8751 = vmatpush3.bf16.msra.mxu0 %v8870_v27  ;;  %v960_v20 = vld [vmem:[#allocation10 + $0x1e8] sm:$0xff]  ;;  %v7884_v35 = vcombine.low %v947_v24, %v951_v25  ;;  %v931_v39 = vld [vmem:[#allocation10 + $0x100] sm:$0xff] }
  0xa1   :  { %8773 = vmatpush3.bf16.msra.mxu1 %v8871_v28  ;;  %8752 = vmatprep.subr.bf16.mxu0 %v8872_v29  ;;  %v7894_v23 = vcombine.low %v956_v19, %v960_v20  ;;  %v948_v26 = vld [vmem:[#allocation10 + $0x188] sm:$0xff]  ;;  %v7895_v27 = vcombine.high %v956_v19, %v960_v20  ;;  %v7885_v28 = vcombine.high %v947_v24, %v951_v25  ;;  %v899_v9 = vld [vmem:[#allocation10] sm:$0xff] }
  0xa2   :  { %8774 = vmatprep.subr.bf16.mxu1 %v8873_v30  ;;  %v952_v29 = vld [vmem:[#allocation10 + $0x1a8] sm:$0xff]  ;;  %v939_v30 = vld [vmem:[#allocation10 + $0x140] sm:$0xff]  ;;  %v7932_v24 = vcombine.low %v995_v14, %v995_v14 }
  0xa3   :  { %v940_v33 = vld [vmem:[#allocation10 + $0x148] sm:$0xff]  ;;  %v7886_v36 = vcombine.low %v948_v26, %v952_v29  ;;  %v903_v10 = vld [vmem:[#allocation10 + $0x20] sm:$0xff] }
  0xa4   :  { %8753 = vmatpush3.bf16.msra.mxu0 %v8874_v31  ;;  %v943_v31 = vld [vmem:[#allocation10 + $0x160] sm:$0xff]  ;;  %v944_v34 = vld [vmem:[#allocation10 + $0x168] sm:$0xff]  ;;  %v7836_v19 = vcombine.low %v899_v9, %v903_v10 }
  0xa5   :  { %8775 = vmatpush3.bf16.msra.mxu1 %v8875_v32  ;;  %8782 = vmatprep.subr.bf16.mxu0 %v8876_v41  ;;  %v7887_v32 = vcombine.high %v948_v26, %v952_v29  ;;  %v7877_v37 = vcombine.high %v939_v30, %v943_v31  ;;  %v932_v41 = vld [vmem:[#allocation10 + $0x108] sm:$0xff]  ;;  %v987_v20 = vld [vmem:[#allocation10 + $0x2c0] sm:$0xff]  ;;  %v1505_v29 = vsel %vm1503_vm1, %v7932_v24, 0 }
  0xa6   :  { %8804 = vmatprep.subr.bf16.mxu1 %v8877_v42  ;;  %v936_v42 = vld [vmem:[#allocation10 + $0x128] sm:$0xff] }
  0xa7   :  { %754 = vmatmul.mubr.bf16.vlgmr.msra.gmra.mxu0 %v190_v38  ;;  %v7879_v38 = vcombine.high %v940_v33, %v944_v34  ;;  %v988_v25 = vld [vmem:[#allocation10 + $0x2c8] sm:$0xff] }
  0xa8   :  { %794 = vmatmul.mubr.bf16.vlgmr.msra.gmra.mxu1 %v192_v40  ;;  %8783 = vmatpush3.bf16.msra.mxu0 %v8878_v43  ;;  %v935_v40 = vld [vmem:[#allocation10 + $0x120] sm:$0xff]  ;;  %v7876_v43 = vcombine.low %v939_v30, %v943_v31  ;;  %v992_v26 = vld [vmem:[#allocation10 + $0x2e8] sm:$0xff] }
  0xa9   :  { %8805 = vmatpush3.bf16.msra.mxu1 %v8879_v44  ;;  %8784 = vmatprep.subr.bf16.mxu0 %v8880_v45  ;;  %v7878_v44 = vcombine.low %v940_v33, %v944_v34  ;;  %v7869_v45 = vcombine.high %v931_v39, %v935_v40  ;;  %v979_v31 = vld [vmem:[#allocation10 + $0x280] sm:$0xff]  ;;  %v7927_v34 = vcombine.high %v988_v25, %v992_v26 }
  0xaa   :  { %8806 = vmatprep.subr.bf16.mxu1 %v8881_v46  ;;  %833 = vmatprep.mubr.bf16.mxu0 %v195_v11  ;;  %v7871_v46 = vcombine.high %v932_v41, %v936_v42  ;;  %v900_v11 = vld [vmem:[#allocation10 + $0x8] sm:$0xff] }
  0xab   :  { %873 = vmatprep.mubr.bf16.mxu1 %v197_v12  ;;  %v904_v12 = vld [vmem:[#allocation10 + $0x28] sm:$0xff] }
  0xac   :  { %8785 = vmatpush3.bf16.msra.mxu0 %v8882_v47  ;;  %v923_v47 = vld [vmem:[#allocation10 + $0xc0] sm:$0xff]  ;;  %v7839_v18 = vcombine.high %v900_v11, %v904_v12 }
  0xad   :  { %8807 = vmatpush3.bf16.msra.mxu1 %v8883_v48  ;;  %8786 = vmatprep.subr.bf16.mxu0 %v8884_v49  ;;  %v927_v48 = vld [vmem:[#allocation10 + $0xe0] sm:$0xff]  ;;  %v924_v49 = vld [vmem:[#allocation10 + $0xc8] sm:$0xff] }
  0xae   :  { %8808 = vmatprep.subr.bf16.mxu1 %v8885_v50  ;;  %v928_v50 = vld [vmem:[#allocation10 + $0xe8] sm:$0xff] }
  0xb0   :  { %8787 = vmatpush3.bf16.msra.mxu0 %v8886_v51  ;;  %v7868_v51 = vcombine.low %v931_v39, %v935_v40  ;;  %v971_v40 = vld [vmem:[#allocation10 + $0x240] sm:$0xff] }
  0xb1   :  { %8809 = vmatpush3.bf16.msra.mxu1 %v8887_v52  ;;  %8788 = vmatprep.subr.bf16.mxu0 %v8888_v53  ;;  %v7870_v52 = vcombine.low %v932_v41, %v936_v42  ;;  %v7861_v53 = vcombine.high %v923_v47, %v927_v48  ;;  %v975_v41 = vld [vmem:[#allocation10 + $0x260] sm:$0xff] }
  0xb2   :  { %8810 = vmatprep.subr.bf16.mxu1 %v8889_v54  ;;  %v7863_v54 = vcombine.high %v924_v49, %v928_v50 }
  0xb4   :  { %8789 = vmatpush3.bf16.msra.mxu0 %v8890_v55  ;;  %v915_v55 = vld [vmem:[#allocation10 + $0x80] sm:$0xff] }
  0xb5   :  { %8811 = vmatpush3.bf16.msra.mxu1 %v8891_v56  ;;  %8790 = vmatprep.subr.bf16.mxu0 %v8892_v57  ;;  %v919_v56 = vld [vmem:[#allocation10 + $0xa0] sm:$0xff]  ;;  %v916_v57 = vld [vmem:[#allocation10 + $0x88] sm:$0xff] }
  0xb6   :  { %8812 = vmatprep.subr.bf16.mxu1 %v8893_v58  ;;  %v920_v58 = vld [vmem:[#allocation10 + $0xa8] sm:$0xff] }
  0xb8   :  { %8791 = vmatpush3.bf16.msra.mxu0 %v8894_v59  ;;  %v7860_v59 = vcombine.low %v923_v47, %v927_v48  ;;  %v7909_v47 = vcombine.high %v971_v40, %v975_v41 }
  0xb9   :  { %8813 = vmatpush3.bf16.msra.mxu1 %v8895_v60  ;;  %8792 = vmatprep.subr.bf16.mxu0 %v8896_v61  ;;  %v199_v60 = vld [vmem:[#allocation5 + $0x8] sm:$0xff]  ;;  %v7862_v61 = vcombine.low %v924_v49, %v928_v50  ;;  %v963_v49 = vld [vmem:[#allocation10 + $0x200] sm:$0xff] }
  0xba   :  { %8814 = vmatprep.subr.bf16.mxu1 %v8897_v62  ;;  %v7853_v62 = vcombine.high %v915_v55, %v919_v56  ;;  %v967_v50 = vld [vmem:[#allocation10 + $0x220] sm:$0xff] }
  0xbc   :  { %8793 = vmatpush3.bf16.msra.mxu0 %v8898_v63  ;;  %v9860_v63 = vpack.c.bf16 %v199_v60, %v199_v60  ;;  %v958_v60 = vld [vmem:[#allocation10 + $0x1d8] sm:$0xff] }
  0xbd   :  { %8815 = vmatpush3.bf16.msra.mxu1 %v8899_v0  ;;  %8794 = vmatprep.subr.bf16.mxu0 %v8900_v1  ;;  %v7855_v0 = vcombine.high %v916_v57, %v920_v58  ;;  %v907_v1 = vld [vmem:[#allocation10 + $0x40] sm:$0xff] }
  0xbe   :  { %8816 = vmatprep.subr.bf16.mxu1 %v8901_v2  ;;  %v911_v2 = vld [vmem:[#allocation10 + $0x60] sm:$0xff] }
  0xbf   :  { %v7844_v13 = vcombine.low %v907_v1, %v911_v2 }
  0xc0   :  { %8795 = vmatpush3.bf16.msra.mxu0 %v8902_v3  ;;  %v908_v3 = vld [vmem:[#allocation10 + $0x48] sm:$0xff] }
  0xc1   :  { %8817 = vmatpush3.bf16.msra.mxu1 %v8903_v4  ;;  %8796 = vmatprep.subr.bf16.mxu0 %v8904_v5  ;;  %v912_v4 = vld [vmem:[#allocation10 + $0x68] sm:$0xff]  ;;  %v7852_v5 = vcombine.low %v915_v55, %v919_v56  ;;  %v7901_v55 = vcombine.high %v963_v49, %v967_v50  ;;  %v957_v56 = vld [vmem:[#allocation10 + $0x1d0] sm:$0xff] }
  0xc2   :  { %8818 = vmatprep.subr.bf16.mxu1 %v8905_v6  ;;  %v7854_v6 = vcombine.low %v916_v57, %v920_v58  ;;  %v7846_v15 = vcombine.low %v908_v3, %v912_v4  ;;  %v961_v57 = vld [vmem:[#allocation10 + $0x1f0] sm:$0xff] }
  0xc4   :  { %8797 = vmatpush3.bf16.msra.mxu0 %v8906_v7  ;;  %v7845_v7 = vcombine.high %v907_v1, %v911_v2  ;;  %v953_v1 = vld [vmem:[#allocation10 + $0x1b0] sm:$0xff] }
  0xc5   :  { %8819 = vmatpush3.bf16.msra.mxu1 %v8907_v8  ;;  %1528 = vmatprep.subr.bf16.mxu0 %v7893_v22  ;;  %v7847_v8 = vcombine.high %v908_v3, %v912_v4  ;;  %v7838_v22 = vcombine.low %v900_v11, %v904_v12  ;;  %v7897_v3 = vcombine.high %v957_v56, %v961_v57  ;;  %v950_v4 = vld [vmem:[#allocation10 + $0x198] sm:$0xff] }
  0xc6   :  { %1569 = vmatprep.subr.bf16.mxu1 %v7895_v27 }
  0xc7   :  { %834 = vmatmul.mubr.bf16.vlgmr.msra.gmra.mxu0 %v194_v16  ;;  %v7837_v16 = vcombine.high %v899_v9, %v903_v10  ;;  %v941_v9 = vld [vmem:[#allocation10 + $0x150] sm:$0xff] }
  0xc8   :  { %874 = vmatmul.mubr.bf16.vlgmr.msra.gmra.mxu1 %v196_v17  ;;  %1529 = vmatpush1.bf16.msra.mxu0 %v7892_v21  ;;  %v996_v17 = vld [vmem:[#allocation10 + $0x308] sm:$0x33]  ;;  %v991_v21 = vld [vmem:[#allocation10 + $0x2e0] sm:$0xff]  ;;  %v945_v10 = vld [vmem:[#allocation10 + $0x170] sm:$0xff] }
  0xc9   :  { %1570 = vmatpush1.bf16.msra.mxu1 %v7894_v23  ;;  %1530 = vmatprep.subr.bf16.mxu0 %v7885_v28  ;;  %v7933_v23 = vcombine.high %v995_v14, %v995_v14  ;;  %v7935_v27 = vcombine.high %v996_v17, %v996_v17  ;;  %v7934_v28 = vcombine.low %v996_v17, %v996_v17  ;;  %v946_v14 = vld [vmem:[#allocation10 + $0x178] sm:$0xff]  ;;  %v933_v17 = vld [vmem:[#allocation10 + $0x110] sm:$0xff] }
  0xca   :  { %1571 = vmatprep.subr.bf16.mxu1 %v7887_v32  ;;  %7941 = vmatprep.mubr.msk.bf16.mxu0 %vm1499_vm0, %v9860_v63  ;;  %v7925_v30 = vcombine.high %v987_v20, %v991_v21  ;;  %v983_v32 = vld [vmem:[#allocation10 + $0x2a0] sm:$0xff]  ;;  %v7880_v24 = vcombine.low %v941_v9, %v945_v10 }
  0xcb   :  { %7943 = vmatprep.mubr.msk.bf16.mxu1 %vm1499_vm0, %v9860_v63  ;;  %v1511_v33 = vsel %vm1503_vm1, %v7934_v28, 0  ;;  %v7917_v39 = vcombine.high %v979_v31, %v983_v32 }
  0xcc   :  { %1531 = vmatpush1.bf16.msra.mxu0 %v7884_v35  ;;  %v980_v35 = vld [vmem:[#allocation10 + $0x288] sm:$0xff] }
  0xcd   :  { %1572 = vmatpush1.bf16.msra.mxu1 %v7886_v36  ;;  %1532 = vmatprep.subr.bf16.mxu0 %v7877_v37  ;;  %v984_v36 = vld [vmem:[#allocation10 + $0x2a8] sm:$0xff]  ;;  %v7924_v37 = vcombine.low %v987_v20, %v991_v21  ;;  %v7881_v20 = vcombine.high %v941_v9, %v945_v10  ;;  %v934_v21 = vld [vmem:[#allocation10 + $0x118] sm:$0xff] }
  0xce   :  { %1573 = vmatprep.subr.bf16.mxu1 %v7879_v38  ;;  %v7926_v38 = vcombine.low %v988_v25, %v992_v26  ;;  %v7919_v42 = vcombine.high %v980_v35, %v984_v36  ;;  %v925_v25 = vld [vmem:[#allocation10 + $0xd0] sm:$0xff] }
  0xcf   :  { %v929_v26 = vld [vmem:[#allocation10 + $0xf0] sm:$0xff] }
  0xd0   :  { %1533 = vmatpush1.bf16.msra.mxu0 %v7876_v43  ;;  %v972_v43 = vld [vmem:[#allocation10 + $0x248] sm:$0xff] }
  0xd1   :  { %1574 = vmatpush1.bf16.msra.mxu1 %v7878_v44  ;;  %1534 = vmatprep.subr.bf16.mxu0 %v7869_v45  ;;  %v976_v44 = vld [vmem:[#allocation10 + $0x268] sm:$0xff]  ;;  %v7916_v45 = vcombine.low %v979_v31, %v983_v32 }
  0xd2   :  { %1575 = vmatprep.subr.bf16.mxu1 %v7871_v46  ;;  %v7918_v46 = vcombine.low %v980_v35, %v984_v36  ;;  %v7911_v48 = vcombine.high %v972_v43, %v976_v44  ;;  %v918_v36 = vld [vmem:[#allocation10 + $0x98] sm:$0xff] }
  0xd4   :  { %1535 = vmatpush1.bf16.msra.mxu0 %v7868_v51  ;;  %v964_v51 = vld [vmem:[#allocation10 + $0x208] sm:$0xff] }
  0xd5   :  { %1576 = vmatpush1.bf16.msra.mxu1 %v7870_v52  ;;  %1536 = vmatprep.subr.bf16.mxu0 %v7861_v53  ;;  %v968_v52 = vld [vmem:[#allocation10 + $0x228] sm:$0xff]  ;;  %v7908_v53 = vcombine.low %v971_v40, %v975_v41 }
  0xd6   :  { %1577 = vmatprep.subr.bf16.mxu1 %v7863_v54  ;;  %v7910_v54 = vcombine.low %v972_v43, %v976_v44  ;;  %v7903_v58 = vcombine.high %v964_v51, %v968_v52  ;;  %v7902_v2 = vcombine.low %v964_v51, %v968_v52  ;;  %v913_v43 = vld [vmem:[#allocation10 + $0x70] sm:$0xff]  ;;  %v910_v44 = vld [vmem:[#allocation10 + $0x58] sm:$0xff] }
  0xd7   :  { %v905_v51 = vld [vmem:[#allocation10 + $0x30] sm:$0xff]  ;;  %v902_v52 = vld [vmem:[#allocation10 + $0x18] sm:$0xff] }
  0xd8   :  { %1537 = vmatpush1.bf16.msra.mxu0 %v7860_v59  ;;  %v198_v59 = vld [vmem:[#allocation5] sm:$0xff] }
  0xd9   :  { %1578 = vmatpush1.bf16.msra.mxu1 %v7862_v61  ;;  %1538 = vmatprep.subr.bf16.mxu0 %v7853_v62  ;;  %v962_v61 = vld [vmem:[#allocation10 + $0x1f8] sm:$0xff]  ;;  %v7900_v62 = vcombine.low %v963_v49, %v967_v50  ;;  %v901_v50 = vld [vmem:[#allocation10 + $0x10] sm:$0xff] }
  0xda   :  { %1579 = vmatprep.subr.bf16.mxu1 %v7855_v0  ;;  %v949_v0 = vld [vmem:[#allocation10 + $0x190] sm:$0xff]  ;;  %v7898_v11 = vcombine.low %v958_v60, %v962_v61 }
  0xdb   :  { %v7889_v12 = vcombine.high %v949_v0, %v953_v1 }
  0xdc   :  { %1539 = vmatpush1.bf16.msra.mxu0 %v7852_v5  ;;  %v954_v5 = vld [vmem:[#allocation10 + $0x1b8] sm:$0xff] }
  0xdd   :  { %1580 = vmatpush1.bf16.msra.mxu1 %v7854_v6  ;;  %1540 = vmatprep.subr.bf16.mxu0 %v7845_v7  ;;  %v7899_v6 = vcombine.high %v958_v60, %v962_v61  ;;  %v9870_v7 = vpack.c.bf16 %v198_v59, %v198_v59  ;;  %v998_v59 = vld [vmem:[#allocation10 + $0x318] sm:$0x33]  ;;  %v9878_v60 = vld [vmem:[#allocation8 + $0x50] sm:$0xff] }
  0xde   :  { %1581 = vmatprep.subr.bf16.mxu1 %v7847_v8  ;;  %v7896_v8 = vcombine.low %v957_v56, %v961_v57  ;;  %v997_v56 = vld [vmem:[#allocation10 + $0x310] sm:$0x33] }
  0xdf   :  { %v9880_v61 = vld [vmem:[#allocation8 + $0x70] sm:$0xff]  ;;  %v7937_v10 = vcombine.high %v997_v56, %v997_v56 }
  0xe0   :  { %1541 = vmatpush1.bf16.msra.mxu0 %v7844_v13  ;;  %v942_v13 = vld [vmem:[#allocation10 + $0x158] sm:$0xff] }
  0xe1   :  { %1582 = vmatpush1.bf16.msra.mxu1 %v7846_v15  ;;  %1542 = vmatprep.subr.bf16.mxu0 %v7837_v16  ;;  %v7891_v15 = vcombine.high %v950_v4, %v954_v5  ;;  %v7888_v16 = vcombine.low %v949_v0, %v953_v1  ;;  %v9884_v1 = vld [vmem:[#allocation8 + $0x78] sm:$0xff] }
  0xe2   :  { %1583 = vmatprep.subr.bf16.mxu1 %v7839_v18  ;;  %v937_v18 = vld [vmem:[#allocation10 + $0x130] sm:$0xff] }
  0xe3   :  { %v7873_v28 = vcombine.high %v933_v17, %v937_v18  ;;  %v7872_v32 = vcombine.low %v933_v17, %v937_v18  ;;  %v985_v17 = vld [vmem:[#allocation10 + $0x2b0] sm:$0xff] }
  0xe4   :  { %1543 = vmatpush1.bf16.msra.mxu0 %v7836_v19  ;;  %v7890_v19 = vcombine.low %v950_v4, %v954_v5  ;;  %v7840_v5 = vcombine.low %v901_v50, %v905_v51 }
  0xe5   :  { %1584 = vmatpush1.bf16.msra.mxu1 %v7838_v22  ;;  %7940 = vmatprep.subr.msk.bf16.mxu0 %vm1503_vm1, %v7933_v23  ;;  %v938_v22 = vld [vmem:[#allocation10 + $0x138] sm:$0xff]  ;;  %v7883_v23 = vcombine.high %v942_v13, %v946_v14 }
  0xe6   :  { %7942 = vmatprep.subr.msk.bf16.mxu1 %vm1503_vm1, %v7935_v27  ;;  %v7882_v27 = vcombine.low %v942_v13, %v946_v14  ;;  %v7875_v31 = vcombine.high %v934_v21, %v938_v22  ;;  %v7874_v35 = vcombine.low %v934_v21, %v938_v22  ;;  %v994_v13 = vld [vmem:[#allocation10 + $0x2f8] sm:$0xff]  ;;  %v7939_v14 = vcombine.high %v998_v59, %v998_v59 }
  0xe7   :  { %v986_v21 = vld [vmem:[#allocation10 + $0x2b8] sm:$0xff] }
  0xe8   :  { %1551 = vmatpush2.bf16.msra.mxu0 %v1505_v29  ;;  %v926_v29 = vld [vmem:[#allocation10 + $0xd8] sm:$0xff] }
  0xe9   :  { %1592 = vmatpush2.bf16.msra.mxu1 %v1511_v33  ;;  %1552 = vmatprep.subr.bf16.mxu0 %v7925_v30  ;;  %v930_v30 = vld [vmem:[#allocation10 + $0xf8] sm:$0xff]  ;;  %v917_v33 = vld [vmem:[#allocation10 + $0x90] sm:$0xff] }
  0xea   :  { %1593 = vmatprep.subr.bf16.mxu1 %v7927_v34  ;;  %v921_v34 = vld [vmem:[#allocation10 + $0xb0] sm:$0xff]  ;;  %v7866_v40 = vcombine.low %v926_v29, %v930_v30 }
  0xeb   :  { %v7857_v41 = vcombine.high %v917_v33, %v921_v34 }
  0xec   :  { %1553 = vmatpush2.bf16.msra.mxu0 %v7924_v37  ;;  %v922_v37 = vld [vmem:[#allocation10 + $0xb8] sm:$0xff] }
  0xed   :  { %1594 = vmatpush2.bf16.msra.mxu1 %v7926_v38  ;;  %1554 = vmatprep.subr.bf16.mxu0 %v7917_v39  ;;  %v7867_v38 = vcombine.high %v926_v29, %v930_v30  ;;  %v7864_v39 = vcombine.low %v925_v25, %v929_v26  ;;  %v974_v29 = vld [vmem:[#allocation10 + $0x258] sm:$0xff] }
  0xee   :  { %1595 = vmatprep.subr.bf16.mxu1 %v7919_v42  ;;  %v909_v42 = vld [vmem:[#allocation10 + $0x50] sm:$0xff]  ;;  %v978_v30 = vld [vmem:[#allocation10 + $0x278] sm:$0xff] }
  0xef   :  { %v7849_v49 = vcombine.high %v909_v42, %v913_v43 }
  0xf0   :  { %1555 = vmatpush2.bf16.msra.mxu0 %v7916_v45  ;;  %v7859_v45 = vcombine.high %v918_v36, %v922_v37 }
  0xf1   :  { %1596 = vmatpush2.bf16.msra.mxu1 %v7918_v46  ;;  %1556 = vmatprep.subr.bf16.mxu0 %v7909_v47  ;;  %v914_v46 = vld [vmem:[#allocation10 + $0x78] sm:$0xff]  ;;  %v7856_v47 = vcombine.low %v917_v33, %v921_v34  ;;  %v965_v33 = vld [vmem:[#allocation10 + $0x210] sm:$0xff] }
  0xf2   :  { %1597 = vmatprep.subr.bf16.mxu1 %v7911_v48  ;;  %v7858_v48 = vcombine.low %v918_v36, %v922_v37  ;;  %v7850_v57 = vcombine.low %v910_v44, %v914_v46  ;;  %v969_v34 = vld [vmem:[#allocation10 + $0x230] sm:$0xff]  ;;  %v966_v36 = vld [vmem:[#allocation10 + $0x218] sm:$0xff] }
  0xf3   :  { %v970_v37 = vld [vmem:[#allocation10 + $0x238] sm:$0xff] }
  0xf4   :  { %1557 = vmatpush2.bf16.msra.mxu0 %v7908_v53  ;;  %v7851_v53 = vcombine.high %v910_v44, %v914_v46  ;;  %v892_v44 = vld [vmem:[#allocation8 + $0x48] sm:$0xff]  ;;  %v7907_v46 = vcombine.high %v966_v36, %v970_v37 }
  0xf5   :  { %1598 = vmatpush2.bf16.msra.mxu1 %v7910_v54  ;;  %1558 = vmatprep.subr.bf16.mxu0 %v7901_v55  ;;  %v906_v54 = vld [vmem:[#allocation10 + $0x38] sm:$0xff]  ;;  %v7848_v55 = vcombine.low %v909_v42, %v913_v43  ;;  %v7914_v42 = vcombine.low %v974_v29, %v978_v30  ;;  %v7905_v43 = vcombine.high %v965_v33, %v969_v34 }
  0xf6   :  { %1599 = vmatprep.subr.bf16.mxu1 %v7903_v58  ;;  %v7841_v58 = vcombine.high %v901_v50, %v905_v51  ;;  %v7843_v0 = vcombine.high %v902_v52, %v906_v54  ;;  %v7842_v9 = vcombine.low %v902_v52, %v906_v54  ;;  %v7906_v50 = vcombine.low %v966_v36, %v970_v37  ;;  %v884_v52 = vld [vmem:[#allocation8 + $0x8] sm:$0xff] }
  0xf8   :  { %1559 = vmatpush2.bf16.msra.mxu0 %v7900_v62  ;;  %v9882_v62 = vld [vmem:[#allocation8 + $0x58] sm:$0xff] }
  0xf9   :  { %1600 = vmatpush2.bf16.msra.mxu1 %v7902_v2  ;;  %1610 = vmatprep.subr.bf16.mxu0 %v7897_v3  ;;  %v9552_v2 = vmov 0   ;;  %v7960_v3 = vcombine.low %v9878_v60, %v9880_v61  ;;  %v7962_v4 = vcombine.low %v9882_v62, %v9884_v1 }
  0xfa   :  { %1651 = vmatprep.subr.bf16.mxu1 %v7899_v6  ;;  %8842 = vset.pattern.permute.xlu0 %v9552_v2  ;;  %v989_v6 = vld [vmem:[#allocation10 + $0x2d0] sm:$0xff] }
  0xfb   :  { %1561 = vmatmul.mubr.bf16.vlgmr.msra.gmra.mxu0 %v9870_v7  ;;  %8843 = vset.pattern.permute.xlu1 %v9552_v2 }
  0xfc   :  { %1611 = vmatpush1.bf16.msra.mxu0 %v7896_v8  ;;  %1602 = vmatmul.mubr.bf16.vlgmr.msra.gmra.mxu1 %v9870_v7  ;;  %v993_v8 = vld [vmem:[#allocation10 + $0x2f0] sm:$0xff] }
  0xfd   :  { %1652 = vmatpush1.bf16.msra.mxu1 %v7898_v11  ;;  %1612 = vmatprep.subr.bf16.mxu0 %v7889_v12  ;;  %v7936_v11 = vcombine.low %v997_v56, %v997_v56  ;;  %v990_v12 = vld [vmem:[#allocation10 + $0x2d8] sm:$0xff] }
  0xfe   :  { %1653 = vmatprep.subr.bf16.mxu1 %v7891_v15  ;;  %7945 = vmatprep.mubr.msk.bf16.mxu0 %vm1499_vm0, %v9860_v63  ;;  %v7938_v15 = vcombine.low %v998_v59, %v998_v59 }
  0xff   :  { %7947 = vmatprep.mubr.msk.bf16.mxu1 %vm1499_vm0, %v9860_v63  ;;  %v7865_v63 = vcombine.high %v925_v25, %v929_v26  ;;  %v1517_v18 = vsel %vm1503_vm1, %v7936_v11, 0  ;;  %v973_v25 = vld [vmem:[#allocation10 + $0x250] sm:$0xff] }
 0x100   :  { %1613 = vmatpush1.bf16.msra.mxu0 %v7888_v16  ;;  %v981_v16 = vld [vmem:[#allocation10 + $0x290] sm:$0xff]  ;;  %v1523_v22 = vsel %vm1503_vm1, %v7938_v15, 0 }
 0x101   :  { %1654 = vmatpush1.bf16.msra.mxu1 %v7890_v19  ;;  %1614 = vmatprep.subr.bf16.mxu0 %v7881_v20  ;;  %v7929_v19 = vcombine.high %v989_v6, %v993_v8  ;;  %v982_v20 = vld [vmem:[#allocation10 + $0x298] sm:$0xff]  ;;  %v977_v26 = vld [vmem:[#allocation10 + $0x270] sm:$0xff] }
 0x102   :  { %1655 = vmatprep.subr.bf16.mxu1 %v7883_v23  ;;  %v7931_v23 = vcombine.high %v990_v12, %v994_v13 }
 0x104   :  { %1615 = vmatpush1.bf16.msra.mxu0 %v7880_v24  ;;  %v7928_v24 = vcombine.low %v989_v6, %v993_v8  ;;  %v7963_v6 = vcombine.high %v9882_v62, %v9884_v1 }
 0x105   :  { %1656 = vmatpush1.bf16.msra.mxu1 %v7882_v27  ;;  %1616 = vmatprep.subr.bf16.mxu0 %v7873_v28  ;;  %v7930_v27 = vcombine.low %v990_v12, %v994_v13  ;;  %v7921_v28 = vcombine.high %v981_v16, %v985_v17 }
 0x106   :  { %1657 = vmatprep.subr.bf16.mxu1 %v7875_v31  ;;  %v7923_v31 = vcombine.high %v982_v20, %v986_v21 }
 0x108   :  { %1617 = vmatpush1.bf16.msra.mxu0 %v7872_v32  ;;  %v7920_v32 = vcombine.low %v981_v16, %v985_v17  ;;  %v7771_v16 = vld [vmem:[#allocation7] ss:$0 sm:$0xff] }
 0x109   :  { %1658 = vmatpush1.bf16.msra.mxu1 %v7874_v35  ;;  %1618 = vmatprep.subr.bf16.mxu0 %v7865_v63  ;;  %v7922_v35 = vcombine.low %v982_v20, %v986_v21  ;;  %v7913_v63 = vcombine.high %v973_v25, %v977_v26 }
 0x10a   :  { %1659 = vmatprep.subr.bf16.mxu1 %v7867_v38  ;;  %v7915_v38 = vcombine.high %v974_v29, %v978_v30 }
 0x10c   :  { %1619 = vmatpush1.bf16.msra.mxu0 %v7864_v39  ;;  %v7912_v39 = vcombine.low %v973_v25, %v977_v26 }
 0x10d   :  { %1660 = vmatpush1.bf16.msra.mxu1 %v7866_v40  ;;  %1620 = vmatprep.subr.bf16.mxu0 %v7857_v41  ;;  %v891_v40 = vld [vmem:[#allocation8 + $0x40] sm:$0xff] }
 0x10e   :  { %1661 = vmatprep.subr.bf16.mxu1 %v7859_v45  ;;  %v895_v41 = vld [vmem:[#allocation8 + $0x60] sm:$0xff]  ;;  %v896_v45 = vld [vmem:[#allocation8 + $0x68] sm:$0xff] }
 0x10f   :  { %v7957_v51 = vcombine.high %v891_v40, %v895_v41  ;;  %v7959_v54 = vcombine.high %v892_v44, %v896_v45  ;;  %v7958_v56 = vcombine.low %v892_v44, %v896_v45 }
 0x110   :  { %1621 = vmatpush1.bf16.msra.mxu0 %v7856_v47  ;;  %v7904_v47 = vcombine.low %v965_v33, %v969_v34  ;;  %v889_v33 = vld [vmem:[#allocation8 + $0x30] sm:$0xff]  ;;  %v886_v34 = vld [vmem:[#allocation8 + $0x18] sm:$0xff] }
 0x111   :  { %1662 = vmatpush1.bf16.msra.mxu1 %v7858_v48  ;;  %1622 = vmatprep.subr.bf16.mxu0 %v7849_v49  ;;  %v883_v48 = vld [vmem:[#allocation8] sm:$0xff] }
 0x112   :  { %1663 = vmatprep.subr.bf16.mxu1 %v7851_v53  ;;  %v887_v49 = vld [vmem:[#allocation8 + $0x20] sm:$0xff]  ;;  %v888_v53 = vld [vmem:[#allocation8 + $0x28] sm:$0xff] }
 0x113   :  { %v7948_v59 = vcombine.low %v883_v48, %v887_v49 }
 0x114   :  { %1623 = vmatpush1.bf16.msra.mxu0 %v7848_v55  ;;  %v7956_v55 = vcombine.low %v891_v40, %v895_v41  ;;  %v2066_v40 = vld [vmem:[#allocation13 + $0x1e0] sm:$0xff] }
 0x115   :  { %1664 = vmatpush1.bf16.msra.mxu1 %v7850_v57  ;;  %1624 = vmatprep.subr.bf16.mxu0 %v7841_v58  ;;  %v7949_v57 = vcombine.high %v883_v48, %v887_v49  ;;  %v7951_v58 = vcombine.high %v884_v52, %v888_v53  ;;  %v2190_v41 = vld [vmem:[#allocation13 + $0x5c0] sm:$0xff] }
 0x116   :  { %1665 = vmatprep.subr.bf16.mxu1 %v7843_v0  ;;  %v7950_v0 = vcombine.low %v884_v52, %v888_v53  ;;  %v2058_v48 = vld [vmem:[#allocation13 + $0x1a0] sm:$0xff] }
 0x117   :  { %v2182_v49 = vld [vmem:[#allocation13 + $0x580] sm:$0xff] }
 0x118   :  { %1625 = vmatpush1.bf16.msra.mxu0 %v7840_v5  ;;  %v7961_v5 = vcombine.high %v9878_v60, %v9880_v61  ;;  %v2178_v52 = vld [vmem:[#allocation13 + $0x560] sm:$0xff] }
 0x119   :  { %1666 = vmatpush1.bf16.msra.mxu1 %v7842_v9  ;;  %7944 = vmatprep.subr.msk.bf16.mxu0 %vm1503_vm1, %v7937_v10 }
 0x11a   :  { %7946 = vmatprep.subr.msk.bf16.mxu1 %vm1503_vm1, %v7939_v14 }
 0x11c   :  { %1633 = vmatpush2.bf16.msra.mxu0 %v1517_v18 }
 0x11d   :  { %1674 = vmatpush2.bf16.msra.mxu1 %v1523_v22  ;;  %1634 = vmatprep.subr.bf16.mxu0 %v7929_v19 }
 0x11e   :  { %1675 = vmatprep.subr.bf16.mxu1 %v7931_v23 }
 0x120   :  { %1635 = vmatpush2.bf16.msra.mxu0 %v7928_v24 }
 0x121   :  { %1676 = vmatpush2.bf16.msra.mxu1 %v7930_v27  ;;  %1636 = vmatprep.subr.bf16.mxu0 %v7921_v28 }
 0x122   :  { %1677 = vmatprep.subr.bf16.mxu1 %v7923_v31 }
 0x124   :  { %1637 = vmatpush2.bf16.msra.mxu0 %v7920_v32  ;;  %v885_v32 = vld [vmem:[#allocation8 + $0x10] sm:$0xff] }
 0x125   :  { %1678 = vmatpush2.bf16.msra.mxu1 %v7922_v35  ;;  %1638 = vmatprep.subr.bf16.mxu0 %v7913_v63  ;;  %v890_v35 = vld [vmem:[#allocation8 + $0x38] sm:$0xff]  ;;  %v7953_v37 = vcombine.high %v885_v32, %v889_v33 }
 0x126   :  { %1679 = vmatprep.subr.bf16.mxu1 %v7915_v38  ;;  %v7955_v38 = vcombine.high %v886_v34, %v890_v35  ;;  %v7954_v44 = vcombine.low %v886_v34, %v890_v35  ;;  %v2134_v34 = vld [vmem:[#allocation13 + $0x400] sm:$0xff] }
 0x127   :  { %v2138_v35 = vld [vmem:[#allocation13 + $0x420] sm:$0xff] }
 0x128   :  { %1639 = vmatpush2.bf16.msra.mxu0 %v7912_v39  ;;  %v2062_v39 = vld [vmem:[#allocation13 + $0x1c0] sm:$0xff] }
 0x129   :  { %1680 = vmatpush2.bf16.msra.mxu1 %v7914_v42  ;;  %1640 = vmatprep.subr.bf16.mxu0 %v7905_v43  ;;  %v2194_v42 = vld [vmem:[#allocation13 + $0x5e0] sm:$0xff]  ;;  %v7952_v43 = vcombine.low %v885_v32, %v889_v33  ;;  %v8025_v45 = vcombine.high %v2062_v39, %v2066_v40  ;;  %v8024_v60 = vcombine.low %v2062_v39, %v2066_v40 }
 0x12a   :  { %1681 = vmatprep.subr.bf16.mxu1 %v7907_v46  ;;  %v8153_v46 = vcombine.high %v2190_v41, %v2194_v42  ;;  %v8152_v61 = vcombine.low %v2190_v41, %v2194_v42  ;;  %v2006_v32 = vld [vmem:[#allocation13] sm:$0xff] }
 0x12b   :  { %v2010_v33 = vld [vmem:[#allocation13 + $0x20] sm:$0xff] }
 0x12c   :  { %1641 = vmatpush2.bf16.msra.mxu0 %v7904_v47  ;;  %v2054_v47 = vld [vmem:[#allocation13 + $0x180] sm:$0xff] }
 0x12d   :  { %1682 = vmatpush2.bf16.msra.mxu1 %v7906_v50  ;;  %1788 = vmatprep.subr.bf16.mxu0 %v7957_v51  ;;  %v2186_v50 = vld [vmem:[#allocation13 + $0x5a0] sm:$0xff]  ;;  %v8017_v62 = vcombine.high %v2054_v47, %v2058_v48 }
 0x12e   :  { %1829 = vmatprep.subr.bf16.mxu1 %v7959_v54  ;;  %v8145_v1 = vcombine.high %v2182_v49, %v2186_v50  ;;  %v2174_v51 = vld [vmem:[#allocation13 + $0x540] sm:$0xff]  ;;  %v8144_v53 = vcombine.low %v2182_v49, %v2186_v50 }
 0x12f   :  { %1643 = vmatmul.mubr.bf16.vlgmr.msra.gmra.mxu0 %v9870_v7  ;;  %v2126_v39 = vld [vmem:[#allocation13 + $0x3c0] sm:$0xff] }
 0x130   :  { %1684 = vmatmul.mubr.bf16.vlgmr.msra.gmra.mxu1 %v9870_v7  ;;  %1789 = vmatpush1.bf16.msra.mxu0 %v7956_v55  ;;  %v8137_v55 = vcombine.high %v2174_v51, %v2178_v52  ;;  %v2130_v40 = vld [vmem:[#allocation13 + $0x3e0] sm:$0xff] }
 0x131   :  { %1830 = vmatpush1.bf16.msra.mxu1 %v7958_v56  ;;  %1790 = vmatprep.subr.bf16.mxu0 %v7949_v57  ;;  %v2038_v56 = vld [vmem:[#allocation13 + $0x100] sm:$0xff] }
 0x132   :  { %1831 = vmatprep.subr.bf16.mxu1 %v7951_v58  ;;  %1808 = vmatprep.mubr.bf16.mxu0 %v9552_v2  ;;  %v2042_v57 = vld [vmem:[#allocation13 + $0x120] sm:$0xff] }
 0x133   :  { %1849 = vmatprep.mubr.bf16.mxu1 %v9552_v2  ;;  %v2166_v58 = vld [vmem:[#allocation13 + $0x500] sm:$0xff] }
 0x134   :  { %1791 = vmatpush1.bf16.msra.mxu0 %v7948_v59  ;;  %v2170_v59 = vld [vmem:[#allocation13 + $0x520] sm:$0xff] }
 0x135   :  { %1832 = vmatpush1.bf16.msra.mxu1 %v7950_v0  ;;  %1870 = vmatprep.subr.bf16.mxu0 %v7961_v5  ;;  %v8136_v5 = vcombine.low %v2174_v51, %v2178_v52  ;;  %v2254_v41 = vld [vmem:[#allocation13 + $0x7c0] sm:$0xff] }
 0x136   :  { %1911 = vmatprep.subr.bf16.mxu1 %v7963_v6  ;;  %v8001_v6 = vcombine.high %v2038_v56, %v2042_v57  ;;  %v2258_v42 = vld [vmem:[#allocation13 + $0x7e0] sm:$0xff] }
 0x137   :  { %v2246_v49 = vld [vmem:[#allocation13 + $0x780] sm:$0xff] }
 0x138   :  { %v2250_v50 = vld [vmem:[#allocation13 + $0x7a0] sm:$0xff] }
 0x139   :  { %v2238_v51 = vld [vmem:[#allocation13 + $0x740] sm:$0xff] }
 0x13a   :  { %v2242_v52 = vld [vmem:[#allocation13 + $0x760] sm:$0xff] }
 0x167   :  { %v8754_v7 = vpop.f32.mrf.mxu0 }
 0x168   :  { %v8776_v8 = vpop.f32.mrf.mxu1 }
 0x169   :  { %v8755_v9 = vpop.f32.mrf.mxu0 }
 0x16a   :  { %v8777_v10 = vpop.f32.mrf.mxu1  ;;  %v8756_v15 = vadd.f32 %v8755_v9, %v8754_v7  ;;  %v8129_v7 = vcombine.high %v2166_v58, %v2170_v59  ;;  %v2034_v9 = vld [vmem:[#allocation13 + $0xe0] sm:$0xff] }
 0x16b   :  { %v8757_v11 = vpop.f32.mrf.mxu0  ;;  %v8778_v18 = vadd.f32 %v8777_v10, %v8776_v8  ;;  %v2030_v8 = vld [vmem:[#allocation13 + $0xc0] sm:$0xff] }
 0x16c   :  { %v8779_v12 = vpop.f32.mrf.mxu1  ;;  %v756_v17 = vadd.f32 %v8756_v15, %v7771_v16  ;;  %v2158_v10 = vld [vmem:[#allocation13 + $0x4c0] sm:$0xff] }
 0x16d   :  { %v8758_v13 = vpop.f32.mrf.mxu0  ;;  %v2162_v11 = vld [vmem:[#allocation13 + $0x4e0] sm:$0xff]  ;;  %v8000_v12 = vcombine.low %v2038_v56, %v2042_v57 }
 0x16e   :  { %v8780_v14 = vpop.f32.mrf.mxu1  ;;  %v796_v22 = vadd.f32 %v8778_v18, %v756_v17  ;;  %v8128_v13 = vcombine.low %v2166_v58, %v2170_v59  ;;  %v8121_v15 = vcombine.high %v2158_v10, %v2162_v11  ;;  %v2022_v16 = vld [vmem:[#allocation13 + $0x80] sm:$0xff]  ;;  %v8201_v58 = vcombine.high %v2238_v51, %v2242_v52 }
 0x16f   :  { %v7993_v14 = vcombine.high %v2030_v8, %v2034_v9  ;;  %v2026_v17 = vld [vmem:[#allocation13 + $0xa0] sm:$0xff] }
 0x170   :  { %v2150_v18 = vld [vmem:[#allocation13 + $0x480] sm:$0xff] }
 0x171   :  { %v2102_v59 = vld [vmem:[#allocation13 + $0x300] sm:$0xff] }
 0x187   :  { %v8798_v19 = vpop.f32.mrf.mxu0 }
 0x188   :  { %v8820_v20 = vpop.f32.mrf.mxu1 }
 0x189   :  { %v8799_v21 = vpop.f32.mrf.mxu0 }
 0x18a   :  { %v8800_v23 = vadd.f32 %v8799_v21, %v8798_v19  ;;  %v8821_v24 = vpop.f32.mrf.mxu1  ;;  %v2154_v19 = vld [vmem:[#allocation13 + $0x4a0] sm:$0xff]  ;;  %v8120_v21 = vcombine.low %v2158_v10, %v2162_v11  ;;  %v8200_v11 = vcombine.low %v2238_v51, %v2242_v52 }
 0x18b   :  { %v8801_v25 = vpop.f32.mrf.mxu0  ;;  %v8822_v27 = vadd.f32 %v8821_v24, %v8820_v20  ;;  %v7992_v20 = vcombine.low %v2030_v8, %v2034_v9  ;;  %v2014_v24 = vld [vmem:[#allocation13 + $0x40] sm:$0xff] }
 0x18c   :  { %v836_v26 = vadd.f32 %v8800_v23, %v796_v22  ;;  %v8823_v28 = vpop.f32.mrf.mxu1  ;;  %v7985_v22 = vcombine.high %v2022_v16, %v2026_v17  ;;  %v8113_v23 = vcombine.high %v2150_v18, %v2154_v19  ;;  %v2018_v25 = vld [vmem:[#allocation13 + $0x60] sm:$0xff] }
 0x18d   :  { %v8802_v29 = vpop.f32.mrf.mxu0  ;;  %v7984_v28 = vcombine.low %v2022_v16, %v2026_v17  ;;  %v2098_v17 = vld [vmem:[#allocation13 + $0x2e0] sm:$0xff] }
 0x18e   :  { %v876_v30 = vadd.f32 %v8822_v27, %v836_v26  ;;  %v8824_v31 = vpop.f32.mrf.mxu1  ;;  %v2142_v26 = vld [vmem:[#allocation13 + $0x440] sm:$0xff]  ;;  %v8112_v29 = vcombine.low %v2150_v18, %v2154_v19 }
 0x18f   :  { %v2146_v27 = vld [vmem:[#allocation13 + $0x460] sm:$0xff] }
 0x190   :  { %v881_v63 = vmax.f32 %v876_v30, 0.0  ;;  %v7977_v30 = vcombine.high %v2014_v24, %v2018_v25  ;;  %v8105_v31 = vcombine.high %v2142_v26, %v2146_v27  ;;  %v2222_v18 = vld [vmem:[#allocation13 + $0x6c0] sm:$0xff] }
 0x191   :  { %v2226_v19 = vld [vmem:[#allocation13 + $0x6e0] sm:$0xff] }
 0x192   :  { %v882_v36 = vpack.c.bf16 %v881_v63, %v881_v63  ;;  %v7976_v63 = vcombine.low %v2014_v24, %v2018_v25  ;;  %v2086_v24 = vld [vmem:[#allocation13 + $0x280] sm:$0xff] }
 0x193   :  { %v2090_v25 = vld [vmem:[#allocation13 + $0x2a0] sm:$0xff] }
 0x194   :  { %7964 = vmatmul.mubr.msk.bf16.vlgmr.msra.gmra.mxu0 %vm1772_vm2, %v882_v36  ;;  %7965 = vmatmul.mubr.msk.bf16.vlgmr.msra.gmra.mxu1 %vm1772_vm2, %v882_v36 }
 0x195   :  { %1871 = vmatpush1.bf16.msra.mxu0 %v7960_v3  ;;  %1912 = vmatpush1.bf16.msra.mxu1 %v7962_v4  ;;  %v2046_v3 = vld [vmem:[#allocation13 + $0x140] sm:$0xff] }
 0x196   :  { %1872 = vmatprep.subr.bf16.mxu0 %v7953_v37  ;;  %1913 = vmatprep.subr.bf16.mxu1 %v7955_v38  ;;  %v2050_v4 = vld [vmem:[#allocation13 + $0x160] sm:$0xff]  ;;  %v7969_v37 = vcombine.high %v2006_v32, %v2010_v33  ;;  %v8097_v38 = vcombine.high %v2134_v34, %v2138_v35 }
 0x197   :  { %1890 = vmatprep.mubr.bf16.mxu0 %v9552_v2  ;;  %1931 = vmatprep.mubr.bf16.mxu1 %v9552_v2  ;;  %v8016_v2 = vcombine.low %v2054_v47, %v2058_v48  ;;  %v8009_v54 = vcombine.high %v2046_v3, %v2050_v4  ;;  %v8008_v0 = vcombine.low %v2046_v3, %v2050_v4  ;;  %v2118_v47 = vld [vmem:[#allocation13 + $0x380] sm:$0xff] }
 0x198   :  { %v2122_v48 = vld [vmem:[#allocation13 + $0x3a0] sm:$0xff] }
 0x199   :  { %1873 = vmatpush1.bf16.msra.mxu0 %v7952_v43  ;;  %1914 = vmatpush1.bf16.msra.mxu1 %v7954_v44  ;;  %v7968_v43 = vcombine.low %v2006_v32, %v2010_v33  ;;  %v8096_v44 = vcombine.low %v2134_v34, %v2138_v35  ;;  %v2110_v3 = vld [vmem:[#allocation13 + $0x340] sm:$0xff]  ;;  %v8048_v32 = vcombine.low %v2086_v24, %v2090_v25 }
 0x19a   :  { %5120 = vmatprep.subr.bf16.mxu0 %v8025_v45  ;;  %5161 = vmatprep.subr.bf16.mxu1 %v8153_v46  ;;  %v8089_v45 = vcombine.high %v2126_v39, %v2130_v40  ;;  %v8217_v46 = vcombine.high %v2254_v41, %v2258_v42  ;;  %v2114_v4 = vld [vmem:[#allocation13 + $0x360] sm:$0xff] }
 0x19b   :  { %v8073_v57 = vcombine.high %v2110_v3, %v2114_v4  ;;  %v8072_v10 = vcombine.low %v2110_v3, %v2114_v4  ;;  %v2078_v34 = vld [vmem:[#allocation13 + $0x240] sm:$0xff] }
 0x19c   :  { %7966 = vmatmul.mubr.msk.bf16.vlgmr.msra.gmra.mxu0 %vm1772_vm2, %v882_v36  ;;  %7967 = vmatmul.mubr.msk.bf16.vlgmr.msra.gmra.mxu1 %vm1772_vm2, %v882_v36  ;;  %v8104_v36 = vcombine.low %v2142_v26, %v2146_v27  ;;  %v2214_v26 = vld [vmem:[#allocation13 + $0x680] sm:$0xff] }
 0x19d   :  { %5121 = vmatpush1.bf16.msra.mxu0 %v8024_v60  ;;  %5162 = vmatpush1.bf16.msra.mxu1 %v8152_v61  ;;  %v8088_v60 = vcombine.low %v2126_v39, %v2130_v40  ;;  %v8216_v61 = vcombine.low %v2254_v41, %v2258_v42  ;;  %v2218_v27 = vld [vmem:[#allocation13 + $0x6a0] sm:$0xff] }
 0x19e   :  { %5122 = vmatprep.subr.bf16.mxu0 %v8017_v62  ;;  %5163 = vmatprep.subr.bf16.mxu1 %v8145_v1  ;;  %v8081_v62 = vcombine.high %v2118_v47, %v2122_v48  ;;  %v8209_v1 = vcombine.high %v2246_v49, %v2250_v50  ;;  %v8176_v33 = vcombine.low %v2214_v26, %v2218_v27  ;;  %v2082_v35 = vld [vmem:[#allocation13 + $0x260] sm:$0xff] }
 0x19f   :  { %v2070_v41 = vld [vmem:[#allocation13 + $0x200] sm:$0xff] }
 0x1a0   :  { %v2074_v42 = vld [vmem:[#allocation13 + $0x220] sm:$0xff] }
 0x1a1   :  { %5123 = vmatpush1.bf16.msra.mxu0 %v8016_v2  ;;  %5164 = vmatpush1.bf16.msra.mxu1 %v8144_v53 }
 0x1a2   :  { %5124 = vmatprep.subr.bf16.mxu0 %v8009_v54  ;;  %5165 = vmatprep.subr.bf16.mxu1 %v8137_v55  ;;  %v8080_v54 = vcombine.low %v2118_v47, %v2122_v48  ;;  %v8208_v55 = vcombine.low %v2246_v49, %v2250_v50  ;;  %v9924_v49 = vld [vmem:[#allocation13 + $0x9c0] sm:$0xff] }
 0x1a3   :  { %v9926_v50 = vld [vmem:[#allocation13 + $0x9e0] sm:$0xff] }
 0x1a5   :  { %5125 = vmatpush1.bf16.msra.mxu0 %v8008_v0  ;;  %5166 = vmatpush1.bf16.msra.mxu1 %v8136_v5  ;;  %v2106_v5 = vld [vmem:[#allocation13 + $0x320] sm:$0xff] }
 0x1a6   :  { %5126 = vmatprep.subr.bf16.mxu0 %v8001_v6  ;;  %5167 = vmatprep.subr.bf16.mxu1 %v8129_v7  ;;  %v2230_v6 = vld [vmem:[#allocation13 + $0x700] sm:$0xff] }
 0x1a7   :  { %v2234_v7 = vld [vmem:[#allocation13 + $0x720] sm:$0xff] }
 0x1a9   :  { %5127 = vmatpush1.bf16.msra.mxu0 %v8000_v12  ;;  %5168 = vmatpush1.bf16.msra.mxu1 %v8128_v13  ;;  %v8065_v13 = vcombine.high %v2102_v59, %v2106_v5 }
 0x1aa   :  { %5128 = vmatprep.subr.bf16.mxu0 %v7993_v14  ;;  %5169 = vmatprep.subr.bf16.mxu1 %v8121_v15  ;;  %v8193_v14 = vcombine.high %v2230_v6, %v2234_v7  ;;  %v2094_v15 = vld [vmem:[#allocation13 + $0x2c0] sm:$0xff] }
 0x1ad   :  { %5129 = vmatpush1.bf16.msra.mxu0 %v7992_v20  ;;  %5170 = vmatpush1.bf16.msra.mxu1 %v8120_v21  ;;  %v8064_v20 = vcombine.low %v2102_v59, %v2106_v5  ;;  %v8192_v21 = vcombine.low %v2230_v6, %v2234_v7  ;;  %v1942_v6 = vlaneseq }
 0x1ae   :  { %5130 = vmatprep.subr.bf16.mxu0 %v7985_v22  ;;  %5171 = vmatprep.subr.bf16.mxu1 %v8113_v23  ;;  %v8057_v22 = vcombine.high %v2094_v15, %v2098_v17  ;;  %v8185_v23 = vcombine.high %v2222_v18, %v2226_v19 }
 0x1af   :  { %v9945_v7 = vshrl.u32 %v1942_v6, 7 }
 0x1b1   :  { %5131 = vmatpush1.bf16.msra.mxu0 %v7984_v28  ;;  %5172 = vmatpush1.bf16.msra.mxu1 %v8112_v29  ;;  %v8056_v28 = vcombine.low %v2094_v15, %v2098_v17  ;;  %v8184_v29 = vcombine.low %v2222_v18, %v2226_v19 }
 0x1b2   :  { %5132 = vmatprep.subr.bf16.mxu0 %v7977_v30  ;;  %5173 = vmatprep.subr.bf16.mxu1 %v8105_v31  ;;  %v8049_v30 = vcombine.high %v2086_v24, %v2090_v25  ;;  %v8177_v31 = vcombine.high %v2214_v26, %v2218_v27 }
 0x1b5   :  { %5133 = vmatpush1.bf16.msra.mxu0 %v7976_v63  ;;  %5174 = vmatpush1.bf16.msra.mxu1 %v8104_v36  ;;  %v2206_v63 = vld [vmem:[#allocation13 + $0x640] sm:$0xff] }
 0x1b6   :  { %5134 = vmatprep.subr.bf16.mxu0 %v7969_v37  ;;  %5175 = vmatprep.subr.bf16.mxu1 %v8097_v38  ;;  %v2210_v36 = vld [vmem:[#allocation13 + $0x660] sm:$0xff]  ;;  %v8040_v37 = vcombine.low %v2078_v34, %v2082_v35  ;;  %v8041_v38 = vcombine.high %v2078_v34, %v2082_v35 }
 0x1b7   :  { %v8168_v39 = vcombine.low %v2206_v63, %v2210_v36  ;;  %v8169_v40 = vcombine.high %v2206_v63, %v2210_v36  ;;  %v2310_v36 = vld [vmem:[#allocation13 + $0x980] sm:$0xff] }
 0x1b9   :  { %5135 = vmatpush1.bf16.msra.mxu0 %v7968_v43  ;;  %5176 = vmatpush1.bf16.msra.mxu1 %v8096_v44  ;;  %v2198_v43 = vld [vmem:[#allocation13 + $0x600] sm:$0xff]  ;;  %v8033_v44 = vcombine.high %v2070_v41, %v2074_v42 }
 0x1ba   :  { %5136 = vmatprep.subr.bf16.mxu0 %v8089_v45  ;;  %5177 = vmatprep.subr.bf16.mxu1 %v8217_v46  ;;  %v2202_v45 = vld [vmem:[#allocation13 + $0x620] sm:$0xff]  ;;  %v8032_v46 = vcombine.low %v2070_v41, %v2074_v42 }
 0x1bb   :  { %v9916_v2 = vpop.f32.mrf.mxu0  ;;  %v8160_v47 = vcombine.low %v2198_v43, %v2202_v45  ;;  %v8161_v48 = vcombine.high %v2198_v43, %v2202_v45 }
 0x1bc   :  { %v9918_v53 = vpop.f32.mrf.mxu1 }
 0x1bd   :  { %5137 = vmatpush2.bf16.msra.mxu0 %v8088_v60  ;;  %5178 = vmatpush2.bf16.msra.mxu1 %v8216_v61  ;;  %v9920_v56 = vpop.f32.mrf.mxu0  ;;  %v9928_v60 = vld [vmem:[#allocation13 + $0xdc0] sm:$0xff] }
 0x1be   :  { %5138 = vmatprep.subr.bf16.mxu0 %v8081_v62  ;;  %5179 = vmatprep.subr.bf16.mxu1 %v8209_v1  ;;  %v9922_v0 = vpop.f32.mrf.mxu1  ;;  %v9930_v61 = vld [vmem:[#allocation13 + $0xde0] sm:$0xff]  ;;  %v8280_v62 = vcombine.low %v9924_v49, %v9926_v50  ;;  %v8281_v1 = vcombine.high %v9924_v49, %v9926_v50 }
 0x1bf   :  { %v1566_v8 = vpop.f32.mrf.mxu0  ;;  %v8408_v3 = vcombine.low %v9928_v60, %v9930_v61  ;;  %v8409_v4 = vcombine.high %v9928_v60, %v9930_v61 }
 0x1c0   :  { %v1607_v9 = vpop.f32.mrf.mxu1  ;;  %v9948_v8 = vsub.s32 0, %v9945_v7 }
 0x1c1   :  { %5139 = vmatpush2.bf16.msra.mxu0 %v8080_v54  ;;  %5180 = vmatpush2.bf16.msra.mxu1 %v8208_v55  ;;  %v1567_v12 = vpop.f32.mrf.mxu0  ;;  %v9951_v9 = vsub.s32 2, %v9945_v7 }
 0x1c2   :  { %5140 = vmatprep.subr.bf16.mxu0 %v8073_v57  ;;  %5181 = vmatprep.subr.bf16.mxu1 %v8201_v58  ;;  %v1608_v16 = vpop.f32.mrf.mxu1  ;;  %v9959_v12 = vsub.s32 3, %v9945_v7 }
 0x1c5   :  { %5141 = vmatpush2.bf16.msra.mxu0 %v8072_v10  ;;  %5182 = vmatpush2.bf16.msra.mxu1 %v8200_v11  ;;  %v9953_v10 = vld [vmem:[#allocation11] sm:$0xff]  ;;  %v9956_v11 = vsub.s32 1, %v9945_v7 }
 0x1c6   :  { %5142 = vmatprep.subr.bf16.mxu0 %v8065_v13  ;;  %5183 = vmatprep.subr.bf16.mxu1 %v8193_v14  ;;  %v1945_v13 = vrot.slane %v9953_v10, %v9948_v8  ;;  %v1953_v14 = vrot.slane %v9953_v10, %v9951_v9 }
 0x1c7   :  { %v1949_v19 = vrot.slane %v9953_v10, %v9956_v11 }
 0x1c9   :  { %5143 = vmatpush2.bf16.msra.mxu0 %v8064_v20  ;;  %5184 = vmatpush2.bf16.msra.mxu1 %v8192_v21  ;;  %v1957_v20 = vrot.slane %v9953_v10, %v9959_v12 }
 0x1ca   :  { %5144 = vmatprep.subr.bf16.mxu0 %v8057_v22  ;;  %5185 = vmatprep.subr.bf16.mxu1 %v8185_v23 }
 0x1cd   :  { %5145 = vmatpush2.bf16.msra.mxu0 %v8056_v28  ;;  %5186 = vmatpush2.bf16.msra.mxu1 %v8184_v29 }
 0x1ce   :  { %5146 = vmatprep.subr.bf16.mxu0 %v8049_v30  ;;  %5187 = vmatprep.subr.bf16.mxu1 %v8177_v31  ;;  %v1972_v30 = vsub.s32 7, %v9945_v7 }
 0x1d0   :  { %v1973_v43 = vrot.slane %v9953_v10, %v1972_v30 }
 0x1d1   :  { %5147 = vmatpush2.bf16.msra.mxu0 %v8048_v32  ;;  %5188 = vmatpush2.bf16.msra.mxu1 %v8176_v33 }
 0x1d2   :  { %5148 = vmatprep.subr.bf16.mxu0 %v8041_v38  ;;  %5189 = vmatprep.subr.bf16.mxu1 %v8169_v40 }
 0x1d5   :  { %5149 = vmatpush2.bf16.msra.mxu0 %v8040_v37  ;;  %5190 = vmatpush2.bf16.msra.mxu1 %v8168_v39  ;;  %v2314_v37 = vld [vmem:[#allocation13 + $0x9a0] sm:$0xff] }
 0x1d6   :  { %5150 = vmatprep.subr.bf16.mxu0 %v8033_v44  ;;  %5191 = vmatprep.subr.bf16.mxu1 %v8161_v48  ;;  %v2442_v39 = vld [vmem:[#allocation13 + $0xda0] sm:$0xff] }
 0x1d9   :  { %5151 = vmatpush2.bf16.msra.mxu0 %v8032_v46  ;;  %5192 = vmatpush2.bf16.msra.mxu1 %v8160_v47  ;;  %v8273_v47 = vcombine.high %v2310_v36, %v2314_v37 }
 0x1da   :  { %5202 = vmatprep.subr.bf16.mxu0 %v8281_v1  ;;  %5243 = vmatprep.subr.bf16.mxu1 %v8409_v4 }
 0x1ef   :  { %v9940_v51 = vpop.f32.mrf.mxu0 }
 0x1f0   :  { %v9942_v52 = vpop.f32.mrf.mxu1 }
 0x1f1   :  { %v1646_v54 = vpop.f32.mrf.mxu0 }
 0x1f2   :  { %v1687_v55 = vpop.f32.mrf.mxu1 }
 0x1f3   :  { %v1648_v57 = vpop.f32.mrf.mxu0 }
 0x1f4   :  { %v1689_v58 = vpop.f32.mrf.mxu1 }
 0x1f5   :  { %v1649_v59 = vpop.f32.mrf.mxu0  ;;  %v2302_v58 = vld [vmem:[#allocation13 + $0x940] sm:$0xff] }
 0x1f6   :  { %v1690_v5 = vpop.f32.mrf.mxu1  ;;  %v2306_v59 = vld [vmem:[#allocation13 + $0x960] sm:$0xff] }
 0x1f7   :  { %v8264_v60 = vcombine.low %v2302_v58, %v2306_v59 }
 0x254   :  { %v1810_v15 = vpop.f32.mrf.mxu0  ;;  %v1851_v16 = vpop.f32.mrf.mxu1 }
 0x255   :  { %v1811_v17 = vadd.f32 %v1810_v15, %v9916_v2  ;;  %v1852_v18 = vadd.f32 %v1851_v16, %v9918_v53  ;;  %v1964_v53 = vsub.s32 5, %v9945_v7  ;;  %v2434_v15 = vld [vmem:[#allocation13 + $0xd60] sm:$0xff] }
 0x256   :  { %v1812_v21 = vpop.f32.mrf.mxu0  ;;  %v1853_v22 = vpop.f32.mrf.mxu1 }
 0x257   :  { %v1982_v23 = vadd.f32 %v1945_v13, %v1811_v17  ;;  %v1984_v24 = vadd.f32 %v1953_v14, %v1852_v18  ;;  %v1813_v25 = vadd.f32 %v1812_v21, %v9920_v56  ;;  %v1854_v26 = vadd.f32 %v1853_v22, %v9922_v0  ;;  %v2438_v0 = vld [vmem:[#allocation13 + $0xd80] sm:$0xff] }
 0x258   :  { %v1814_v27 = vpop.f32.mrf.mxu0  ;;  %v1855_v28 = vpop.f32.mrf.mxu1  ;;  %v1965_v42 = vrot.slane %v9953_v10, %v1964_v53  ;;  %v8401_v57 = vcombine.high %v2438_v0, %v2442_v39  ;;  %v2430_v14 = vld [vmem:[#allocation13 + $0xd40] sm:$0xff] }
 0x259   :  { %v1983_v29 = vadd.f32 %v1949_v19, %v1813_v25  ;;  %v1985_v2 = vadd.f32 %v1957_v20, %v1854_v26  ;;  %v1990_v31 = vmax.f32 %v1982_v23, 0.0  ;;  %v1992_v34 = vmax.f32 %v1984_v24, 0.0  ;;  %v2294_v24 = vld [vmem:[#allocation13 + $0x900] sm:$0xff] }
 0x25a   :  { %v1815_v32 = vpop.f32.mrf.mxu0  ;;  %v1856_v33 = vpop.f32.mrf.mxu1  ;;  %v8400_v19 = vcombine.low %v2438_v0, %v2442_v39  ;;  %v8265_v20 = vcombine.high %v2302_v58, %v2306_v59  ;;  %v8393_v23 = vcombine.high %v2430_v14, %v2434_v15  ;;  %v2298_v25 = vld [vmem:[#allocation13 + $0x920] sm:$0xff]  ;;  %v8392_v61 = vcombine.low %v2430_v14, %v2434_v15 }
 0x25b   :  { %v1991_v35 = vmax.f32 %v1983_v29, 0.0  ;;  %v1993_v63 = vmax.f32 %v1985_v2, 0.0  ;;  %v9989_v44 = vpack.c.bf16 %v1990_v31, %v1990_v31  ;;  %v9991_v48 = vpack.c.bf16 %v1992_v34, %v1992_v34  ;;  %v2422_v26 = vld [vmem:[#allocation13 + $0xd00] sm:$0xff] }
 0x25c   :  { %v9975_v38 = vpop.f32.mrf.mxu0  ;;  %v9977_v56 = vpop.f32.mrf.mxu1  ;;  %v2426_v27 = vld [vmem:[#allocation13 + $0xd20] sm:$0xff]  ;;  %v8256_v32 = vcombine.low %v2294_v24, %v2298_v25 }
 0x25d   :  { %v9979_v40 = vpack.c.bf16 %v1991_v35, %v1991_v35  ;;  %v9981_v41 = vpack.c.bf16 %v1993_v63, %v1993_v63  ;;  %v2286_v28 = vld [vmem:[#allocation13 + $0x8c0] sm:$0xff]  ;;  %v8384_v33 = vcombine.low %v2422_v26, %v2426_v27 }
 0x25e   :  { %v1894_v45 = vpop.f32.mrf.mxu0  ;;  %v1935_v46 = vpop.f32.mrf.mxu1  ;;  %v2290_v29 = vld [vmem:[#allocation13 + $0x8e0] sm:$0xff] }
 0x25f   :  { %v1895_v1 = vadd.f32 %v1894_v45, %v1646_v54  ;;  %v1936_v4 = vadd.f32 %v1935_v46, %v1687_v55  ;;  %5152 = vmatprep.mubr.bf16.mxu0 %v9979_v40  ;;  %5193 = vmatprep.mubr.bf16.mxu1 %v9981_v41  ;;  %v8272_v54 = vcombine.low %v2310_v36, %v2314_v37  ;;  %v2414_v2 = vld [vmem:[#allocation13 + $0xcc0] sm:$0xff] }
 0x260   :  { %v1896_v5 = vpop.f32.mrf.mxu0  ;;  %v1937_v13 = vpop.f32.mrf.mxu1  ;;  %5153 = vmatmul.mubr.bf16.vlgmr.msra.gmra.mxu0 %v9989_v44  ;;  %5194 = vmatmul.mubr.bf16.vlgmr.msra.gmra.mxu1 %v9991_v48  ;;  %v2418_v31 = vld [vmem:[#allocation13 + $0xce0] sm:$0xff]  ;;  %v8249_v34 = vcombine.high %v2286_v28, %v2290_v29  ;;  %v8248_v39 = vcombine.low %v2286_v28, %v2290_v29 }
 0x261   :  { %v1987_v16 = vadd.f32 %v1965_v42, %v1895_v1  ;;  %v1989_v17 = vadd.f32 %v1973_v43, %v1936_v4  ;;  %5203 = vmatpush1.bf16.msra.mxu0 %v8280_v62  ;;  %5244 = vmatpush1.bf16.msra.mxu1 %v8408_v3  ;;  %v8257_v62 = vcombine.high %v2294_v24, %v2298_v25  ;;  %v2278_v63 = vld [vmem:[#allocation13 + $0x880] sm:$0xff] }
 0x262   :  { %v1897_v55 = vpop.f32.mrf.mxu0  ;;  %v1938_v18 = vpop.f32.mrf.mxu1  ;;  %5204 = vmatprep.subr.bf16.mxu0 %v8273_v47  ;;  %5245 = vmatprep.subr.bf16.mxu1 %v8401_v57  ;;  %v8385_v3 = vcombine.high %v2422_v26, %v2426_v27  ;;  %v8377_v35 = vcombine.high %v2414_v2, %v2418_v31  ;;  %v2282_v36 = vld [vmem:[#allocation13 + $0x8a0] sm:$0xff]  ;;  %v8376_v42 = vcombine.low %v2414_v2, %v2418_v31 }
 0x263   :  { %v1995_v21 = vmax.f32 %v1987_v16, 0.0  ;;  %v1997_v22 = vmax.f32 %v1989_v17, 0.0  ;;  %v2406_v37 = vld [vmem:[#allocation13 + $0xc80] sm:$0xff]  ;;  %v8241_v43 = vcombine.high %v2278_v63, %v2282_v36  ;;  %v8240_v57 = vcombine.low %v2278_v63, %v2282_v36 }
 0x264   :  { %v2410_v0 = vld [vmem:[#allocation13 + $0xca0] sm:$0xff] }
 0x265   :  { %v10003_v49 = vpack.c.bf16 %v1995_v21, %v1995_v21  ;;  %v10005_v50 = vpack.c.bf16 %v1997_v22, %v1997_v22  ;;  %5205 = vmatpush1.bf16.msra.mxu0 %v8272_v54  ;;  %5246 = vmatpush1.bf16.msra.mxu1 %v8400_v19  ;;  %v8369_v45 = vcombine.high %v2406_v37, %v2410_v0  ;;  %v2270_v46 = vld [vmem:[#allocation13 + $0x840] sm:$0xff] }
 0x266   :  { %5206 = vmatprep.subr.bf16.mxu0 %v8265_v20  ;;  %5247 = vmatprep.subr.bf16.mxu1 %v8393_v23  ;;  %v2274_v47 = vld [vmem:[#allocation13 + $0x860] sm:$0xff]  ;;  %v8368_v58 = vcombine.low %v2406_v37, %v2410_v0 }
 0x267   :  { %5234 = vmatprep.mubr.bf16.mxu0 %v10003_v49  ;;  %5275 = vmatprep.mubr.bf16.mxu1 %v10005_v50  ;;  %v2398_v1 = vld [vmem:[#allocation13 + $0xc40] sm:$0xff]  ;;  %v8233_v59 = vcombine.high %v2270_v46, %v2274_v47  ;;  %v8232_v17 = vcombine.low %v2270_v46, %v2274_v47 }
 0x268   :  { %v2402_v4 = vld [vmem:[#allocation13 + $0xc60] sm:$0xff] }
 0x269   :  { %5207 = vmatpush1.bf16.msra.mxu0 %v8264_v60  ;;  %5248 = vmatpush1.bf16.msra.mxu1 %v8392_v61  ;;  %v8361_v5 = vcombine.high %v2398_v1, %v2402_v4  ;;  %v2262_v13 = vld [vmem:[#allocation13 + $0x800] sm:$0xff]  ;;  %v8360_v54 = vcombine.low %v2398_v1, %v2402_v4 }
 0x26a   :  { %5208 = vmatprep.subr.bf16.mxu0 %v8257_v62  ;;  %5249 = vmatprep.subr.bf16.mxu1 %v8385_v3  ;;  %v2266_v14 = vld [vmem:[#allocation13 + $0x820] sm:$0xff] }
 0x26b   :  { %v2390_v15 = vld [vmem:[#allocation13 + $0xc00] sm:$0xff]  ;;  %v8225_v55 = vcombine.high %v2262_v13, %v2266_v14  ;;  %v8224_v23 = vcombine.low %v2262_v13, %v2266_v14 }
 0x26c   :  { %v2394_v16 = vld [vmem:[#allocation13 + $0xc20] sm:$0xff] }
 0x26d   :  { %5209 = vmatpush1.bf16.msra.mxu0 %v8256_v32  ;;  %5250 = vmatpush1.bf16.msra.mxu1 %v8384_v33  ;;  %v8353_v18 = vcombine.high %v2390_v15, %v2394_v16  ;;  %v2382_v19 = vld [vmem:[#allocation13 + $0xbc0] sm:$0xff]  ;;  %v8352_v24 = vcombine.low %v2390_v15, %v2394_v16 }
 0x26e   :  { %5210 = vmatprep.subr.bf16.mxu0 %v8249_v34  ;;  %5251 = vmatprep.subr.bf16.mxu1 %v8377_v35  ;;  %v2386_v20 = vld [vmem:[#allocation13 + $0xbe0] sm:$0xff] }
 0x26f   :  { %v2510_v21 = vld [vmem:[#allocation13 + $0xfc0] sm:$0xff]  ;;  %v8345_v25 = vcombine.high %v2382_v19, %v2386_v20  ;;  %v8344_v3 = vcombine.low %v2382_v19, %v2386_v20 }
 0x270   :  { %v2514_v22 = vld [vmem:[#allocation13 + $0xfe0] sm:$0xff] }
 0x271   :  { %5211 = vmatpush1.bf16.msra.mxu0 %v8248_v39  ;;  %5252 = vmatpush1.bf16.msra.mxu1 %v8376_v42  ;;  %v8473_v26 = vcombine.high %v2510_v21, %v2514_v22  ;;  %v2374_v27 = vld [vmem:[#allocation13 + $0xb80] sm:$0xff]  ;;  %v8472_v28 = vcombine.low %v2510_v21, %v2514_v22  ;;  %v10013_v22 = vsub.s32 6, %v9945_v7 }
 0x272   :  { %5212 = vmatprep.subr.bf16.mxu0 %v8241_v43  ;;  %5253 = vmatprep.subr.bf16.mxu1 %v8369_v45  ;;  %v2378_v60 = vld [vmem:[#allocation13 + $0xba0] sm:$0xff] }
 0x273   :  { %v2502_v61 = vld [vmem:[#allocation13 + $0xf80] sm:$0xff]  ;;  %v8337_v29 = vcombine.high %v2374_v27, %v2378_v60  ;;  %v8336_v35 = vcombine.low %v2374_v27, %v2378_v60 }
 0x274   :  { %v2506_v62 = vld [vmem:[#allocation13 + $0xfa0] sm:$0xff] }
 0x275   :  { %5213 = vmatpush1.bf16.msra.mxu0 %v8240_v57  ;;  %5254 = vmatpush1.bf16.msra.mxu1 %v8368_v58  ;;  %v8465_v2 = vcombine.high %v2502_v61, %v2506_v62  ;;  %v2366_v31 = vld [vmem:[#allocation13 + $0xb40] sm:$0xff]  ;;  %v8464_v63 = vcombine.low %v2502_v61, %v2506_v62  ;;  %v1893_v62 = vadd.f32 %v9975_v38, %v9940_v51 }
 0x276   :  { %5214 = vmatprep.subr.bf16.mxu0 %v8233_v59  ;;  %5255 = vmatprep.subr.bf16.mxu1 %v8361_v5  ;;  %v2370_v32 = vld [vmem:[#allocation13 + $0xb60] sm:$0xff] }
 0x277   :  { %v2494_v33 = vld [vmem:[#allocation13 + $0xf40] sm:$0xff]  ;;  %v8329_v36 = vcombine.high %v2366_v31, %v2370_v32  ;;  %v8328_v45 = vcombine.low %v2366_v31, %v2370_v32 }
 0x278   :  { %v2498_v34 = vld [vmem:[#allocation13 + $0xf60] sm:$0xff] }
 0x279   :  { %5215 = vmatpush1.bf16.msra.mxu0 %v8232_v17  ;;  %5256 = vmatpush1.bf16.msra.mxu1 %v8360_v54  ;;  %v8457_v37 = vcombine.high %v2494_v33, %v2498_v34  ;;  %v2358_v0 = vld [vmem:[#allocation13 + $0xb00] sm:$0xff]  ;;  %v8456_v46 = vcombine.low %v2494_v33, %v2498_v34 }
 0x27a   :  { %5216 = vmatprep.subr.bf16.mxu0 %v8225_v55  ;;  %5257 = vmatprep.subr.bf16.mxu1 %v8353_v18  ;;  %v2362_v39 = vld [vmem:[#allocation13 + $0xb20] sm:$0xff]  ;;  %v10010_v18 = vsub.s32 4, %v9945_v7 }
 0x27b   :  { %v2486_v42 = vld [vmem:[#allocation13 + $0xf00] sm:$0xff]  ;;  %v8321_v47 = vcombine.high %v2358_v0, %v2362_v39  ;;  %v8320_v5 = vcombine.low %v2358_v0, %v2362_v39  ;;  %v2191_v39 = vld [vmem:[#allocation13 + $0x5c8] sm:$0xff] }
 0x27c   :  { %v2490_v43 = vld [vmem:[#allocation13 + $0xf20] sm:$0xff]  ;;  %v1961_v60 = vrot.slane %v9953_v10, %v10010_v18 }
 0x27d   :  { %5217 = vmatpush1.bf16.msra.mxu0 %v8224_v23  ;;  %5258 = vmatpush1.bf16.msra.mxu1 %v8352_v24  ;;  %v8449_v1 = vcombine.high %v2486_v42, %v2490_v43  ;;  %v2350_v4 = vld [vmem:[#allocation13 + $0xac0] sm:$0xff]  ;;  %v8448_v13 = vcombine.low %v2486_v42, %v2490_v43 }
 0x27e   :  { %5218 = vmatprep.subr.bf16.mxu0 %v8345_v25  ;;  %5259 = vmatprep.subr.bf16.mxu1 %v8473_v26  ;;  %v2354_v57 = vld [vmem:[#allocation13 + $0xae0] sm:$0xff] }
 0x27f   :  { %v2478_v58 = vld [vmem:[#allocation13 + $0xec0] sm:$0xff]  ;;  %v8313_v14 = vcombine.high %v2350_v4, %v2354_v57  ;;  %v8312_v19 = vcombine.low %v2350_v4, %v2354_v57  ;;  %v2055_v4 = vld [vmem:[#allocation13 + $0x188] sm:$0xff] }
 0x280   :  { %v2482_v59 = vld [vmem:[#allocation13 + $0xee0] sm:$0xff]  ;;  %v2059_v57 = vld [vmem:[#allocation13 + $0x1a8] sm:$0xff] }
 0x281   :  { %5219 = vmatpush2.bf16.msra.mxu0 %v8344_v3  ;;  %5260 = vmatpush2.bf16.msra.mxu1 %v8472_v28  ;;  %v8441_v15 = vcombine.high %v2478_v58, %v2482_v59  ;;  %v2342_v16 = vld [vmem:[#allocation13 + $0xa80] sm:$0xff]  ;;  %v8440_v20 = vcombine.low %v2478_v58, %v2482_v59  ;;  %v2183_v59 = vld [vmem:[#allocation13 + $0x588] sm:$0xff] }
 0x282   :  { %5220 = vmatprep.subr.bf16.mxu0 %v8337_v29  ;;  %5261 = vmatprep.subr.bf16.mxu1 %v8465_v2  ;;  %v2346_v17 = vld [vmem:[#allocation13 + $0xaa0] sm:$0xff]  ;;  %v1934_v29 = vadd.f32 %v9977_v56, %v9942_v52  ;;  %v1969_v2 = vrot.slane %v9953_v10, %v10013_v22  ;;  %v2063_v52 = vld [vmem:[#allocation13 + $0x1c8] sm:$0xff] }
 0x283   :  { %v2470_v54 = vld [vmem:[#allocation13 + $0xe80] sm:$0xff]  ;;  %v8305_v21 = vcombine.high %v2342_v16, %v2346_v17  ;;  %v8304_v61 = vcombine.low %v2342_v16, %v2346_v17  ;;  %v2067_v56 = vld [vmem:[#allocation13 + $0x1e8] sm:$0xff]  ;;  %v8019_v16 = vcombine.high %v2055_v4, %v2059_v57 }
 0x284   :  { %v2474_v55 = vld [vmem:[#allocation13 + $0xea0] sm:$0xff]  ;;  %v2195_v10 = vld [vmem:[#allocation13 + $0x5e8] sm:$0xff]  ;;  %v8026_v58 = vcombine.low %v2063_v52, %v2067_v56 }
 0x285   :  { %5221 = vmatpush2.bf16.msra.mxu0 %v8336_v35  ;;  %5262 = vmatpush2.bf16.msra.mxu1 %v8464_v63  ;;  %v8433_v23 = vcombine.high %v2470_v54, %v2474_v55  ;;  %v2334_v24 = vld [vmem:[#allocation13 + $0xa40] sm:$0xff]  ;;  %v8432_v3 = vcombine.low %v2470_v54, %v2474_v55  ;;  %v2047_v17 = vld [vmem:[#allocation13 + $0x148] sm:$0xff] }
 0x286   :  { %5222 = vmatprep.subr.bf16.mxu0 %v8329_v36  ;;  %5263 = vmatprep.subr.bf16.mxu1 %v8457_v37  ;;  %v2338_v25 = vld [vmem:[#allocation13 + $0xa60] sm:$0xff]  ;;  %v1986_v36 = vadd.f32 %v1961_v60, %v1893_v62  ;;  %v1988_v37 = vadd.f32 %v1969_v2, %v1934_v29  ;;  %v2051_v54 = vld [vmem:[#allocation13 + $0x168] sm:$0xff] }
 0x287   :  { %v2462_v26 = vld [vmem:[#allocation13 + $0xe40] sm:$0xff]  ;;  %v8297_v28 = vcombine.high %v2334_v24, %v2338_v25  ;;  %v8296_v63 = vcombine.low %v2334_v24, %v2338_v25  ;;  %v8011_v24 = vcombine.high %v2047_v17, %v2051_v54  ;;  %v2167_v60 = vld [vmem:[#allocation13 + $0x508] sm:$0xff]  ;;  %v8010_v62 = vcombine.low %v2047_v17, %v2051_v54 }
 0x288   :  { %v2466_v27 = vld [vmem:[#allocation13 + $0xe60] sm:$0xff]  ;;  %v1994_v43 = vmax.f32 %v1986_v36, 0.0  ;;  %v2031_v2 = vld [vmem:[#allocation13 + $0xc8] sm:$0xff] }
 0x289   :  { %5223 = vmatpush2.bf16.msra.mxu0 %v8328_v45  ;;  %5264 = vmatpush2.bf16.msra.mxu1 %v8456_v46  ;;  %v8425_v31 = vcombine.high %v2462_v26, %v2466_v27  ;;  %v2326_v32 = vld [vmem:[#allocation13 + $0xa00] sm:$0xff]  ;;  %v8424_v51 = vcombine.low %v2462_v26, %v2466_v27  ;;  %v8027_v46 = vcombine.high %v2063_v52, %v2067_v56  ;;  %v2039_v26 = vld [vmem:[#allocation13 + $0x108] sm:$0xff] }
 0x28a   :  { %5224 = vmatprep.subr.bf16.mxu0 %v8321_v47  ;;  %5265 = vmatprep.subr.bf16.mxu1 %v8449_v1  ;;  %v2330_v33 = vld [vmem:[#allocation13 + $0xa20] sm:$0xff]  ;;  %v1996_v47 = vmax.f32 %v1988_v37, 0.0  ;;  %v8155_v1 = vcombine.high %v2191_v39, %v2195_v10  ;;  %v2043_v27 = vld [vmem:[#allocation13 + $0x128] sm:$0xff] }
 0x28b   :  { %v2454_v34 = vld [vmem:[#allocation13 + $0xe00] sm:$0xff]  ;;  %v8289_v38 = vcombine.high %v2326_v32, %v2330_v33  ;;  %v8288_v42 = vcombine.low %v2326_v32, %v2330_v33  ;;  %v2159_v32 = vld [vmem:[#allocation13 + $0x4c8] sm:$0xff] }
 0x28c   :  { %v2458_v35 = vld [vmem:[#allocation13 + $0xe20] sm:$0xff]  ;;  %v2163_v33 = vld [vmem:[#allocation13 + $0x4e8] sm:$0xff] }
 0x28d   :  { %5225 = vmatpush2.bf16.msra.mxu0 %v8320_v5  ;;  %5266 = vmatpush2.bf16.msra.mxu1 %v8448_v13  ;;  %v8417_v0 = vcombine.high %v2454_v34, %v2458_v35  ;;  %v8416_v45 = vcombine.low %v2454_v34, %v2458_v35  ;;  %v2187_v5 = vld [vmem:[#allocation13 + $0x5a8] sm:$0xff]  ;;  %v10023_v13 = vpack.c.bf16 %v1994_v43, %v1994_v43 }
 0x28e   :  { %5226 = vmatprep.subr.bf16.mxu0 %v8313_v14  ;;  %5267 = vmatprep.subr.bf16.mxu1 %v8441_v15  ;;  %v8154_v14 = vcombine.low %v2191_v39, %v2195_v10  ;;  %v10025_v15 = vpack.c.bf16 %v1996_v47, %v1996_v47  ;;  %v8147_v55 = vcombine.high %v2183_v59, %v2187_v5  ;;  %v2151_v37 = vld [vmem:[#allocation13 + $0x488] sm:$0xff] }
 0x28f   :  { %v8002_v34 = vcombine.low %v2039_v26, %v2043_v27  ;;  %v8123_v36 = vcombine.high %v2159_v32, %v2163_v33  ;;  %v8122_v56 = vcombine.low %v2159_v32, %v2163_v33  ;;  %v2019_v43 = vld [vmem:[#allocation13 + $0x68] sm:$0xff] }
 0x290   :  { %v2111_v32 = vld [vmem:[#allocation13 + $0x348] sm:$0xff] }
 0x291   :  { %5227 = vmatpush2.bf16.msra.mxu0 %v8312_v19  ;;  %5268 = vmatpush2.bf16.msra.mxu1 %v8440_v20  ;;  %v2175_v19 = vld [vmem:[#allocation13 + $0x548] sm:$0xff] }
 0x292   :  { %5228 = vmatprep.subr.bf16.mxu0 %v8305_v21  ;;  %5269 = vmatprep.subr.bf16.mxu1 %v8433_v23  ;;  %v2179_v20 = vld [vmem:[#allocation13 + $0x568] sm:$0xff]  ;;  %v8018_v21 = vcombine.low %v2055_v4, %v2059_v57  ;;  %v8146_v23 = vcombine.low %v2183_v59, %v2187_v5 }
 0x293   :  { %v8139_v25 = vcombine.high %v2175_v19, %v2179_v20  ;;  %v2011_v59 = vld [vmem:[#allocation13 + $0x28] sm:$0xff] }
 0x294   :  { %v2135_v5 = vld [vmem:[#allocation13 + $0x408] sm:$0xff] }
 0x295   :  { %5229 = vmatpush2.bf16.msra.mxu0 %v8304_v61  ;;  %5270 = vmatpush2.bf16.msra.mxu1 %v8432_v3  ;;  %v2171_v61 = vld [vmem:[#allocation13 + $0x528] sm:$0xff]  ;;  %v8138_v3 = vcombine.low %v2175_v19, %v2179_v20 }
 0x296   :  { %5230 = vmatprep.subr.bf16.mxu0 %v8297_v28  ;;  %5271 = vmatprep.subr.bf16.mxu1 %v8425_v31  ;;  %v8003_v28 = vcombine.high %v2039_v26, %v2043_v27  ;;  %v8131_v29 = vcombine.high %v2167_v60, %v2171_v61  ;;  %v2035_v31 = vld [vmem:[#allocation13 + $0xe8] sm:$0xff]  ;;  %v8130_v35 = vcombine.low %v2167_v60, %v2171_v61 }
 0x297   :  { %v7994_v52 = vcombine.low %v2031_v2, %v2035_v31  ;;  %v2127_v19 = vld [vmem:[#allocation13 + $0x3c8] sm:$0xff] }
 0x298   :  { %v2131_v20 = vld [vmem:[#allocation13 + $0x3e8] sm:$0xff] }
 0x299   :  { %5231 = vmatpush2.bf16.msra.mxu0 %v8296_v63  ;;  %5272 = vmatpush2.bf16.msra.mxu1 %v8424_v51  ;;  %v7995_v63 = vcombine.high %v2031_v2, %v2035_v31  ;;  %v2023_v51 = vld [vmem:[#allocation13 + $0x88] sm:$0xff]  ;;  %v8091_v26 = vcombine.high %v2127_v19, %v2131_v20 }
 0x29a   :  { %5232 = vmatprep.subr.bf16.mxu0 %v8289_v38  ;;  %5273 = vmatprep.subr.bf16.mxu1 %v8417_v0  ;;  %v2027_v38 = vld [vmem:[#allocation13 + $0xa8] sm:$0xff] }
 0x29b   :  { %v2155_v0 = vld [vmem:[#allocation13 + $0x4a8] sm:$0xff]  ;;  %v7987_v39 = vcombine.high %v2023_v51, %v2027_v38  ;;  %v7986_v47 = vcombine.low %v2023_v51, %v2027_v38 }
 0x29c   :  { %v8115_v10 = vcombine.high %v2151_v37, %v2155_v0  ;;  %v2119_v60 = vld [vmem:[#allocation13 + $0x388] sm:$0xff] }
 0x29d   :  { %5233 = vmatpush2.bf16.msra.mxu0 %v8288_v42  ;;  %5274 = vmatpush2.bf16.msra.mxu1 %v8416_v45  ;;  %v2015_v42 = vld [vmem:[#allocation13 + $0x48] sm:$0xff] }
 0x29e   :  { %5284 = vmatprep.subr.bf16.mxu0 %v8027_v46  ;;  %5325 = vmatprep.subr.bf16.mxu1 %v8155_v1  ;;  %v2143_v45 = vld [vmem:[#allocation13 + $0x448] sm:$0xff]  ;;  %v8114_v1 = vcombine.low %v2151_v37, %v2155_v0  ;;  %v7979_v4 = vcombine.high %v2015_v42, %v2019_v43 }
 0x29f   :  { %v2147_v46 = vld [vmem:[#allocation13 + $0x468] sm:$0xff] }
 0x2a0   :  { %5235 = vmatmul.mubr.bf16.vlgmr.msra.gmra.mxu0 %v10023_v13  ;;  %5276 = vmatmul.mubr.bf16.vlgmr.msra.gmra.mxu1 %v10025_v15  ;;  %v8107_v57 = vcombine.high %v2143_v45, %v2147_v46  ;;  %v8106_v17 = vcombine.low %v2143_v45, %v2147_v46  ;;  %v2123_v61 = vld [vmem:[#allocation13 + $0x3a8] sm:$0xff] }
 0x2a1   :  { %5285 = vmatpush1.bf16.msra.mxu0 %v8026_v58  ;;  %5316 = vmatprep.mubr.bf16.mxu0 %v9979_v40  ;;  %v2007_v58 = vld [vmem:[#allocation13 + $0x8] sm:$0xff]  ;;  %v8083_v2 = vcombine.high %v2119_v60, %v2123_v61 }
 0x2a2   :  { %5326 = vmatpush1.bf16.msra.mxu1 %v8154_v14  ;;  %5357 = vmatprep.mubr.bf16.mxu1 %v9981_v41  ;;  %v2139_v14 = vld [vmem:[#allocation13 + $0x428] sm:$0xff]  ;;  %v7971_v54 = vcombine.high %v2007_v58, %v2011_v59 }
 0x2a3   :  { %5286 = vmatprep.subr.bf16.mxu0 %v8019_v16  ;;  %5327 = vmatprep.subr.bf16.mxu1 %v8147_v55  ;;  %v7978_v16 = vcombine.low %v2015_v42, %v2019_v43  ;;  %v8099_v55 = vcombine.high %v2135_v5, %v2139_v14  ;;  %v2115_v33 = vld [vmem:[#allocation13 + $0x368] sm:$0xff] }
 0x2a4   :  { %v8075_v51 = vcombine.high %v2111_v32, %v2115_v33  ;;  %v2103_v37 = vld [vmem:[#allocation13 + $0x308] sm:$0xff] }
 0x2a5   :  { %5287 = vmatpush1.bf16.msra.mxu0 %v8018_v21  ;;  %v2255_v21 = vld [vmem:[#allocation13 + $0x7c8] sm:$0xff] }
 0x2a6   :  { %5328 = vmatpush1.bf16.msra.mxu1 %v8146_v23  ;;  %5288 = vmatprep.subr.bf16.mxu0 %v8011_v24  ;;  %v2259_v23 = vld [vmem:[#allocation13 + $0x7e8] sm:$0xff]  ;;  %v7970_v24 = vcombine.low %v2007_v58, %v2011_v59 }
 0x2a7   :  { %5329 = vmatprep.subr.bf16.mxu1 %v8139_v25  ;;  %v8098_v25 = vcombine.low %v2135_v5, %v2139_v14  ;;  %v8219_v27 = vcombine.high %v2255_v21, %v2259_v23  ;;  %v2107_v0 = vld [vmem:[#allocation13 + $0x328] sm:$0xff] }
 0x2a8   :  { %v8067_v42 = vcombine.high %v2103_v37, %v2107_v0  ;;  %v2095_v45 = vld [vmem:[#allocation13 + $0x2c8] sm:$0xff] }
 0x2a9   :  { %5289 = vmatpush1.bf16.msra.mxu0 %v8010_v62  ;;  %v2247_v62 = vld [vmem:[#allocation13 + $0x788] sm:$0xff] }
 0x2aa   :  { %5330 = vmatpush1.bf16.msra.mxu1 %v8138_v3  ;;  %5290 = vmatprep.subr.bf16.mxu0 %v8003_v28  ;;  %v2251_v3 = vld [vmem:[#allocation13 + $0x7a8] sm:$0xff]  ;;  %v8090_v28 = vcombine.low %v2127_v19, %v2131_v20 }
 0x2ab   :  { %5331 = vmatprep.subr.bf16.mxu1 %v8131_v29  ;;  %v8218_v29 = vcombine.low %v2255_v21, %v2259_v23  ;;  %v8211_v31 = vcombine.high %v2247_v62, %v2251_v3  ;;  %v2099_v46 = vld [vmem:[#allocation13 + $0x2e8] sm:$0xff] }
 0x2ac   :  { %v8059_v58 = vcombine.high %v2095_v45, %v2099_v46  ;;  %v2087_v5 = vld [vmem:[#allocation13 + $0x288] sm:$0xff] }
 0x2ad   :  { %5291 = vmatpush1.bf16.msra.mxu0 %v8002_v34  ;;  %v2239_v34 = vld [vmem:[#allocation13 + $0x748] sm:$0xff] }
 0x2ae   :  { %5332 = vmatpush1.bf16.msra.mxu1 %v8130_v35  ;;  %5292 = vmatprep.subr.bf16.mxu0 %v7995_v63  ;;  %v2243_v35 = vld [vmem:[#allocation13 + $0x768] sm:$0xff]  ;;  %v8082_v63 = vcombine.low %v2119_v60, %v2123_v61 }
 0x2af   :  { %5333 = vmatprep.subr.bf16.mxu1 %v8123_v36  ;;  %v8210_v36 = vcombine.low %v2247_v62, %v2251_v3  ;;  %v8203_v38 = vcombine.high %v2239_v34, %v2243_v35  ;;  %v2091_v14 = vld [vmem:[#allocation13 + $0x2a8] sm:$0xff] }
 0x2b0   :  { %v8051_v19 = vcombine.high %v2087_v5, %v2091_v14  ;;  %v2079_v21 = vld [vmem:[#allocation13 + $0x248] sm:$0xff] }
 0x2b1   :  { %5293 = vmatpush1.bf16.msra.mxu0 %v7994_v52  ;;  %v2231_v52 = vld [vmem:[#allocation13 + $0x708] sm:$0xff] }
 0x2b2   :  { %5334 = vmatpush1.bf16.msra.mxu1 %v8122_v56  ;;  %5294 = vmatprep.subr.bf16.mxu0 %v7987_v39  ;;  %v2235_v56 = vld [vmem:[#allocation13 + $0x728] sm:$0xff]  ;;  %v8074_v39 = vcombine.low %v2111_v32, %v2115_v33 }
 0x2b3   :  { %5335 = vmatprep.subr.bf16.mxu1 %v8115_v10  ;;  %v8202_v10 = vcombine.low %v2239_v34, %v2243_v35  ;;  %v8195_v43 = vcombine.high %v2231_v52, %v2235_v56  ;;  %v2083_v23 = vld [vmem:[#allocation13 + $0x268] sm:$0xff] }
 0x2b4   :  { %v8043_v60 = vcombine.high %v2079_v21, %v2083_v23  ;;  %v2071_v62 = vld [vmem:[#allocation13 + $0x208] sm:$0xff] }
 0x2b5   :  { %5295 = vmatpush1.bf16.msra.mxu0 %v7986_v47  ;;  %v2223_v47 = vld [vmem:[#allocation13 + $0x6c8] sm:$0xff] }
 0x2b6   :  { %5336 = vmatpush1.bf16.msra.mxu1 %v8114_v1  ;;  %5296 = vmatprep.subr.bf16.mxu0 %v7979_v4  ;;  %v2227_v1 = vld [vmem:[#allocation13 + $0x6e8] sm:$0xff]  ;;  %v8066_v4 = vcombine.low %v2103_v37, %v2107_v0 }
 0x2b7   :  { %5337 = vmatprep.subr.bf16.mxu1 %v8107_v57  ;;  %v8194_v57 = vcombine.low %v2231_v52, %v2235_v56  ;;  %v8187_v59 = vcombine.high %v2223_v47, %v2227_v1  ;;  %v2075_v3 = vld [vmem:[#allocation13 + $0x228] sm:$0xff] }
 0x2b8   :  { %v8035_v32 = vcombine.high %v2071_v62, %v2075_v3  ;;  %v2319_v34 = vld [vmem:[#allocation13 + $0x9c8] sm:$0xff] }
 0x2b9   :  { %5297 = vmatpush1.bf16.msra.mxu0 %v7978_v16  ;;  %v2215_v16 = vld [vmem:[#allocation13 + $0x688] sm:$0xff] }
 0x2ba   :  { %5338 = vmatpush1.bf16.msra.mxu1 %v8106_v17  ;;  %5298 = vmatprep.subr.bf16.mxu0 %v7971_v54  ;;  %v2219_v17 = vld [vmem:[#allocation13 + $0x6a8] sm:$0xff]  ;;  %v8058_v54 = vcombine.low %v2095_v45, %v2099_v46 }
 0x2bb   :  { %5339 = vmatprep.subr.bf16.mxu1 %v8099_v55  ;;  %v8186_v55 = vcombine.low %v2223_v47, %v2227_v1  ;;  %v8179_v20 = vcombine.high %v2215_v16, %v2219_v17  ;;  %v2323_v35 = vld [vmem:[#allocation13 + $0x9e8] sm:$0xff] }
 0x2bc   :  { %v8283_v37 = vcombine.high %v2319_v34, %v2323_v35  ;;  %v2311_v52 = vld [vmem:[#allocation13 + $0x988] sm:$0xff] }
 0x2bd   :  { %5299 = vmatpush1.bf16.msra.mxu0 %v7970_v24  ;;  %v2207_v24 = vld [vmem:[#allocation13 + $0x648] sm:$0xff] }
 0x2be   :  { %5340 = vmatpush1.bf16.msra.mxu1 %v8098_v25  ;;  %5300 = vmatprep.subr.bf16.mxu0 %v8091_v26  ;;  %v2211_v25 = vld [vmem:[#allocation13 + $0x668] sm:$0xff]  ;;  %v8050_v26 = vcombine.low %v2087_v5, %v2091_v14 }
 0x2bf   :  { %5341 = vmatprep.subr.bf16.mxu1 %v8219_v27  ;;  %v8178_v27 = vcombine.low %v2215_v16, %v2219_v17  ;;  %v8171_v61 = vcombine.high %v2207_v24, %v2211_v25  ;;  %v2315_v56 = vld [vmem:[#allocation13 + $0x9a8] sm:$0xff] }
 0x2c0   :  { %v8275_v45 = vcombine.high %v2311_v52, %v2315_v56  ;;  %v2303_v46 = vld [vmem:[#allocation13 + $0x948] sm:$0xff] }
 0x2c1   :  { %5301 = vmatpush2.bf16.msra.mxu0 %v8090_v28  ;;  %v2199_v28 = vld [vmem:[#allocation13 + $0x608] sm:$0xff] }
 0x2c2   :  { %5342 = vmatpush2.bf16.msra.mxu1 %v8218_v29  ;;  %5302 = vmatprep.subr.bf16.mxu0 %v8083_v2  ;;  %v2203_v29 = vld [vmem:[#allocation13 + $0x628] sm:$0xff]  ;;  %v8042_v2 = vcombine.low %v2079_v21, %v2083_v23 }
 0x2c3   :  { %5343 = vmatprep.subr.bf16.mxu1 %v8211_v31  ;;  %v8170_v31 = vcombine.low %v2207_v24, %v2211_v25  ;;  %v8163_v33 = vcombine.high %v2199_v28, %v2203_v29  ;;  %v2307_v47 = vld [vmem:[#allocation13 + $0x968] sm:$0xff] }
 0x2c4   :  { %v8267_v5 = vcombine.high %v2303_v46, %v2307_v47  ;;  %v2295_v16 = vld [vmem:[#allocation13 + $0x908] sm:$0xff] }
 0x2c5   :  { %5303 = vmatpush2.bf16.msra.mxu0 %v8082_v63  ;;  %v2447_v63 = vld [vmem:[#allocation13 + $0xdc8] sm:$0xff] }
 0x2c6   :  { %5344 = vmatpush2.bf16.msra.mxu1 %v8210_v36  ;;  %5304 = vmatprep.subr.bf16.mxu0 %v8075_v51  ;;  %v2451_v36 = vld [vmem:[#allocation13 + $0xde8] sm:$0xff]  ;;  %v8034_v51 = vcombine.low %v2071_v62, %v2075_v3 }
 0x2c7   :  { %5345 = vmatprep.subr.bf16.mxu1 %v8203_v38  ;;  %v8162_v38 = vcombine.low %v2199_v28, %v2203_v29  ;;  %v8411_v0 = vcombine.high %v2447_v63, %v2451_v36  ;;  %v2299_v17 = vld [vmem:[#allocation13 + $0x928] sm:$0xff] }
 0x2c8   :  { %v8259_v21 = vcombine.high %v2295_v16, %v2299_v17  ;;  %v2287_v24 = vld [vmem:[#allocation13 + $0x8c8] sm:$0xff] }
 0x2c9   :  { %5305 = vmatpush2.bf16.msra.mxu0 %v8074_v39  ;;  %v8282_v39 = vcombine.low %v2319_v34, %v2323_v35  ;;  %v2291_v25 = vld [vmem:[#allocation13 + $0x8e8] sm:$0xff] }
 0x2ca   :  { %5346 = vmatpush2.bf16.msra.mxu1 %v8202_v10  ;;  %5306 = vmatprep.subr.bf16.mxu0 %v8067_v42  ;;  %v2439_v10 = vld [vmem:[#allocation13 + $0xd88] sm:$0xff]  ;;  %v8251_v62 = vcombine.high %v2287_v24, %v2291_v25 }
 0x2cb   :  { %5347 = vmatprep.subr.bf16.mxu1 %v8195_v43  ;;  %v2443_v42 = vld [vmem:[#allocation13 + $0xda8] sm:$0xff]  ;;  %v8410_v43 = vcombine.low %v2447_v63, %v2451_v36 }
 0x2cc   :  { %v8403_v1 = vcombine.high %v2439_v10, %v2443_v42  ;;  %v2279_v28 = vld [vmem:[#allocation13 + $0x888] sm:$0xff] }
 0x2cd   :  { %5307 = vmatpush2.bf16.msra.mxu0 %v8066_v4  ;;  %v2431_v4 = vld [vmem:[#allocation13 + $0xd48] sm:$0xff] }
 0x2ce   :  { %5348 = vmatpush2.bf16.msra.mxu1 %v8194_v57  ;;  %5308 = vmatprep.subr.bf16.mxu0 %v8059_v58  ;;  %v2435_v57 = vld [vmem:[#allocation13 + $0xd68] sm:$0xff]  ;;  %v8274_v58 = vcombine.low %v2311_v52, %v2315_v56 }
 0x2cf   :  { %5349 = vmatprep.subr.bf16.mxu1 %v8187_v59  ;;  %v8402_v59 = vcombine.low %v2439_v10, %v2443_v42  ;;  %v8395_v14 = vcombine.high %v2431_v4, %v2435_v57  ;;  %v2283_v29 = vld [vmem:[#allocation13 + $0x8a8] sm:$0xff] }
 0x2d0   :  { %v8243_v34 = vcombine.high %v2279_v28, %v2283_v29  ;;  %v2271_v63 = vld [vmem:[#allocation13 + $0x848] sm:$0xff] }
 0x2d1   :  { %5309 = vmatpush2.bf16.msra.mxu0 %v8058_v54  ;;  %v2423_v54 = vld [vmem:[#allocation13 + $0xd08] sm:$0xff] }
 0x2d2   :  { %5350 = vmatpush2.bf16.msra.mxu1 %v8186_v55  ;;  %5310 = vmatprep.subr.bf16.mxu0 %v8051_v19  ;;  %v2427_v55 = vld [vmem:[#allocation13 + $0xd28] sm:$0xff]  ;;  %v8266_v19 = vcombine.low %v2303_v46, %v2307_v47 }
 0x2d3   :  { %5351 = vmatprep.subr.bf16.mxu1 %v8179_v20  ;;  %v8394_v20 = vcombine.low %v2431_v4, %v2435_v57  ;;  %v8387_v23 = vcombine.high %v2423_v54, %v2427_v55  ;;  %v2275_v36 = vld [vmem:[#allocation13 + $0x868] sm:$0xff] }
 0x2d4   :  { %v8235_v52 = vcombine.high %v2271_v63, %v2275_v36  ;;  %v2267_v10 = vld [vmem:[#allocation13 + $0x828] sm:$0xff] }
 0x2d5   :  { %5311 = vmatpush2.bf16.msra.mxu0 %v8050_v26  ;;  %v2415_v26 = vld [vmem:[#allocation13 + $0xcc8] sm:$0xff] }
 0x2d6   :  { %5352 = vmatpush2.bf16.msra.mxu1 %v8178_v27  ;;  %5312 = vmatprep.subr.bf16.mxu0 %v8043_v60  ;;  %v2419_v27 = vld [vmem:[#allocation13 + $0xce8] sm:$0xff]  ;;  %v8258_v60 = vcombine.low %v2295_v16, %v2299_v17 }
 0x2d7   :  { %5353 = vmatprep.subr.bf16.mxu1 %v8171_v61  ;;  %v8386_v61 = vcombine.low %v2423_v54, %v2427_v55  ;;  %v8379_v3 = vcombine.high %v2415_v26, %v2419_v27  ;;  %v2391_v42 = vld [vmem:[#allocation13 + $0xc08] sm:$0xff] }
 0x2d8   :  { %v2383_v4 = vld [vmem:[#allocation13 + $0xbc8] sm:$0xff] }
 0x2d9   :  { %5313 = vmatpush2.bf16.msra.mxu0 %v8042_v2  ;;  %v2407_v2 = vld [vmem:[#allocation13 + $0xc88] sm:$0xff] }
 0x2da   :  { %5354 = vmatpush2.bf16.msra.mxu1 %v8170_v31  ;;  %5314 = vmatprep.subr.bf16.mxu0 %v8035_v32  ;;  %v2411_v31 = vld [vmem:[#allocation13 + $0xca8] sm:$0xff]  ;;  %v8250_v32 = vcombine.low %v2287_v24, %v2291_v25 }
 0x2db   :  { %5355 = vmatprep.subr.bf16.mxu1 %v8163_v33  ;;  %v8378_v33 = vcombine.low %v2415_v26, %v2419_v27  ;;  %v8371_v35 = vcombine.high %v2407_v2, %v2411_v31  ;;  %v2387_v57 = vld [vmem:[#allocation13 + $0xbe8] sm:$0xff] }
 0x2dc   :  { %v8347_v16 = vcombine.high %v2383_v4, %v2387_v57  ;;  %v2375_v54 = vld [vmem:[#allocation13 + $0xb88] sm:$0xff] }
 0x2dd   :  { %5315 = vmatpush2.bf16.msra.mxu0 %v8034_v51  ;;  %v2399_v51 = vld [vmem:[#allocation13 + $0xc48] sm:$0xff] }
 0x2de   :  { %5356 = vmatpush2.bf16.msra.mxu1 %v8162_v38  ;;  %5366 = vmatprep.subr.bf16.mxu0 %v8283_v37  ;;  %v2403_v38 = vld [vmem:[#allocation13 + $0xc68] sm:$0xff]  ;;  %v8242_v37 = vcombine.low %v2279_v28, %v2283_v29 }
 0x2df   :  { %5407 = vmatprep.subr.bf16.mxu1 %v8411_v0  ;;  %v8370_v0 = vcombine.low %v2407_v2, %v2411_v31  ;;  %v8363_v56 = vcombine.high %v2399_v51, %v2403_v38  ;;  %v8362_v46 = vcombine.low %v2399_v51, %v2403_v38  ;;  %v2379_v55 = vld [vmem:[#allocation13 + $0xba8] sm:$0xff] }
 0x2e0   :  { %5317 = vmatmul.mubr.bf16.vlgmr.msra.gmra.mxu0 %v9989_v44  ;;  %v8339_v24 = vcombine.high %v2375_v54, %v2379_v55  ;;  %v2367_v26 = vld [vmem:[#allocation13 + $0xb48] sm:$0xff] }
 0x2e1   :  { %5358 = vmatmul.mubr.bf16.vlgmr.msra.gmra.mxu1 %v9991_v48  ;;  %5367 = vmatpush1.bf16.msra.mxu0 %v8282_v39  ;;  %v2263_v39 = vld [vmem:[#allocation13 + $0x808] sm:$0xff] }
 0x2e2   :  { %5398 = vmatprep.mubr.bf16.mxu0 %v10003_v49  ;;  %5408 = vmatpush1.bf16.msra.mxu1 %v8410_v43  ;;  %v2395_v43 = vld [vmem:[#allocation13 + $0xc28] sm:$0xff]  ;;  %v8227_v47 = vcombine.high %v2263_v39, %v2267_v10 }
 0x2e3   :  { %5439 = vmatprep.mubr.bf16.mxu1 %v10005_v50  ;;  %5368 = vmatprep.subr.bf16.mxu0 %v8275_v45  ;;  %v8234_v45 = vcombine.low %v2271_v63, %v2275_v36  ;;  %v2371_v27 = vld [vmem:[#allocation13 + $0xb68] sm:$0xff] }
 0x2e4   :  { %5409 = vmatprep.subr.bf16.mxu1 %v8403_v1  ;;  %v8355_v1 = vcombine.high %v2391_v42, %v2395_v43  ;;  %v8331_v28 = vcombine.high %v2367_v26, %v2371_v27  ;;  %v2359_v2 = vld [vmem:[#allocation13 + $0xb08] sm:$0xff] }
 0x2e5   :  { %5369 = vmatpush1.bf16.msra.mxu0 %v8274_v58  ;;  %v2511_v58 = vld [vmem:[#allocation13 + $0xfc8] sm:$0xff] }
 0x2e6   :  { %5410 = vmatpush1.bf16.msra.mxu1 %v8402_v59  ;;  %5370 = vmatprep.subr.bf16.mxu0 %v8267_v5  ;;  %v2515_v59 = vld [vmem:[#allocation13 + $0xfe8] sm:$0xff]  ;;  %v8226_v5 = vcombine.low %v2263_v39, %v2267_v10 }
 0x2e7   :  { %5411 = vmatprep.subr.bf16.mxu1 %v8395_v14  ;;  %v8354_v14 = vcombine.low %v2391_v42, %v2395_v43  ;;  %v8475_v17 = vcombine.high %v2511_v58, %v2515_v59  ;;  %v2363_v31 = vld [vmem:[#allocation13 + $0xb28] sm:$0xff] }
 0x2e8   :  { %v8323_v63 = vcombine.high %v2359_v2, %v2363_v31  ;;  %v2351_v51 = vld [vmem:[#allocation13 + $0xac8] sm:$0xff] }
 0x2e9   :  { %5371 = vmatpush1.bf16.msra.mxu0 %v8266_v19  ;;  %v2503_v19 = vld [vmem:[#allocation13 + $0xf88] sm:$0xff] }
 0x2ea   :  { %5412 = vmatpush1.bf16.msra.mxu1 %v8394_v20  ;;  %5372 = vmatprep.subr.bf16.mxu0 %v8259_v21  ;;  %v2507_v20 = vld [vmem:[#allocation13 + $0xfa8] sm:$0xff]  ;;  %v8346_v21 = vcombine.low %v2383_v4, %v2387_v57 }
 0x2eb   :  { %5413 = vmatprep.subr.bf16.mxu1 %v8387_v23  ;;  %v8474_v23 = vcombine.low %v2511_v58, %v2515_v59  ;;  %v8467_v25 = vcombine.high %v2503_v19, %v2507_v20  ;;  %v2355_v38 = vld [vmem:[#allocation13 + $0xae8] sm:$0xff] }
 0x2ec   :  { %v8315_v39 = vcombine.high %v2351_v51, %v2355_v38  ;;  %v2343_v42 = vld [vmem:[#allocation13 + $0xa88] sm:$0xff] }
 0x2ed   :  { %5373 = vmatpush1.bf16.msra.mxu0 %v8258_v60  ;;  %v2495_v60 = vld [vmem:[#allocation13 + $0xf48] sm:$0xff] }
 0x2ee   :  { %5414 = vmatpush1.bf16.msra.mxu1 %v8386_v61  ;;  %5374 = vmatprep.subr.bf16.mxu0 %v8251_v62  ;;  %v2499_v61 = vld [vmem:[#allocation13 + $0xf68] sm:$0xff]  ;;  %v8338_v62 = vcombine.low %v2375_v54, %v2379_v55 }
 0x2ef   :  { %5415 = vmatprep.subr.bf16.mxu1 %v8379_v3  ;;  %v8466_v3 = vcombine.low %v2503_v19, %v2507_v20  ;;  %v8459_v29 = vcombine.high %v2495_v60, %v2499_v61  ;;  %v2347_v43 = vld [vmem:[#allocation13 + $0xaa8] sm:$0xff] }
 0x2f0   :  { %v8307_v4 = vcombine.high %v2343_v42, %v2347_v43  ;;  %v2335_v58 = vld [vmem:[#allocation13 + $0xa48] sm:$0xff] }
 0x2f1   :  { %5375 = vmatpush1.bf16.msra.mxu0 %v8250_v32  ;;  %v2487_v32 = vld [vmem:[#allocation13 + $0xf08] sm:$0xff] }
 0x2f2   :  { %5416 = vmatpush1.bf16.msra.mxu1 %v8378_v33  ;;  %5376 = vmatprep.subr.bf16.mxu0 %v8243_v34  ;;  %v2491_v33 = vld [vmem:[#allocation13 + $0xf28] sm:$0xff]  ;;  %v8330_v34 = vcombine.low %v2367_v26, %v2371_v27 }
 0x2f3   :  { %5417 = vmatprep.subr.bf16.mxu1 %v8371_v35  ;;  %v8458_v35 = vcombine.low %v2495_v60, %v2499_v61  ;;  %v8451_v36 = vcombine.high %v2487_v32, %v2491_v33  ;;  %v2339_v59 = vld [vmem:[#allocation13 + $0xa68] sm:$0xff]  ;;  %v2064_v60 = vld [vmem:[#allocation13 + $0x1d0] sm:$0xff] }
 0x2f4   :  { %v8299_v54 = vcombine.high %v2335_v58, %v2339_v59  ;;  %v2327_v19 = vld [vmem:[#allocation13 + $0xa08] sm:$0xff]  ;;  %v2068_v61 = vld [vmem:[#allocation13 + $0x1f0] sm:$0xff] }
 0x2f5   :  { %5377 = vmatpush1.bf16.msra.mxu0 %v8242_v37  ;;  %v2479_v37 = vld [vmem:[#allocation13 + $0xec8] sm:$0xff] }
 0x2f6   :  { %5418 = vmatpush1.bf16.msra.mxu1 %v8370_v0  ;;  %5378 = vmatprep.subr.bf16.mxu0 %v8235_v52  ;;  %v2483_v0 = vld [vmem:[#allocation13 + $0xee8] sm:$0xff]  ;;  %v8322_v52 = vcombine.low %v2359_v2, %v2363_v31  ;;  %v8029_v2 = vcombine.high %v2064_v60, %v2068_v61  ;;  %v10035_v31 = vld [vmem:[#allocation14] sm:$0xff] }
 0x2f7   :  { %5419 = vmatprep.subr.bf16.mxu1 %v8363_v56  ;;  %v8450_v56 = vcombine.low %v2487_v32, %v2491_v33  ;;  %v8443_v10 = vcombine.high %v2479_v37, %v2483_v0  ;;  %v2331_v20 = vld [vmem:[#allocation13 + $0xa28] sm:$0xff]  ;;  %v2056_v33 = vld [vmem:[#allocation13 + $0x190] sm:$0xff] }
 0x2f8   :  { %v8291_v26 = vcombine.high %v2327_v19, %v2331_v20 }
 0x2f9   :  { %5379 = vmatpush1.bf16.msra.mxu0 %v8234_v45  ;;  %v2471_v45 = vld [vmem:[#allocation13 + $0xe88] sm:$0xff] }
 0x2fa   :  { %5420 = vmatpush1.bf16.msra.mxu1 %v8362_v46  ;;  %5380 = vmatprep.subr.bf16.mxu0 %v8227_v47  ;;  %v2475_v46 = vld [vmem:[#allocation13 + $0xea8] sm:$0xff]  ;;  %v8314_v47 = vcombine.low %v2351_v51, %v2355_v38  ;;  %v2188_v51 = vld [vmem:[#allocation13 + $0x5b0] sm:$0xff] }
 0x2fb   :  { %5421 = vmatprep.subr.bf16.mxu1 %v8355_v1  ;;  %v8442_v1 = vcombine.low %v2479_v37, %v2483_v0  ;;  %v8435_v57 = vcombine.high %v2471_v45, %v2475_v46  ;;  %v2527_v37 = vrot.slane %v10035_v31, %v9956_v11 }
 0x2fd   :  { %5381 = vmatpush1.bf16.msra.mxu0 %v8226_v5  ;;  %v2463_v5 = vld [vmem:[#allocation13 + $0xe48] sm:$0xff] }
 0x2fe   :  { %5422 = vmatpush1.bf16.msra.mxu1 %v8354_v14  ;;  %5382 = vmatprep.subr.bf16.mxu0 %v8347_v16  ;;  %v2467_v14 = vld [vmem:[#allocation13 + $0xe68] sm:$0xff]  ;;  %v8306_v16 = vcombine.low %v2343_v42, %v2347_v43  ;;  %v2176_v42 = vld [vmem:[#allocation13 + $0x550] sm:$0xff] }
 0x2ff   :  { %5423 = vmatprep.subr.bf16.mxu1 %v8475_v17  ;;  %v8434_v17 = vcombine.low %v2471_v45, %v2475_v46  ;;  %v8427_v55 = vcombine.high %v2463_v5, %v2467_v14  ;;  %v2180_v43 = vld [vmem:[#allocation13 + $0x570] sm:$0xff] }
 0x301   :  { %5383 = vmatpush2.bf16.msra.mxu0 %v8346_v21  ;;  %v2455_v21 = vld [vmem:[#allocation13 + $0xe08] sm:$0xff] }
 0x302   :  { %5424 = vmatpush2.bf16.msra.mxu1 %v8474_v23  ;;  %5384 = vmatprep.subr.bf16.mxu0 %v8339_v24  ;;  %v2459_v23 = vld [vmem:[#allocation13 + $0xe28] sm:$0xff]  ;;  %v8298_v24 = vcombine.low %v2335_v58, %v2339_v59 }
 0x303   :  { %5425 = vmatprep.subr.bf16.mxu1 %v8467_v25  ;;  %v8426_v25 = vcombine.low %v2463_v5, %v2467_v14  ;;  %v8419_v27 = vcombine.high %v2455_v21, %v2459_v23  ;;  %v8141_v14 = vcombine.high %v2176_v42, %v2180_v43 }
 0x305   :  { %5385 = vmatpush2.bf16.msra.mxu0 %v8338_v62  ;;  %v2192_v62 = vld [vmem:[#allocation13 + $0x5d0] sm:$0xff] }
 0x306   :  { %5426 = vmatpush2.bf16.msra.mxu1 %v8466_v3  ;;  %5386 = vmatprep.subr.bf16.mxu0 %v8331_v28  ;;  %v2196_v3 = vld [vmem:[#allocation13 + $0x5f0] sm:$0xff]  ;;  %v8290_v28 = vcombine.low %v2327_v19, %v2331_v20 }
 0x307   :  { %5427 = vmatprep.subr.bf16.mxu1 %v8459_v29  ;;  %v8418_v29 = vcombine.low %v2455_v21, %v2459_v23  ;;  %v8157_v32 = vcombine.high %v2192_v62, %v2196_v3  ;;  %v8156_v38 = vcombine.low %v2192_v62, %v2196_v3  ;;  %v2172_v19 = vld [vmem:[#allocation13 + $0x530] sm:$0xff] }
 0x308   :  { %v2036_v62 = vld [vmem:[#allocation13 + $0xf0] sm:$0xff] }
 0x309   :  { %5387 = vmatpush2.bf16.msra.mxu0 %v8330_v34  ;;  %v2060_v34 = vld [vmem:[#allocation13 + $0x1b0] sm:$0xff] }
 0x30a   :  { %5428 = vmatpush2.bf16.msra.mxu1 %v8458_v35  ;;  %5388 = vmatprep.subr.bf16.mxu0 %v8323_v63  ;;  %v8028_v35 = vcombine.low %v2064_v60, %v2068_v61  ;;  %v2523_v63 = vrot.slane %v10035_v31, %v9948_v8  ;;  %v8021_v0 = vcombine.high %v2056_v33, %v2060_v34  ;;  %v2032_v61 = vld [vmem:[#allocation13 + $0xd0] sm:$0xff] }
 0x30b   :  { %5429 = vmatprep.subr.bf16.mxu1 %v8451_v36  ;;  %v2184_v36 = vld [vmem:[#allocation13 + $0x590] sm:$0xff] }
 0x30c   :  { %v2160_v3 = vld [vmem:[#allocation13 + $0x4d0] sm:$0xff] }
 0x30d   :  { %5389 = vmatpush2.bf16.msra.mxu0 %v8322_v52  ;;  %v2048_v52 = vld [vmem:[#allocation13 + $0x150] sm:$0xff] }
 0x30e   :  { %5430 = vmatpush2.bf16.msra.mxu1 %v8450_v56  ;;  %5390 = vmatprep.subr.bf16.mxu0 %v8315_v39  ;;  %v2052_v56 = vld [vmem:[#allocation13 + $0x170] sm:$0xff] }
 0x30f   :  { %5431 = vmatprep.subr.bf16.mxu1 %v8443_v10  ;;  %v8149_v10 = vcombine.high %v2184_v36, %v2188_v51  ;;  %v8012_v23 = vcombine.low %v2048_v52, %v2052_v56 }
 0x311   :  { %5391 = vmatpush2.bf16.msra.mxu0 %v8314_v47  ;;  %v8020_v47 = vcombine.low %v2056_v33, %v2060_v34  ;;  %v2024_v34 = vld [vmem:[#allocation13 + $0x90] sm:$0xff] }
 0x312   :  { %5432 = vmatpush2.bf16.msra.mxu1 %v8442_v1  ;;  %5392 = vmatprep.subr.bf16.mxu0 %v8307_v4  ;;  %v8148_v4 = vcombine.low %v2184_v36, %v2188_v51  ;;  %v2156_v36 = vld [vmem:[#allocation13 + $0x4b0] sm:$0xff]  ;;  %v7996_v51 = vcombine.low %v2032_v61, %v2036_v62 }
 0x313   :  { %5433 = vmatprep.subr.bf16.mxu1 %v8435_v57  ;;  %v8013_v57 = vcombine.high %v2048_v52, %v2052_v56  ;;  %v2016_v52 = vld [vmem:[#allocation13 + $0x50] sm:$0xff] }
 0x314   :  { %v2020_v56 = vld [vmem:[#allocation13 + $0x70] sm:$0xff] }
 0x315   :  { %5393 = vmatpush2.bf16.msra.mxu0 %v8306_v16  ;;  %v2040_v16 = vld [vmem:[#allocation13 + $0x110] sm:$0xff] }
 0x316   :  { %5434 = vmatpush2.bf16.msra.mxu1 %v8434_v17  ;;  %5394 = vmatprep.subr.bf16.mxu0 %v8299_v54  ;;  %v2044_v17 = vld [vmem:[#allocation13 + $0x130] sm:$0xff] }
 0x317   :  { %5435 = vmatprep.subr.bf16.mxu1 %v8427_v55  ;;  %v2168_v55 = vld [vmem:[#allocation13 + $0x510] sm:$0xff] }
 0x318   :  { %v8133_v60 = vcombine.high %v2168_v55, %v2172_v19 }
 0x319   :  { %5395 = vmatpush2.bf16.msra.mxu0 %v8298_v24 }
 0x31a   :  { %5436 = vmatpush2.bf16.msra.mxu1 %v8426_v25  ;;  %5396 = vmatprep.subr.bf16.mxu0 %v8291_v26  ;;  %v8140_v25 = vcombine.low %v2176_v42, %v2180_v43  ;;  %v8005_v26 = vcombine.high %v2040_v16, %v2044_v17 }
 0x31b   :  { %5437 = vmatprep.subr.bf16.mxu1 %v8419_v27 }
 0x31d   :  { %5397 = vmatpush2.bf16.msra.mxu0 %v8290_v28  ;;  %v2164_v28 = vld [vmem:[#allocation13 + $0x4f0] sm:$0xff] }
 0x31e   :  { %5438 = vmatpush2.bf16.msra.mxu1 %v8418_v29  ;;  %5448 = vmatprep.subr.bf16.mxu0 %v8029_v2  ;;  %v8004_v29 = vcombine.low %v2040_v16, %v2044_v17  ;;  %v8132_v2 = vcombine.low %v2168_v55, %v2172_v19  ;;  %v8125_v33 = vcombine.high %v2160_v3, %v2164_v28  ;;  %v2128_v17 = vld [vmem:[#allocation13 + $0x3d0] sm:$0xff] }
 0x31f   :  { %5489 = vmatprep.subr.bf16.mxu1 %v8157_v32  ;;  %v7997_v32 = vcombine.high %v2032_v61, %v2036_v62  ;;  %v2256_v55 = vld [vmem:[#allocation13 + $0x7d0] sm:$0xff] }
 0x320   :  { %5399 = vmatmul.mubr.bf16.vlgmr.msra.gmra.mxu0 %v10023_v13  ;;  %v5154_v39 = vpop.f32.mrf.mxu0  ;;  %v5195_v46 = vpop.f32.mrf.mxu1  ;;  %v2260_v19 = vld [vmem:[#allocation13 + $0x7f0] sm:$0xff] }
 0x321   :  { %5440 = vmatmul.mubr.bf16.vlgmr.msra.gmra.mxu1 %v10025_v15  ;;  %v5155_v45 = vadd.f32 %v5154_v39, %v2523_v63  ;;  %5449 = vmatpush1.bf16.msra.mxu0 %v8028_v35  ;;  %v2028_v35 = vld [vmem:[#allocation13 + $0xb0] sm:$0xff] }
 0x322   :  { %5480 = vmatprep.mubr.bf16.mxu0 %v9979_v40  ;;  %5490 = vmatpush1.bf16.msra.mxu1 %v8156_v38  ;;  %v5156_v1 = vpop.f32.mrf.mxu0  ;;  %v5197_v5 = vpop.f32.mrf.mxu1  ;;  %v2152_v63 = vld [vmem:[#allocation13 + $0x490] sm:$0xff]  ;;  %v8124_v38 = vcombine.low %v2160_v3, %v2164_v28  ;;  %v7988_v42 = vcombine.low %v2024_v34, %v2028_v35  ;;  %v8220_v3 = vcombine.low %v2256_v55, %v2260_v19 }
 0x323   :  { %v10044_v58 = vadd.f32 %v5195_v46, %v5155_v45  ;;  %5521 = vmatprep.mubr.bf16.mxu1 %v9981_v41  ;;  %v5157_v59 = vadd.f32 %v5156_v1, %v2527_v37  ;;  %5450 = vmatprep.subr.bf16.mxu0 %v8021_v0  ;;  %v7989_v37 = vcombine.high %v2024_v34, %v2028_v35  ;;  %v2144_v39 = vld [vmem:[#allocation13 + $0x450] sm:$0xff] }
 0x324   :  { %5491 = vmatprep.subr.bf16.mxu1 %v8149_v10  ;;  %v5158_v54 = vpop.f32.mrf.mxu0  ;;  %v5199_v21 = vpop.f32.mrf.mxu1  ;;  %v8117_v0 = vcombine.high %v2152_v63, %v2156_v36  ;;  %v2148_v10 = vld [vmem:[#allocation13 + $0x470] sm:$0xff]  ;;  %v8116_v43 = vcombine.low %v2152_v63, %v2156_v36  ;;  %v7981_v45 = vcombine.high %v2016_v52, %v2020_v56 }
 0x325   :  { %v10047_v20 = vadd.f32 %v5197_v5, %v5157_v59  ;;  %5451 = vmatpush1.bf16.msra.mxu0 %v8020_v47  ;;  %v8109_v46 = vcombine.high %v2144_v39, %v2148_v10  ;;  %v2008_v47 = vld [vmem:[#allocation13 + $0x10] sm:$0xff]  ;;  %v7980_v59 = vcombine.low %v2016_v52, %v2020_v56  ;;  %v8108_v5 = vcombine.low %v2144_v39, %v2148_v10 }
 0x326   :  { %5492 = vmatpush1.bf16.msra.mxu1 %v8148_v4  ;;  %v5159_v24 = vpop.f32.mrf.mxu0  ;;  %5452 = vmatprep.subr.bf16.mxu0 %v8013_v57  ;;  %v5200_v27 = vpop.f32.mrf.mxu1  ;;  %v2012_v1 = vld [vmem:[#allocation13 + $0x30] sm:$0xff] }
 0x327   :  { %5493 = vmatprep.subr.bf16.mxu1 %v8141_v14  ;;  %v2136_v4 = vld [vmem:[#allocation13 + $0x410] sm:$0xff]  ;;  %v7973_v14 = vcombine.high %v2008_v47, %v2012_v1  ;;  %v7972_v21 = vcombine.low %v2008_v47, %v2012_v1 }
 0x328   :  { %v2140_v57 = vld [vmem:[#allocation13 + $0x430] sm:$0xff] }
 0x329   :  { %5453 = vmatpush1.bf16.msra.mxu0 %v8012_v23  ;;  %v8101_v16 = vcombine.high %v2136_v4, %v2140_v57  ;;  %v2132_v54 = vld [vmem:[#allocation13 + $0x3f0] sm:$0xff]  ;;  %v8100_v23 = vcombine.low %v2136_v4, %v2140_v57 }
 0x32a   :  { %5494 = vmatpush1.bf16.msra.mxu1 %v8140_v25  ;;  %5454 = vmatprep.subr.bf16.mxu0 %v8005_v26  ;;  %v8093_v24 = vcombine.high %v2128_v17, %v2132_v54  ;;  %v8221_v25 = vcombine.high %v2256_v55, %v2260_v19  ;;  %v2120_v26 = vld [vmem:[#allocation13 + $0x390] sm:$0xff]  ;;  %v8092_v62 = vcombine.low %v2128_v17, %v2132_v54 }
 0x32b   :  { %5495 = vmatprep.subr.bf16.mxu1 %v8133_v60  ;;  %v2124_v27 = vld [vmem:[#allocation13 + $0x3b0] sm:$0xff] }
 0x32c   :  { %v2248_v60 = vld [vmem:[#allocation13 + $0x790] sm:$0xff]  ;;  %v8085_v28 = vcombine.high %v2120_v26, %v2124_v27  ;;  %v8084_v35 = vcombine.low %v2120_v26, %v2124_v27 }
 0x32d   :  { %5455 = vmatpush1.bf16.msra.mxu0 %v8004_v29  ;;  %v2252_v61 = vld [vmem:[#allocation13 + $0x7b0] sm:$0xff] }
 0x32e   :  { %5496 = vmatpush1.bf16.msra.mxu1 %v8132_v2  ;;  %5456 = vmatprep.subr.bf16.mxu0 %v7997_v32  ;;  %v8213_v29 = vcombine.high %v2248_v60, %v2252_v61  ;;  %v2112_v2 = vld [vmem:[#allocation13 + $0x350] sm:$0xff]  ;;  %v8212_v63 = vcombine.low %v2248_v60, %v2252_v61 }
 0x32f   :  { %5497 = vmatprep.subr.bf16.mxu1 %v8125_v33  ;;  %v2116_v32 = vld [vmem:[#allocation13 + $0x370] sm:$0xff] }
 0x330   :  { %v2240_v33 = vld [vmem:[#allocation13 + $0x750] sm:$0xff]  ;;  %v8077_v36 = vcombine.high %v2112_v2, %v2116_v32  ;;  %v8076_v56 = vcombine.low %v2112_v2, %v2116_v32 }
 0x331   :  { %5457 = vmatpush1.bf16.msra.mxu0 %v7996_v51  ;;  %v2244_v34 = vld [vmem:[#allocation13 + $0x770] sm:$0xff] }
 0x332   :  { %5498 = vmatpush1.bf16.msra.mxu1 %v8124_v38  ;;  %5458 = vmatprep.subr.bf16.mxu0 %v7989_v37  ;;  %v8205_v51 = vcombine.high %v2240_v33, %v2244_v34  ;;  %v2104_v38 = vld [vmem:[#allocation13 + $0x310] sm:$0xff]  ;;  %v8204_v39 = vcombine.low %v2240_v33, %v2244_v34 }
 0x333   :  { %5499 = vmatprep.subr.bf16.mxu1 %v8117_v0  ;;  %v2108_v37 = vld [vmem:[#allocation13 + $0x330] sm:$0xff] }
 0x334   :  { %v2232_v0 = vld [vmem:[#allocation13 + $0x710] sm:$0xff]  ;;  %v8069_v10 = vcombine.high %v2104_v38, %v2108_v37  ;;  %v8068_v1 = vcombine.low %v2104_v38, %v2108_v37 }
 0x335   :  { %5459 = vmatpush1.bf16.msra.mxu0 %v7988_v42  ;;  %v2236_v52 = vld [vmem:[#allocation13 + $0x730] sm:$0xff] }
 0x336   :  { %5500 = vmatpush1.bf16.msra.mxu1 %v8116_v43  ;;  %5460 = vmatprep.subr.bf16.mxu0 %v7981_v45  ;;  %v8197_v42 = vcombine.high %v2232_v0, %v2236_v52  ;;  %v2096_v43 = vld [vmem:[#allocation13 + $0x2d0] sm:$0xff]  ;;  %v8196_v4 = vcombine.low %v2232_v0, %v2236_v52 }
 0x337   :  { %5501 = vmatprep.subr.bf16.mxu1 %v8109_v46  ;;  %v2100_v45 = vld [vmem:[#allocation13 + $0x2f0] sm:$0xff] }
 0x338   :  { %v2224_v46 = vld [vmem:[#allocation13 + $0x6d0] sm:$0xff]  ;;  %v8061_v57 = vcombine.high %v2096_v43, %v2100_v45  ;;  %v8060_v54 = vcombine.low %v2096_v43, %v2100_v45 }
 0x339   :  { %5461 = vmatpush1.bf16.msra.mxu0 %v7980_v59  ;;  %v2228_v47 = vld [vmem:[#allocation13 + $0x6f0] sm:$0xff] }
 0x33a   :  { %5502 = vmatpush1.bf16.msra.mxu1 %v8108_v5  ;;  %5462 = vmatprep.subr.bf16.mxu0 %v7973_v14  ;;  %v8189_v59 = vcombine.high %v2224_v46, %v2228_v47  ;;  %v2088_v5 = vld [vmem:[#allocation13 + $0x290] sm:$0xff]  ;;  %v8188_v55 = vcombine.low %v2224_v46, %v2228_v47 }
 0x33b   :  { %5503 = vmatprep.subr.bf16.mxu1 %v8101_v16  ;;  %v2092_v14 = vld [vmem:[#allocation13 + $0x2b0] sm:$0xff] }
 0x33c   :  { %v2216_v16 = vld [vmem:[#allocation13 + $0x690] sm:$0xff]  ;;  %v8053_v19 = vcombine.high %v2088_v5, %v2092_v14  ;;  %v8052_v27 = vcombine.low %v2088_v5, %v2092_v14 }
 0x33d   :  { %5463 = vmatpush1.bf16.msra.mxu0 %v7972_v21  ;;  %v2220_v17 = vld [vmem:[#allocation13 + $0x6b0] sm:$0xff] }
 0x33e   :  { %5504 = vmatpush1.bf16.msra.mxu1 %v8100_v23  ;;  %5464 = vmatprep.subr.bf16.mxu0 %v8093_v24  ;;  %v8181_v21 = vcombine.high %v2216_v16, %v2220_v17  ;;  %v2080_v23 = vld [vmem:[#allocation13 + $0x250] sm:$0xff]  ;;  %v8180_v60 = vcombine.low %v2216_v16, %v2220_v17 }
 0x33f   :  { %5505 = vmatprep.subr.bf16.mxu1 %v8221_v25  ;;  %v2084_v24 = vld [vmem:[#allocation13 + $0x270] sm:$0xff] }
 0x340   :  { %v2208_v25 = vld [vmem:[#allocation13 + $0x650] sm:$0xff]  ;;  %v8045_v61 = vcombine.high %v2080_v23, %v2084_v24  ;;  %v8044_v32 = vcombine.low %v2080_v23, %v2084_v24 }
 0x341   :  { %5465 = vmatpush2.bf16.msra.mxu0 %v8092_v62  ;;  %v2212_v26 = vld [vmem:[#allocation13 + $0x670] sm:$0xff] }
 0x342   :  { %5506 = vmatpush2.bf16.msra.mxu1 %v8220_v3  ;;  %5466 = vmatprep.subr.bf16.mxu0 %v8085_v28  ;;  %v8173_v62 = vcombine.high %v2208_v25, %v2212_v26  ;;  %v2072_v3 = vld [vmem:[#allocation13 + $0x210] sm:$0xff]  ;;  %v8172_v33 = vcombine.low %v2208_v25, %v2212_v26 }
 0x343   :  { %5507 = vmatprep.subr.bf16.mxu1 %v8213_v29  ;;  %v2076_v28 = vld [vmem:[#allocation13 + $0x230] sm:$0xff] }
 0x344   :  { %v2200_v29 = vld [vmem:[#allocation13 + $0x610] sm:$0xff]  ;;  %v8037_v34 = vcombine.high %v2072_v3, %v2076_v28  ;;  %v8036_v37 = vcombine.low %v2072_v3, %v2076_v28 }
 0x345   :  { %5467 = vmatpush2.bf16.msra.mxu0 %v8084_v35  ;;  %v2204_v2 = vld [vmem:[#allocation13 + $0x630] sm:$0xff] }
 0x346   :  { %5508 = vmatpush2.bf16.msra.mxu1 %v8212_v63  ;;  %5468 = vmatprep.subr.bf16.mxu0 %v8077_v36  ;;  %v8165_v35 = vcombine.high %v2200_v29, %v2204_v2  ;;  %v2320_v63 = vld [vmem:[#allocation13 + $0x9d0] sm:$0xff]  ;;  %v8164_v0 = vcombine.low %v2200_v29, %v2204_v2 }
 0x347   :  { %5509 = vmatprep.subr.bf16.mxu1 %v8205_v51  ;;  %v2324_v36 = vld [vmem:[#allocation13 + $0x9f0] sm:$0xff] }
 0x348   :  { %v2448_v51 = vld [vmem:[#allocation13 + $0xdd0] sm:$0xff]  ;;  %v8285_v52 = vcombine.high %v2320_v63, %v2324_v36 }
 0x349   :  { %5469 = vmatpush2.bf16.msra.mxu0 %v8076_v56  ;;  %v2452_v38 = vld [vmem:[#allocation13 + $0xdf0] sm:$0xff] }
 0x34a   :  { %5510 = vmatpush2.bf16.msra.mxu1 %v8204_v39  ;;  %5470 = vmatprep.subr.bf16.mxu0 %v8069_v10  ;;  %v8413_v56 = vcombine.high %v2448_v51, %v2452_v38  ;;  %v2312_v39 = vld [vmem:[#allocation13 + $0x990] sm:$0xff]  ;;  %v8412_v46 = vcombine.low %v2448_v51, %v2452_v38 }
 0x34b   :  { %5511 = vmatprep.subr.bf16.mxu1 %v8197_v42  ;;  %v2316_v10 = vld [vmem:[#allocation13 + $0x9b0] sm:$0xff]  ;;  %v8284_v42 = vcombine.low %v2320_v63, %v2324_v36 }
 0x34c   :  { %v2440_v43 = vld [vmem:[#allocation13 + $0xd90] sm:$0xff]  ;;  %v8277_v47 = vcombine.high %v2312_v39, %v2316_v10 }
 0x34d   :  { %5471 = vmatpush2.bf16.msra.mxu0 %v8068_v1  ;;  %v2444_v45 = vld [vmem:[#allocation13 + $0xdb0] sm:$0xff] }
 0x34e   :  { %5512 = vmatpush2.bf16.msra.mxu1 %v8196_v4  ;;  %5472 = vmatprep.subr.bf16.mxu0 %v8061_v57  ;;  %v2304_v1 = vld [vmem:[#allocation13 + $0x950] sm:$0xff] }
 0x34f   :  { %5513 = vmatprep.subr.bf16.mxu1 %v8189_v59  ;;  %v2308_v4 = vld [vmem:[#allocation13 + $0x970] sm:$0xff]  ;;  %v8405_v59 = vcombine.high %v2440_v43, %v2444_v45 }
 0x350   :  { %v2432_v5 = vld [vmem:[#allocation13 + $0xd50] sm:$0xff]  ;;  %v8268_v29 = vcombine.low %v2304_v1, %v2308_v4 }
 0x351   :  { %5473 = vmatpush2.bf16.msra.mxu0 %v8060_v54  ;;  %v2436_v14 = vld [vmem:[#allocation13 + $0xd70] sm:$0xff]  ;;  %v8276_v54 = vcombine.low %v2312_v39, %v2316_v10 }
 0x352   :  { %5514 = vmatpush2.bf16.msra.mxu1 %v8188_v55  ;;  %5474 = vmatprep.subr.bf16.mxu0 %v8053_v19  ;;  %v8404_v19 = vcombine.low %v2440_v43, %v2444_v45  ;;  %v2296_v26 = vld [vmem:[#allocation13 + $0x910] sm:$0xff] }
 0x353   :  { %5515 = vmatprep.subr.bf16.mxu1 %v8181_v21  ;;  %v8269_v21 = vcombine.high %v2304_v1, %v2308_v4  ;;  %v2292_v63 = vld [vmem:[#allocation13 + $0x8f0] sm:$0xff] }
 0x354   :  { %v2416_v36 = vld [vmem:[#allocation13 + $0xcd0] sm:$0xff] }
 0x355   :  { %5475 = vmatpush2.bf16.msra.mxu0 %v8052_v27  ;;  %v2300_v27 = vld [vmem:[#allocation13 + $0x930] sm:$0xff] }
 0x356   :  { %5516 = vmatpush2.bf16.msra.mxu1 %v8180_v60  ;;  %5476 = vmatprep.subr.bf16.mxu0 %v8045_v61  ;;  %v2424_v61 = vld [vmem:[#allocation13 + $0xd10] sm:$0xff]  ;;  %v8260_v38 = vcombine.low %v2296_v26, %v2300_v27 }
 0x357   :  { %5517 = vmatprep.subr.bf16.mxu1 %v8173_v62  ;;  %v2428_v62 = vld [vmem:[#allocation13 + $0xd30] sm:$0xff] }
 0x358   :  { %v2420_v51 = vld [vmem:[#allocation13 + $0xcf0] sm:$0xff] }
 0x359   :  { %5477 = vmatpush2.bf16.msra.mxu0 %v8044_v32  ;;  %v8396_v32 = vcombine.low %v2432_v5, %v2436_v14  ;;  %v2284_v39 = vld [vmem:[#allocation13 + $0x8b0] sm:$0xff]  ;;  %v8380_v45 = vcombine.low %v2416_v36, %v2420_v51 }
 0x35a   :  { %5518 = vmatpush2.bf16.msra.mxu1 %v8172_v33  ;;  %5478 = vmatprep.subr.bf16.mxu0 %v8037_v34  ;;  %v8261_v33 = vcombine.high %v2296_v26, %v2300_v27  ;;  %v8389_v34 = vcombine.high %v2424_v61, %v2428_v62  ;;  %v2408_v10 = vld [vmem:[#allocation13 + $0xc90] sm:$0xff] }
 0x35b   :  { %5519 = vmatprep.subr.bf16.mxu1 %v8165_v35  ;;  %v2288_v35 = vld [vmem:[#allocation13 + $0x8d0] sm:$0xff] }
 0x35c   :  { %v8252_v43 = vcombine.low %v2288_v35, %v2292_v63  ;;  %v2272_v1 = vld [vmem:[#allocation13 + $0x850] sm:$0xff] }
 0x35d   :  { %5479 = vmatpush2.bf16.msra.mxu0 %v8036_v37  ;;  %v8388_v37 = vcombine.low %v2424_v61, %v2428_v62  ;;  %v2276_v4 = vld [vmem:[#allocation13 + $0x870] sm:$0xff] }
 0x35e   :  { %5520 = vmatpush2.bf16.msra.mxu1 %v8164_v0  ;;  %5530 = vmatprep.subr.bf16.mxu0 %v8285_v52  ;;  %v8253_v0 = vcombine.high %v2288_v35, %v2292_v63  ;;  %v8381_v52 = vcombine.high %v2416_v36, %v2420_v51  ;;  %v2384_v27 = vld [vmem:[#allocation13 + $0xbd0] sm:$0xff] }
 0x35f   :  { %5571 = vmatprep.subr.bf16.mxu1 %v8413_v56  ;;  %v2280_v56 = vld [vmem:[#allocation13 + $0x890] sm:$0xff] }
 0x360   :  { %v5236_v57 = vpop.f32.mrf.mxu0  ;;  %5481 = vmatmul.mubr.bf16.vlgmr.msra.gmra.mxu0 %v9989_v44  ;;  %v5277_v17 = vpop.f32.mrf.mxu1  ;;  %v2512_v61 = vld [vmem:[#allocation13 + $0xfd0] sm:$0xff] }
 0x361   :  { %v5237_v16 = vadd.f32 %v5236_v57, %v10044_v58  ;;  %5522 = vmatmul.mubr.bf16.vlgmr.msra.gmra.mxu1 %v9991_v48  ;;  %5531 = vmatpush1.bf16.msra.mxu0 %v8284_v42  ;;  %v8397_v58 = vcombine.high %v2432_v5, %v2436_v14  ;;  %v2412_v42 = vld [vmem:[#allocation13 + $0xcb0] sm:$0xff]  ;;  %v8244_v5 = vcombine.low %v2280_v56, %v2284_v39 }
 0x362   :  { %5562 = vmatprep.mubr.bf16.mxu0 %v10003_v49  ;;  %5572 = vmatpush1.bf16.msra.mxu1 %v8412_v46  ;;  %v5238_v55 = vpop.f32.mrf.mxu0  ;;  %v5279_v25 = vpop.f32.mrf.mxu1  ;;  %v8245_v46 = vcombine.high %v2280_v56, %v2284_v39  ;;  %v2400_v57 = vld [vmem:[#allocation13 + $0xc50] sm:$0xff]  ;;  %v8372_v14 = vcombine.low %v2408_v10, %v2412_v42 }
 0x363   :  { %v10053_v23 = vadd.f32 %v5277_v17, %v5237_v16  ;;  %5603 = vmatprep.mubr.bf16.mxu1 %v10005_v50  ;;  %v5239_v24 = vadd.f32 %v5238_v55, %v10047_v20  ;;  %5532 = vmatprep.subr.bf16.mxu0 %v8277_v47  ;;  %v8373_v47 = vcombine.high %v2408_v10, %v2412_v42  ;;  %v2268_v55 = vld [vmem:[#allocation13 + $0x830] sm:$0xff] }
 0x364   :  { %v5240_v60 = vpop.f32.mrf.mxu0  ;;  %5573 = vmatprep.subr.bf16.mxu1 %v8405_v59  ;;  %v5281_v28 = vpop.f32.mrf.mxu1  ;;  %v2404_v59 = vld [vmem:[#allocation13 + $0xc70] sm:$0xff]  ;;  %v8237_v16 = vcombine.high %v2272_v1, %v2276_v4 }
 0x365   :  { %v10057_v3 = vadd.f32 %v5279_v25, %v5239_v24  ;;  %5533 = vmatpush1.bf16.msra.mxu0 %v8276_v54  ;;  %v8365_v17 = vcombine.high %v2400_v57, %v2404_v59  ;;  %v2264_v54 = vld [vmem:[#allocation13 + $0x810] sm:$0xff]  ;;  %v8236_v24 = vcombine.low %v2272_v1, %v2276_v4  ;;  %v8364_v25 = vcombine.low %v2400_v57, %v2404_v59 }
 0x366   :  { %5574 = vmatpush1.bf16.msra.mxu1 %v8404_v19  ;;  %v5241_v2 = vpop.f32.mrf.mxu0  ;;  %5534 = vmatprep.subr.bf16.mxu0 %v8269_v21  ;;  %v5282_v20 = vpop.f32.mrf.mxu1  ;;  %v2392_v19 = vld [vmem:[#allocation13 + $0xc10] sm:$0xff]  ;;  %v8228_v28 = vcombine.low %v2264_v54, %v2268_v55 }
 0x367   :  { %5575 = vmatprep.subr.bf16.mxu1 %v8397_v58  ;;  %v2396_v21 = vld [vmem:[#allocation13 + $0xc30] sm:$0xff]  ;;  %v8229_v58 = vcombine.high %v2264_v54, %v2268_v55 }
 0x368   :  { %v8357_v26 = vcombine.high %v2392_v19, %v2396_v21  ;;  %v2388_v60 = vld [vmem:[#allocation13 + $0xbf0] sm:$0xff] }
 0x369   :  { %5535 = vmatpush1.bf16.msra.mxu0 %v8268_v29  ;;  %v2516_v62 = vld [vmem:[#allocation13 + $0xff0] sm:$0xff]  ;;  %v8356_v29 = vcombine.low %v2392_v19, %v2396_v21  ;;  %v8349_v2 = vcombine.high %v2384_v27, %v2388_v60  ;;  %v8348_v63 = vcombine.low %v2384_v27, %v2388_v60 }
 0x36a   :  { %5576 = vmatpush1.bf16.msra.mxu1 %v8396_v32  ;;  %5536 = vmatprep.subr.bf16.mxu0 %v8261_v33  ;;  %v8477_v32 = vcombine.high %v2512_v61, %v2516_v62  ;;  %v2376_v33 = vld [vmem:[#allocation13 + $0xb90] sm:$0xff]  ;;  %v8476_v36 = vcombine.low %v2512_v61, %v2516_v62 }
 0x36b   :  { %5577 = vmatprep.subr.bf16.mxu1 %v8389_v34  ;;  %v2380_v20 = vld [vmem:[#allocation13 + $0xbb0] sm:$0xff] }
 0x36c   :  { %v2504_v34 = vld [vmem:[#allocation13 + $0xf90] sm:$0xff]  ;;  %v8341_v51 = vcombine.high %v2376_v33, %v2380_v20  ;;  %v8340_v39 = vcombine.low %v2376_v33, %v2380_v20 }
 0x36d   :  { %5537 = vmatpush1.bf16.msra.mxu0 %v8260_v38  ;;  %v2508_v35 = vld [vmem:[#allocation13 + $0xfb0] sm:$0xff] }
 0x36e   :  { %5578 = vmatpush1.bf16.msra.mxu1 %v8388_v37  ;;  %5538 = vmatprep.subr.bf16.mxu0 %v8253_v0  ;;  %v8469_v38 = vcombine.high %v2504_v34, %v2508_v35  ;;  %v2368_v37 = vld [vmem:[#allocation13 + $0xb50] sm:$0xff]  ;;  %v8468_v10 = vcombine.low %v2504_v34, %v2508_v35 }
 0x36f   :  { %5579 = vmatprep.subr.bf16.mxu1 %v8381_v52  ;;  %v2372_v0 = vld [vmem:[#allocation13 + $0xb70] sm:$0xff] }
 0x370   :  { %v2496_v52 = vld [vmem:[#allocation13 + $0xf50] sm:$0xff]  ;;  %v8333_v42 = vcombine.high %v2368_v37, %v2372_v0  ;;  %v8332_v4 = vcombine.low %v2368_v37, %v2372_v0 }
 0x371   :  { %5539 = vmatpush1.bf16.msra.mxu0 %v8252_v43  ;;  %v2500_v56 = vld [vmem:[#allocation13 + $0xf70] sm:$0xff] }
 0x372   :  { %5580 = vmatpush1.bf16.msra.mxu1 %v8380_v45  ;;  %5540 = vmatprep.subr.bf16.mxu0 %v8245_v46  ;;  %v8461_v43 = vcombine.high %v2496_v52, %v2500_v56  ;;  %v2360_v45 = vld [vmem:[#allocation13 + $0xb10] sm:$0xff]  ;;  %v8460_v57 = vcombine.low %v2496_v52, %v2500_v56 }
 0x373   :  { %5581 = vmatprep.subr.bf16.mxu1 %v8373_v47  ;;  %v2364_v46 = vld [vmem:[#allocation13 + $0xb30] sm:$0xff] }
 0x374   :  { %v2488_v47 = vld [vmem:[#allocation13 + $0xf10] sm:$0xff]  ;;  %v8325_v59 = vcombine.high %v2360_v45, %v2364_v46  ;;  %v8324_v55 = vcombine.low %v2360_v45, %v2364_v46  ;;  %v2197_v45 = vld [vmem:[#allocation13 + $0x5f8] sm:$0xff] }
 0x375   :  { %5541 = vmatpush1.bf16.msra.mxu0 %v8244_v5  ;;  %v2492_v1 = vld [vmem:[#allocation13 + $0xf30] sm:$0xff] }
 0x376   :  { %5582 = vmatpush1.bf16.msra.mxu1 %v8372_v14  ;;  %5542 = vmatprep.subr.bf16.mxu0 %v8237_v16  ;;  %v8453_v5 = vcombine.high %v2488_v47, %v2492_v1  ;;  %v2352_v14 = vld [vmem:[#allocation13 + $0xad0] sm:$0xff]  ;;  %v8452_v19 = vcombine.low %v2488_v47, %v2492_v1 }
 0x377   :  { %5583 = vmatprep.subr.bf16.mxu1 %v8365_v17  ;;  %v2356_v16 = vld [vmem:[#allocation13 + $0xaf0] sm:$0xff] }
 0x378   :  { %v2480_v17 = vld [vmem:[#allocation13 + $0xed0] sm:$0xff]  ;;  %v8317_v21 = vcombine.high %v2352_v14, %v2356_v16  ;;  %v8316_v60 = vcombine.low %v2352_v14, %v2356_v16  ;;  %v2185_v16 = vld [vmem:[#allocation13 + $0x598] sm:$0xff] }
 0x379   :  { %5543 = vmatpush1.bf16.msra.mxu0 %v8236_v24  ;;  %v2484_v54 = vld [vmem:[#allocation13 + $0xef0] sm:$0xff] }
 0x37a   :  { %5584 = vmatpush1.bf16.msra.mxu1 %v8364_v25  ;;  %5544 = vmatprep.subr.bf16.mxu0 %v8229_v58  ;;  %v8445_v24 = vcombine.high %v2480_v17, %v2484_v54  ;;  %v2344_v25 = vld [vmem:[#allocation13 + $0xa90] sm:$0xff]  ;;  %v8444_v61 = vcombine.low %v2480_v17, %v2484_v54  ;;  %v2189_v17 = vld [vmem:[#allocation13 + $0x5b8] sm:$0xff] }
 0x37b   :  { %5585 = vmatprep.subr.bf16.mxu1 %v8357_v26  ;;  %v2348_v58 = vld [vmem:[#allocation13 + $0xab0] sm:$0xff] }
 0x37c   :  { %v2472_v26 = vld [vmem:[#allocation13 + $0xe90] sm:$0xff]  ;;  %v8309_v62 = vcombine.high %v2344_v25, %v2348_v58  ;;  %v8308_v20 = vcombine.low %v2344_v25, %v2348_v58  ;;  %v8151_v58 = vcombine.high %v2185_v16, %v2189_v17 }
 0x37d   :  { %5545 = vmatpush1.bf16.msra.mxu0 %v8228_v28  ;;  %v2476_v27 = vld [vmem:[#allocation13 + $0xeb0] sm:$0xff] }
 0x37e   :  { %5586 = vmatpush1.bf16.msra.mxu1 %v8356_v29  ;;  %5546 = vmatprep.subr.bf16.mxu0 %v8349_v2  ;;  %v8437_v28 = vcombine.high %v2472_v26, %v2476_v27  ;;  %v2336_v29 = vld [vmem:[#allocation13 + $0xa50] sm:$0xff]  ;;  %v8436_v34 = vcombine.low %v2472_v26, %v2476_v27  ;;  %v2177_v26 = vld [vmem:[#allocation13 + $0x558] sm:$0xff] }
 0x37f   :  { %5587 = vmatprep.subr.bf16.mxu1 %v8477_v32  ;;  %v2340_v2 = vld [vmem:[#allocation13 + $0xa70] sm:$0xff]  ;;  %v2181_v27 = vld [vmem:[#allocation13 + $0x578] sm:$0xff] }
 0x380   :  { %v2464_v32 = vld [vmem:[#allocation13 + $0xe50] sm:$0xff]  ;;  %v8301_v35 = vcombine.high %v2336_v29, %v2340_v2  ;;  %v8300_v0 = vcombine.low %v2336_v29, %v2340_v2 }
 0x381   :  { %5547 = vmatpush2.bf16.msra.mxu0 %v8348_v63  ;;  %v2468_v33 = vld [vmem:[#allocation13 + $0xe70] sm:$0xff] }
 0x382   :  { %5588 = vmatpush2.bf16.msra.mxu1 %v8476_v36  ;;  %5548 = vmatprep.subr.bf16.mxu0 %v8341_v51  ;;  %v8429_v63 = vcombine.high %v2464_v32, %v2468_v33  ;;  %v2328_v36 = vld [vmem:[#allocation13 + $0xa10] sm:$0xff]  ;;  %v8428_v52 = vcombine.low %v2464_v32, %v2468_v33 }
 0x383   :  { %5589 = vmatprep.subr.bf16.mxu1 %v8469_v38  ;;  %v2332_v51 = vld [vmem:[#allocation13 + $0xa30] sm:$0xff] }
 0x384   :  { %v2456_v38 = vld [vmem:[#allocation13 + $0xe10] sm:$0xff]  ;;  %v8293_v56 = vcombine.high %v2328_v36, %v2332_v51  ;;  %v8292_v46 = vcombine.low %v2328_v36, %v2332_v51  ;;  %v2169_v36 = vld [vmem:[#allocation13 + $0x518] sm:$0xff] }
 0x385   :  { %5549 = vmatpush2.bf16.msra.mxu0 %v8340_v39  ;;  %v2460_v37 = vld [vmem:[#allocation13 + $0xe30] sm:$0xff]  ;;  %v2173_v51 = vld [vmem:[#allocation13 + $0x538] sm:$0xff] }
 0x386   :  { %5590 = vmatpush2.bf16.msra.mxu1 %v8468_v10  ;;  %5550 = vmatprep.subr.bf16.mxu0 %v8333_v42  ;;  %v8421_v39 = vcombine.high %v2456_v38, %v2460_v37  ;;  %v2065_v10 = vld [vmem:[#allocation13 + $0x1d8] sm:$0xff]  ;;  %v8420_v47 = vcombine.low %v2456_v38, %v2460_v37 }
 0x387   :  { %5591 = vmatprep.subr.bf16.mxu1 %v8461_v43  ;;  %v2069_v42 = vld [vmem:[#allocation13 + $0x1f8] sm:$0xff] }
 0x388   :  { %v2193_v43 = vld [vmem:[#allocation13 + $0x5d8] sm:$0xff]  ;;  %v8031_v1 = vcombine.high %v2065_v10, %v2069_v42  ;;  %v8030_v14 = vcombine.low %v2065_v10, %v2069_v42 }
 0x389   :  { %5551 = vmatpush2.bf16.msra.mxu0 %v8332_v4  ;;  %v8159_v4 = vcombine.high %v2193_v43, %v2197_v45  ;;  %v8158_v54 = vcombine.low %v2193_v43, %v2197_v45  ;;  %v2033_v10 = vld [vmem:[#allocation13 + $0xd8] sm:$0xff] }
 0x38a   :  { %5592 = vmatpush2.bf16.msra.mxu1 %v8460_v57  ;;  %5552 = vmatprep.subr.bf16.mxu0 %v8325_v59  ;;  %v2057_v57 = vld [vmem:[#allocation13 + $0x198] sm:$0xff] }
 0x38b   :  { %5593 = vmatprep.subr.bf16.mxu1 %v8453_v5  ;;  %v2061_v59 = vld [vmem:[#allocation13 + $0x1b8] sm:$0xff]  ;;  %v2531_v5 = vrot.slane %v10035_v31, %v9951_v9 }
 0x38c   :  { %v2037_v42 = vld [vmem:[#allocation13 + $0xf8] sm:$0xff] }
 0x38d   :  { %5553 = vmatpush2.bf16.msra.mxu0 %v8324_v55  ;;  %v2535_v55 = vrot.slane %v10035_v31, %v9959_v12  ;;  %v8150_v31 = vcombine.low %v2185_v16, %v2189_v17  ;;  %v2161_v43 = vld [vmem:[#allocation13 + $0x4d8] sm:$0xff]  ;;  %v7998_v16 = vcombine.low %v2033_v10, %v2037_v42 }
 0x38e   :  { %5594 = vmatpush2.bf16.msra.mxu1 %v8452_v19  ;;  %5554 = vmatprep.subr.bf16.mxu0 %v8317_v21  ;;  %v8023_v19 = vcombine.high %v2057_v57, %v2061_v59  ;;  %v2049_v21 = vld [vmem:[#allocation13 + $0x158] sm:$0xff] }
 0x38f   :  { %5595 = vmatprep.subr.bf16.mxu1 %v8445_v24  ;;  %v2053_v24 = vld [vmem:[#allocation13 + $0x178] sm:$0xff] }
 0x390   :  { %v8015_v29 = vcombine.high %v2049_v21, %v2053_v24  ;;  %v8014_v37 = vcombine.low %v2049_v21, %v2053_v24  ;;  %v2165_v45 = vld [vmem:[#allocation13 + $0x4f8] sm:$0xff] }
 0x391   :  { %5555 = vmatpush2.bf16.msra.mxu0 %v8316_v60  ;;  %v8126_v17 = vcombine.low %v2161_v43, %v2165_v45  ;;  %v2021_v21 = vld [vmem:[#allocation13 + $0x78] sm:$0xff] }
 0x392   :  { %5596 = vmatpush2.bf16.msra.mxu1 %v8444_v61  ;;  %5556 = vmatprep.subr.bf16.mxu0 %v8309_v62  ;;  %v8022_v62 = vcombine.low %v2057_v57, %v2061_v59  ;;  %v2025_v57 = vld [vmem:[#allocation13 + $0x98] sm:$0xff] }
 0x393   :  { %5597 = vmatprep.subr.bf16.mxu1 %v8437_v28  ;;  %v2029_v59 = vld [vmem:[#allocation13 + $0xb8] sm:$0xff] }
 0x394   :  { %v2145_v24 = vld [vmem:[#allocation13 + $0x458] sm:$0xff] }
 0x395   :  { %5557 = vmatpush2.bf16.msra.mxu0 %v8308_v20  ;;  %v8143_v20 = vcombine.high %v2177_v26, %v2181_v27 }
 0x396   :  { %5598 = vmatpush2.bf16.msra.mxu1 %v8436_v34  ;;  %5558 = vmatprep.subr.bf16.mxu0 %v8301_v35  ;;  %v2041_v34 = vld [vmem:[#allocation13 + $0x118] sm:$0xff] }
 0x397   :  { %5599 = vmatprep.subr.bf16.mxu1 %v8429_v63  ;;  %v2045_v35 = vld [vmem:[#allocation13 + $0x138] sm:$0xff] }
 0x399   :  { %5559 = vmatpush2.bf16.msra.mxu0 %v8300_v0 }
 0x39a   :  { %5600 = vmatpush2.bf16.msra.mxu1 %v8428_v52  ;;  %5560 = vmatprep.subr.bf16.mxu0 %v8293_v56  ;;  %v8142_v52 = vcombine.low %v2177_v26, %v2181_v27 }
 0x39b   :  { %5601 = vmatprep.subr.bf16.mxu1 %v8421_v39  ;;  %v8135_v39 = vcombine.high %v2169_v36, %v2173_v51 }
 0x39d   :  { %5561 = vmatpush2.bf16.msra.mxu0 %v8292_v46  ;;  %v8006_v46 = vcombine.low %v2041_v34, %v2045_v35 }
 0x39e   :  { %5602 = vmatpush2.bf16.msra.mxu1 %v8420_v47  ;;  %5612 = vmatprep.subr.bf16.mxu0 %v8031_v1  ;;  %v8134_v47 = vcombine.low %v2169_v36, %v2173_v51  ;;  %v7999_v1 = vcombine.high %v2033_v10, %v2037_v42  ;;  %v2261_v36 = vld [vmem:[#allocation13 + $0x7f8] sm:$0xff] }
 0x39f   :  { %5653 = vmatprep.subr.bf16.mxu1 %v8159_v4  ;;  %v8127_v4 = vcombine.high %v2161_v43, %v2165_v45 }
 0x3a0   :  { %v5318_v25 = vpop.f32.mrf.mxu0  ;;  %5563 = vmatmul.mubr.bf16.vlgmr.msra.gmra.mxu0 %v10023_v13 }
 0x3a1   :  { %v5319_v60 = vadd.f32 %v5318_v25, %v2531_v5  ;;  %v5359_v61 = vpop.f32.mrf.mxu1  ;;  %5604 = vmatmul.mubr.bf16.vlgmr.msra.gmra.mxu1 %v10025_v15  ;;  %5613 = vmatpush1.bf16.msra.mxu0 %v8030_v14  ;;  %v2153_v5 = vld [vmem:[#allocation13 + $0x498] sm:$0xff] }
 0x3a2   :  { %5644 = vmatprep.mubr.bf16.mxu0 %v9979_v40  ;;  %5654 = vmatpush1.bf16.msra.mxu1 %v8158_v54  ;;  %v5320_v28 = vpop.f32.mrf.mxu0  ;;  %v2157_v14 = vld [vmem:[#allocation13 + $0x4b8] sm:$0xff]  ;;  %v7991_v54 = vcombine.high %v2025_v57, %v2029_v59 }
 0x3a3   :  { %v10066_v2 = vadd.f32 %v5359_v61, %v5319_v60  ;;  %5685 = vmatprep.mubr.bf16.mxu1 %v9981_v41  ;;  %v5321_v32 = vadd.f32 %v5320_v28, %v2535_v55  ;;  %v5361_v33 = vpop.f32.mrf.mxu1  ;;  %5614 = vmatprep.subr.bf16.mxu0 %v8023_v19  ;;  %v8007_v41 = vcombine.high %v2041_v34, %v2045_v35  ;;  %v2017_v19 = vld [vmem:[#allocation13 + $0x58] sm:$0xff] }
 0x3a4   :  { %v5322_v63 = vpop.f32.mrf.mxu0  ;;  %5655 = vmatprep.subr.bf16.mxu1 %v8151_v58  ;;  %v8119_v55 = vcombine.high %v2153_v5, %v2157_v14  ;;  %v2149_v25 = vld [vmem:[#allocation13 + $0x478] sm:$0xff]  ;;  %v7990_v58 = vcombine.low %v2025_v57, %v2029_v59  ;;  %v8118_v26 = vcombine.low %v2153_v5, %v2157_v14  ;;  %v7983_v27 = vcombine.high %v2017_v19, %v2021_v21 }
 0x3a5   :  { %v10069_v38 = vadd.f32 %v5361_v33, %v5321_v32  ;;  %v5363_v40 = vpop.f32.mrf.mxu1  ;;  %5615 = vmatpush1.bf16.msra.mxu0 %v8022_v62  ;;  %v8111_v60 = vcombine.high %v2145_v24, %v2149_v25  ;;  %v2009_v61 = vld [vmem:[#allocation13 + $0x18] sm:$0xff]  ;;  %v8110_v32 = vcombine.low %v2145_v24, %v2149_v25 }
 0x3a6   :  { %5656 = vmatpush1.bf16.msra.mxu1 %v8150_v31  ;;  %v5323_v0 = vpop.f32.mrf.mxu0  ;;  %5616 = vmatprep.subr.bf16.mxu0 %v8015_v29  ;;  %v2013_v62 = vld [vmem:[#allocation13 + $0x38] sm:$0xff]  ;;  %v7982_v29 = vcombine.low %v2017_v19, %v2021_v21 }
 0x3a7   :  { %v5364_v56 = vpop.f32.mrf.mxu1  ;;  %5657 = vmatprep.subr.bf16.mxu1 %v8143_v20  ;;  %v2137_v28 = vld [vmem:[#allocation13 + $0x418] sm:$0xff]  ;;  %v7975_v33 = vcombine.high %v2009_v61, %v2013_v62  ;;  %v7974_v51 = vcombine.low %v2009_v61, %v2013_v62 }
 0x3a8   :  { %v2141_v31 = vld [vmem:[#allocation13 + $0x438] sm:$0xff] }
 0x3a9   :  { %5617 = vmatpush1.bf16.msra.mxu0 %v8014_v37  ;;  %v8103_v20 = vcombine.high %v2137_v28, %v2141_v31  ;;  %v2129_v34 = vld [vmem:[#allocation13 + $0x3d8] sm:$0xff]  ;;  %v8102_v40 = vcombine.low %v2137_v28, %v2141_v31 }
 0x3aa   :  { %5658 = vmatpush1.bf16.msra.mxu1 %v8142_v52  ;;  %5618 = vmatprep.subr.bf16.mxu0 %v8007_v41  ;;  %v2133_v35 = vld [vmem:[#allocation13 + $0x3f8] sm:$0xff] }
 0x3ab   :  { %5659 = vmatprep.subr.bf16.mxu1 %v8135_v39  ;;  %v2257_v63 = vld [vmem:[#allocation13 + $0x7d8] sm:$0xff]  ;;  %v8095_v37 = vcombine.high %v2129_v34, %v2133_v35  ;;  %v8094_v10 = vcombine.low %v2129_v34, %v2133_v35 }
 0x3ac   :  { %v8223_v0 = vcombine.high %v2257_v63, %v2261_v36  ;;  %v2121_v52 = vld [vmem:[#allocation13 + $0x398] sm:$0xff]  ;;  %v8222_v42 = vcombine.low %v2257_v63, %v2261_v36 }
 0x3ad   :  { %5619 = vmatpush1.bf16.msra.mxu0 %v8006_v46  ;;  %v2125_v41 = vld [vmem:[#allocation13 + $0x3b8] sm:$0xff] }
 0x3ae   :  { %5660 = vmatpush1.bf16.msra.mxu1 %v8134_v47  ;;  %5620 = vmatprep.subr.bf16.mxu0 %v7999_v1  ;;  %v2249_v56 = vld [vmem:[#allocation13 + $0x798] sm:$0xff]  ;;  %v8087_v43 = vcombine.high %v2121_v52, %v2125_v41  ;;  %v8086_v57 = vcombine.low %v2121_v52, %v2125_v41 }
 0x3af   :  { %5661 = vmatprep.subr.bf16.mxu1 %v8127_v4  ;;  %v2253_v39 = vld [vmem:[#allocation13 + $0x7b8] sm:$0xff] }
 0x3b0   :  { %v8215_v45 = vcombine.high %v2249_v56, %v2253_v39  ;;  %v2113_v46 = vld [vmem:[#allocation13 + $0x358] sm:$0xff]  ;;  %v8214_v59 = vcombine.low %v2249_v56, %v2253_v39 }
 0x3b1   :  { %5621 = vmatpush1.bf16.msra.mxu0 %v7998_v16  ;;  %v2117_v47 = vld [vmem:[#allocation13 + $0x378] sm:$0xff] }
 0x3b2   :  { %5662 = vmatpush1.bf16.msra.mxu1 %v8126_v17  ;;  %5622 = vmatprep.subr.bf16.mxu0 %v7991_v54  ;;  %v2241_v1 = vld [vmem:[#allocation13 + $0x758] sm:$0xff]  ;;  %v8079_v5 = vcombine.high %v2113_v46, %v2117_v47  ;;  %v8078_v19 = vcombine.low %v2113_v46, %v2117_v47 }
 0x3b3   :  { %5663 = vmatprep.subr.bf16.mxu1 %v8119_v55  ;;  %v2245_v4 = vld [vmem:[#allocation13 + $0x778] sm:$0xff] }
 0x3b4   :  { %v8207_v14 = vcombine.high %v2241_v1, %v2245_v4  ;;  %v2105_v16 = vld [vmem:[#allocation13 + $0x318] sm:$0xff]  ;;  %v8206_v21 = vcombine.low %v2241_v1, %v2245_v4 }
 0x3b5   :  { %5623 = vmatpush1.bf16.msra.mxu0 %v7990_v58  ;;  %v2109_v17 = vld [vmem:[#allocation13 + $0x338] sm:$0xff] }
 0x3b6   :  { %5664 = vmatpush1.bf16.msra.mxu1 %v8118_v26  ;;  %5624 = vmatprep.subr.bf16.mxu0 %v7983_v27  ;;  %v2233_v54 = vld [vmem:[#allocation13 + $0x718] sm:$0xff]  ;;  %v8071_v24 = vcombine.high %v2105_v16, %v2109_v17  ;;  %v8070_v61 = vcombine.low %v2105_v16, %v2109_v17 }
 0x3b7   :  { %5665 = vmatprep.subr.bf16.mxu1 %v8111_v60  ;;  %v2237_v55 = vld [vmem:[#allocation13 + $0x738] sm:$0xff] }
 0x3b8   :  { %v8199_v25 = vcombine.high %v2233_v54, %v2237_v55  ;;  %v2097_v58 = vld [vmem:[#allocation13 + $0x2d8] sm:$0xff]  ;;  %v8198_v62 = vcombine.low %v2233_v54, %v2237_v55 }
 0x3b9   :  { %5625 = vmatpush1.bf16.msra.mxu0 %v7982_v29  ;;  %v2101_v26 = vld [vmem:[#allocation13 + $0x2f8] sm:$0xff] }
 0x3ba   :  { %5666 = vmatpush1.bf16.msra.mxu1 %v8110_v32  ;;  %5626 = vmatprep.subr.bf16.mxu0 %v7975_v33  ;;  %v2225_v27 = vld [vmem:[#allocation13 + $0x6d8] sm:$0xff]  ;;  %v8063_v28 = vcombine.high %v2097_v58, %v2101_v26  ;;  %v8062_v34 = vcombine.low %v2097_v58, %v2101_v26 }
 0x3bb   :  { %5667 = vmatprep.subr.bf16.mxu1 %v8103_v20  ;;  %v2229_v60 = vld [vmem:[#allocation13 + $0x6f8] sm:$0xff] }
 0x3bc   :  { %v8191_v31 = vcombine.high %v2225_v27, %v2229_v60  ;;  %v2089_v29 = vld [vmem:[#allocation13 + $0x298] sm:$0xff]  ;;  %v8190_v35 = vcombine.low %v2225_v27, %v2229_v60 }
 0x3bd   :  { %5627 = vmatpush1.bf16.msra.mxu0 %v7974_v51  ;;  %v2093_v32 = vld [vmem:[#allocation13 + $0x2b8] sm:$0xff] }
 0x3be   :  { %5668 = vmatpush1.bf16.msra.mxu1 %v8102_v40  ;;  %5628 = vmatprep.subr.bf16.mxu0 %v8095_v37  ;;  %v2217_v33 = vld [vmem:[#allocation13 + $0x698] sm:$0xff]  ;;  %v8055_v63 = vcombine.high %v2089_v29, %v2093_v32  ;;  %v8054_v52 = vcombine.low %v2089_v29, %v2093_v32 }
 0x3bf   :  { %5669 = vmatprep.subr.bf16.mxu1 %v8223_v0  ;;  %v2221_v20 = vld [vmem:[#allocation13 + $0x6b8] sm:$0xff] }
 0x3c0   :  { %v8183_v36 = vcombine.high %v2217_v33, %v2221_v20  ;;  %v2081_v51 = vld [vmem:[#allocation13 + $0x258] sm:$0xff]  ;;  %v8182_v41 = vcombine.low %v2217_v33, %v2221_v20 }
 0x3c1   :  { %5629 = vmatpush2.bf16.msra.mxu0 %v8094_v10  ;;  %v2085_v40 = vld [vmem:[#allocation13 + $0x278] sm:$0xff] }
 0x3c2   :  { %5670 = vmatpush2.bf16.msra.mxu1 %v8222_v42  ;;  %5630 = vmatprep.subr.bf16.mxu0 %v8087_v43  ;;  %v2209_v37 = vld [vmem:[#allocation13 + $0x658] sm:$0xff]  ;;  %v8047_v56 = vcombine.high %v2081_v51, %v2085_v40  ;;  %v8046_v46 = vcombine.low %v2081_v51, %v2085_v40 }
 0x3c3   :  { %5671 = vmatprep.subr.bf16.mxu1 %v8215_v45  ;;  %v2213_v0 = vld [vmem:[#allocation13 + $0x678] sm:$0xff] }
 0x3c4   :  { %v8175_v39 = vcombine.high %v2209_v37, %v2213_v0  ;;  %v2073_v10 = vld [vmem:[#allocation13 + $0x218] sm:$0xff]  ;;  %v8174_v47 = vcombine.low %v2209_v37, %v2213_v0 }
 0x3c5   :  { %5631 = vmatpush2.bf16.msra.mxu0 %v8086_v57  ;;  %v2077_v42 = vld [vmem:[#allocation13 + $0x238] sm:$0xff] }
 0x3c6   :  { %5672 = vmatpush2.bf16.msra.mxu1 %v8214_v59  ;;  %5632 = vmatprep.subr.bf16.mxu0 %v8079_v5  ;;  %v2201_v43 = vld [vmem:[#allocation13 + $0x618] sm:$0xff]  ;;  %v8039_v1 = vcombine.high %v2073_v10, %v2077_v42  ;;  %v8038_v16 = vcombine.low %v2073_v10, %v2077_v42 }
 0x3c7   :  { %5673 = vmatprep.subr.bf16.mxu1 %v8207_v14  ;;  %v2205_v45 = vld [vmem:[#allocation13 + $0x638] sm:$0xff] }
 0x3c8   :  { %v8167_v4 = vcombine.high %v2201_v43, %v2205_v45  ;;  %v2321_v57 = vld [vmem:[#allocation13 + $0x9d8] sm:$0xff]  ;;  %v8166_v17 = vcombine.low %v2201_v43, %v2205_v45 }
 0x3c9   :  { %5633 = vmatpush2.bf16.msra.mxu0 %v8078_v19  ;;  %v2325_v59 = vld [vmem:[#allocation13 + $0x9f8] sm:$0xff] }
 0x3ca   :  { %5674 = vmatpush2.bf16.msra.mxu1 %v8206_v21  ;;  %5634 = vmatprep.subr.bf16.mxu0 %v8071_v24  ;;  %v2449_v5 = vld [vmem:[#allocation13 + $0xdd8] sm:$0xff]  ;;  %v8287_v54 = vcombine.high %v2321_v57, %v2325_v59  ;;  %v8286_v24 = vcombine.low %v2321_v57, %v2325_v59 }
 0x3cb   :  { %5675 = vmatprep.subr.bf16.mxu1 %v8199_v25  ;;  %v2453_v14 = vld [vmem:[#allocation13 + $0xdf8] sm:$0xff] }
 0x3cc   :  { %v8415_v55 = vcombine.high %v2449_v5, %v2453_v14  ;;  %v2313_v19 = vld [vmem:[#allocation13 + $0x998] sm:$0xff]  ;;  %v8414_v26 = vcombine.low %v2449_v5, %v2453_v14 }
 0x3cd   :  { %5635 = vmatpush2.bf16.msra.mxu0 %v8070_v61  ;;  %v2317_v21 = vld [vmem:[#allocation13 + $0x9b8] sm:$0xff] }
 0x3ce   :  { %5676 = vmatpush2.bf16.msra.mxu1 %v8198_v62  ;;  %5636 = vmatprep.subr.bf16.mxu0 %v8063_v28  ;;  %v2441_v25 = vld [vmem:[#allocation13 + $0xd98] sm:$0xff]  ;;  %v8279_v27 = vcombine.high %v2313_v19, %v2317_v21  ;;  %v8278_v20 = vcombine.low %v2313_v19, %v2317_v21 }
 0x3cf   :  { %5677 = vmatprep.subr.bf16.mxu1 %v8191_v31  ;;  %v2445_v58 = vld [vmem:[#allocation13 + $0xdb8] sm:$0xff] }
 0x3d0   :  { %v2305_v60 = vld [vmem:[#allocation13 + $0x958] sm:$0xff]  ;;  %v8407_v28 = vcombine.high %v2441_v25, %v2445_v58 }
 0x3d1   :  { %5637 = vmatpush2.bf16.msra.mxu0 %v8062_v34  ;;  %v2309_v61 = vld [vmem:[#allocation13 + $0x978] sm:$0xff] }
 0x3d2   :  { %5678 = vmatpush2.bf16.msra.mxu1 %v8190_v35  ;;  %5638 = vmatprep.subr.bf16.mxu0 %v8055_v63  ;;  %v2433_v31 = vld [vmem:[#allocation13 + $0xd58] sm:$0xff]  ;;  %v8406_v35 = vcombine.low %v2441_v25, %v2445_v58  ;;  %v8271_v63 = vcombine.high %v2305_v60, %v2309_v61 }
 0x3d3   :  { %5679 = vmatprep.subr.bf16.mxu1 %v8183_v36  ;;  %v2437_v29 = vld [vmem:[#allocation13 + $0xd78] sm:$0xff] }
 0x3d4   :  { %v2297_v51 = vld [vmem:[#allocation13 + $0x918] sm:$0xff] }
 0x3d5   :  { %5639 = vmatpush2.bf16.msra.mxu0 %v8054_v52  ;;  %v2301_v40 = vld [vmem:[#allocation13 + $0x938] sm:$0xff]  ;;  %v8270_v52 = vcombine.low %v2305_v60, %v2309_v61 }
 0x3d6   :  { %5680 = vmatpush2.bf16.msra.mxu1 %v8182_v41  ;;  %5640 = vmatprep.subr.bf16.mxu0 %v8047_v56  ;;  %v2425_v37 = vld [vmem:[#allocation13 + $0xd18] sm:$0xff]  ;;  %v8398_v56 = vcombine.low %v2433_v31, %v2437_v29 }
 0x3d7   :  { %5681 = vmatprep.subr.bf16.mxu1 %v8175_v39  ;;  %v2429_v0 = vld [vmem:[#allocation13 + $0xd38] sm:$0xff]  ;;  %v8263_v39 = vcombine.high %v2297_v51, %v2301_v40 }
 0x3d8   :  { %v2289_v42 = vld [vmem:[#allocation13 + $0x8d8] sm:$0xff] }
 0x3d9   :  { %5641 = vmatpush2.bf16.msra.mxu0 %v8046_v46  ;;  %v2293_v43 = vld [vmem:[#allocation13 + $0x8f8] sm:$0xff] }
 0x3da   :  { %5682 = vmatpush2.bf16.msra.mxu1 %v8174_v47  ;;  %5642 = vmatprep.subr.bf16.mxu0 %v8039_v1  ;;  %v2417_v45 = vld [vmem:[#allocation13 + $0xcd8] sm:$0xff]  ;;  %v8262_v47 = vcombine.low %v2297_v51, %v2301_v40  ;;  %v8390_v1 = vcombine.low %v2425_v37, %v2429_v0 }
 0x3db   :  { %5683 = vmatprep.subr.bf16.mxu1 %v8167_v4  ;;  %v2421_v46 = vld [vmem:[#allocation13 + $0xcf8] sm:$0xff]  ;;  %v8255_v4 = vcombine.high %v2289_v42, %v2293_v43 }
 0x3dc   :  { %v8383_v57 = vcombine.high %v2417_v45, %v2421_v46  ;;  %v2281_v59 = vld [vmem:[#allocation13 + $0x898] sm:$0xff] }
 0x3dd   :  { %5643 = vmatpush2.bf16.msra.mxu0 %v8038_v16  ;;  %v2285_v5 = vld [vmem:[#allocation13 + $0x8b8] sm:$0xff] }
 0x3de   :  { %5684 = vmatpush2.bf16.msra.mxu1 %v8166_v17  ;;  %5694 = vmatprep.subr.bf16.mxu0 %v8287_v54  ;;  %v2409_v14 = vld [vmem:[#allocation13 + $0xc98] sm:$0xff]  ;;  %v8254_v17 = vcombine.low %v2289_v42, %v2293_v43  ;;  %v8382_v54 = vcombine.low %v2417_v45, %v2421_v46 }
 0x3df   :  { %5735 = vmatprep.subr.bf16.mxu1 %v8415_v55  ;;  %v2413_v16 = vld [vmem:[#allocation13 + $0xcb8] sm:$0xff]  ;;  %v8247_v55 = vcombine.high %v2281_v59, %v2285_v5 }
 0x3e0   :  { %v5400_v62 = vpop.f32.mrf.mxu0  ;;  %5645 = vmatmul.mubr.bf16.vlgmr.msra.gmra.mxu0 %v9989_v44  ;;  %v8375_v19 = vcombine.high %v2409_v14, %v2413_v16  ;;  %v2273_v21 = vld [vmem:[#allocation13 + $0x858] sm:$0xff] }
 0x3e1   :  { %v5401_v32 = vadd.f32 %v5400_v62, %v10066_v2  ;;  %v5441_v33 = vpop.f32.mrf.mxu1  ;;  %5686 = vmatmul.mubr.bf16.vlgmr.msra.gmra.mxu1 %v9991_v48  ;;  %5695 = vmatpush1.bf16.msra.mxu0 %v8286_v24  ;;  %v8399_v2 = vcombine.high %v2433_v31, %v2437_v29  ;;  %v2277_v24 = vld [vmem:[#allocation13 + $0x878] sm:$0xff] }
 0x3e2   :  { %5726 = vmatprep.mubr.bf16.mxu0 %v10003_v49  ;;  %5736 = vmatpush1.bf16.msra.mxu1 %v8414_v26  ;;  %v10075_v34 = vpop.f32.mrf.mxu0  ;;  %v2401_v25 = vld [vmem:[#allocation13 + $0xc58] sm:$0xff]  ;;  %v8246_v26 = vcombine.low %v2281_v59, %v2285_v5  ;;  %v8239_v60 = vcombine.high %v2273_v21, %v2277_v24 }
 0x3e3   :  { %v10077_v36 = vadd.f32 %v5441_v33, %v5401_v32  ;;  %5767 = vmatprep.mubr.bf16.mxu1 %v10005_v50  ;;  %v10080_v44 = vpop.f32.mrf.mxu1  ;;  %5696 = vmatprep.subr.bf16.mxu0 %v8279_v27  ;;  %v8391_v50 = vcombine.high %v2425_v37, %v2429_v0  ;;  %v2405_v58 = vld [vmem:[#allocation13 + $0xc78] sm:$0xff]  ;;  %v8374_v27 = vcombine.low %v2409_v14, %v2413_v16 }
 0x3e4   :  { %v5404_v48 = vpop.f32.mrf.mxu0  ;;  %5737 = vmatprep.subr.bf16.mxu1 %v8407_v28  ;;  %v8367_v61 = vcombine.high %v2401_v25, %v2405_v58  ;;  %v2265_v62 = vld [vmem:[#allocation13 + $0x818] sm:$0xff]  ;;  %v8238_v32 = vcombine.low %v2273_v21, %v2277_v24  ;;  %v8366_v33 = vcombine.low %v2401_v25, %v2405_v58 }
 0x3e5   :  { %v5445_v49 = vpop.f32.mrf.mxu1  ;;  %5697 = vmatpush1.bf16.msra.mxu0 %v8278_v20  ;;  %v2269_v28 = vld [vmem:[#allocation13 + $0x838] sm:$0xff] }
 0x3e6   :  { %5738 = vmatpush1.bf16.msra.mxu1 %v8406_v35  ;;  %v5405_v41 = vpop.f32.mrf.mxu0  ;;  %5698 = vmatprep.subr.bf16.mxu0 %v8271_v63  ;;  %v2393_v31 = vld [vmem:[#allocation13 + $0xc18] sm:$0xff]  ;;  %v8231_v20 = vcombine.high %v2265_v62, %v2269_v28  ;;  %v8230_v48 = vcombine.low %v2265_v62, %v2269_v28 }
 0x3e7   :  { %v5446_v10 = vpop.f32.mrf.mxu1  ;;  %5739 = vmatprep.subr.bf16.mxu1 %v8399_v2  ;;  %v2397_v29 = vld [vmem:[#allocation13 + $0xc38] sm:$0xff] }
 0x3e8   :  { %v8359_v35 = vcombine.high %v2393_v31, %v2397_v29  ;;  %v2385_v63 = vld [vmem:[#allocation13 + $0xbd8] sm:$0xff]  ;;  %v8358_v37 = vcombine.low %v2393_v31, %v2397_v29 }
 0x3e9   :  { %5699 = vmatpush1.bf16.msra.mxu0 %v8270_v52  ;;  %v2389_v2 = vld [vmem:[#allocation13 + $0xbf8] sm:$0xff] }
 0x3ea   :  { %5740 = vmatpush1.bf16.msra.mxu1 %v8398_v56  ;;  %5700 = vmatprep.subr.bf16.mxu0 %v8263_v39  ;;  %v2513_v51 = vld [vmem:[#allocation13 + $0xfd8] sm:$0xff]  ;;  %v8351_v0 = vcombine.high %v2385_v63, %v2389_v2  ;;  %v8350_v10 = vcombine.low %v2385_v63, %v2389_v2 }
 0x3eb   :  { %5741 = vmatprep.subr.bf16.mxu1 %v8391_v50  ;;  %v2517_v40 = vld [vmem:[#allocation13 + $0xff8] sm:$0xff] }
 0x3ec   :  { %v8479_v49 = vcombine.high %v2513_v51, %v2517_v40  ;;  %v2377_v52 = vld [vmem:[#allocation13 + $0xb98] sm:$0xff]  ;;  %v8478_v50 = vcombine.low %v2513_v51, %v2517_v40 }
 0x3ed   :  { %5701 = vmatpush1.bf16.msra.mxu0 %v8262_v47  ;;  %v2381_v41 = vld [vmem:[#allocation13 + $0xbb8] sm:$0xff] }
 0x3ee   :  { %5742 = vmatpush1.bf16.msra.mxu1 %v8390_v1  ;;  %5702 = vmatprep.subr.bf16.mxu0 %v8255_v4  ;;  %v2505_v56 = vld [vmem:[#allocation13 + $0xf98] sm:$0xff]  ;;  %v8343_v42 = vcombine.high %v2377_v52, %v2381_v41  ;;  %v8342_v4 = vcombine.low %v2377_v52, %v2381_v41 }
 0x3ef   :  { %5743 = vmatprep.subr.bf16.mxu1 %v8383_v57  ;;  %v2509_v39 = vld [vmem:[#allocation13 + $0xfb8] sm:$0xff] }
 0x3f0   :  { %v8471_v43 = vcombine.high %v2505_v56, %v2509_v39  ;;  %v2369_v45 = vld [vmem:[#allocation13 + $0xb58] sm:$0xff]  ;;  %v8470_v57 = vcombine.low %v2505_v56, %v2509_v39 }
 0x3f1   :  { %5703 = vmatpush1.bf16.msra.mxu0 %v8254_v17  ;;  %v2373_v46 = vld [vmem:[#allocation13 + $0xb78] sm:$0xff] }
 0x3f2   :  { %5744 = vmatpush1.bf16.msra.mxu1 %v8382_v54  ;;  %5704 = vmatprep.subr.bf16.mxu0 %v8247_v55  ;;  %v2497_v47 = vld [vmem:[#allocation13 + $0xf58] sm:$0xff]  ;;  %v8335_v59 = vcombine.high %v2369_v45, %v2373_v46  ;;  %v8334_v55 = vcombine.low %v2369_v45, %v2373_v46 }
 0x3f3   :  { %5745 = vmatprep.subr.bf16.mxu1 %v8375_v19  ;;  %v2501_v1 = vld [vmem:[#allocation13 + $0xf78] sm:$0xff] }
 0x3f4   :  { %v8463_v5 = vcombine.high %v2497_v47, %v2501_v1  ;;  %v2361_v14 = vld [vmem:[#allocation13 + $0xb18] sm:$0xff]  ;;  %v8462_v19 = vcombine.low %v2497_v47, %v2501_v1 }
 0x3f5   :  { %5705 = vmatpush1.bf16.msra.mxu0 %v8246_v26  ;;  %v2365_v16 = vld [vmem:[#allocation13 + $0xb38] sm:$0xff] }
 0x3f6   :  { %5746 = vmatpush1.bf16.msra.mxu1 %v8374_v27  ;;  %5706 = vmatprep.subr.bf16.mxu0 %v8239_v60  ;;  %v2489_v17 = vld [vmem:[#allocation13 + $0xf18] sm:$0xff]  ;;  %v8327_v21 = vcombine.high %v2361_v14, %v2365_v16  ;;  %v8326_v60 = vcombine.low %v2361_v14, %v2365_v16  ;;  %v10086_v14 = vld [vmem:[#allocation14] sm:$0xff] }
 0x3f7   :  { %5747 = vmatprep.subr.bf16.mxu1 %v8367_v61  ;;  %v2493_v54 = vld [vmem:[#allocation13 + $0xf38] sm:$0xff]  ;;  %v2539_v16 = vrot.slane %v10086_v14, %v10010_v18 }
 0x3f8   :  { %v8455_v24 = vcombine.high %v2489_v17, %v2493_v54  ;;  %v2353_v25 = vld [vmem:[#allocation13 + $0xad8] sm:$0xff]  ;;  %v8454_v61 = vcombine.low %v2489_v17, %v2493_v54 }
 0x3f9   :  { %5707 = vmatpush1.bf16.msra.mxu0 %v8238_v32  ;;  %v2357_v58 = vld [vmem:[#allocation13 + $0xaf8] sm:$0xff] }
 0x3fa   :  { %5748 = vmatpush1.bf16.msra.mxu1 %v8366_v33  ;;  %5708 = vmatprep.subr.bf16.mxu0 %v8231_v20  ;;  %v2481_v26 = vld [vmem:[#allocation13 + $0xed8] sm:$0xff]  ;;  %v8319_v62 = vcombine.high %v2353_v25, %v2357_v58  ;;  %v8318_v20 = vcombine.low %v2353_v25, %v2357_v58 }
 0x3fb   :  { %5749 = vmatprep.subr.bf16.mxu1 %v8359_v35  ;;  %v2485_v27 = vld [vmem:[#allocation13 + $0xef8] sm:$0xff] }
 0x3fc   :  { %v8447_v28 = vcombine.high %v2481_v26, %v2485_v27  ;;  %v2345_v31 = vld [vmem:[#allocation13 + $0xa98] sm:$0xff]  ;;  %v8446_v35 = vcombine.low %v2481_v26, %v2485_v27 }
 0x3fd   :  { %5709 = vmatpush1.bf16.msra.mxu0 %v8230_v48  ;;  %v2349_v29 = vld [vmem:[#allocation13 + $0xab8] sm:$0xff] }
 0x3fe   :  { %5750 = vmatpush1.bf16.msra.mxu1 %v8358_v37  ;;  %5710 = vmatprep.subr.bf16.mxu0 %v8351_v0  ;;  %v2473_v32 = vld [vmem:[#allocation13 + $0xe98] sm:$0xff]  ;;  %v8311_v63 = vcombine.high %v2345_v31, %v2349_v29  ;;  %v8310_v0 = vcombine.low %v2345_v31, %v2349_v29 }
 0x3ff   :  { %5751 = vmatprep.subr.bf16.mxu1 %v8479_v49  ;;  %v2477_v33 = vld [vmem:[#allocation13 + $0xeb8] sm:$0xff] }
 0x400   :  { %v8439_v2 = vcombine.high %v2473_v32, %v2477_v33  ;;  %v2337_v51 = vld [vmem:[#allocation13 + $0xa58] sm:$0xff]  ;;  %v8438_v49 = vcombine.low %v2473_v32, %v2477_v33 }
 0x401   :  { %5711 = vmatpush2.bf16.msra.mxu0 %v8350_v10  ;;  %v2341_v40 = vld [vmem:[#allocation13 + $0xa78] sm:$0xff] }
 0x402   :  { %5752 = vmatpush2.bf16.msra.mxu1 %v8478_v50  ;;  %5712 = vmatprep.subr.bf16.mxu0 %v8343_v42  ;;  %v2465_v48 = vld [vmem:[#allocation13 + $0xe58] sm:$0xff]  ;;  %v8303_v52 = vcombine.high %v2337_v51, %v2341_v40  ;;  %v5403_v42 = vadd.f32 %v10075_v34, %v10069_v38  ;;  %v5777_v38 = vmax.f32 %v10057_v3, 0.0 }
 0x403   :  { %5753 = vmatprep.subr.bf16.mxu1 %v8471_v43  ;;  %v2469_v37 = vld [vmem:[#allocation13 + $0xe78] sm:$0xff]  ;;  %v8302_v43 = vcombine.low %v2337_v51, %v2341_v40 }
 0x404   :  { %v8431_v41 = vcombine.high %v2465_v48, %v2469_v37  ;;  %v2329_v56 = vld [vmem:[#allocation13 + $0xa18] sm:$0xff]  ;;  %v8430_v45 = vcombine.low %v2465_v48, %v2469_v37  ;;  %v5444_v1 = vadd.f32 %v10080_v44, %v5403_v42 }
 0x405   :  { %5713 = vmatpush2.bf16.msra.mxu0 %v8342_v4  ;;  %v2333_v39 = vld [vmem:[#allocation13 + $0xa38] sm:$0xff] }
 0x406   :  { %5754 = vmatpush2.bf16.msra.mxu1 %v8470_v57  ;;  %5714 = vmatprep.subr.bf16.mxu0 %v8335_v59  ;;  %v2457_v10 = vld [vmem:[#allocation13 + $0xe18] sm:$0xff]  ;;  %v8295_v46 = vcombine.high %v2329_v56, %v2333_v39  ;;  %v8294_v4 = vcombine.low %v2329_v56, %v2333_v39  ;;  %v5779_v34 = vmax.f32 %v5444_v1, 0.0 }
 0x407   :  { %5755 = vmatprep.subr.bf16.mxu1 %v8463_v5  ;;  %v2461_v50 = vld [vmem:[#allocation13 + $0xe38] sm:$0xff] }
 0x408   :  { %v8423_v47 = vcombine.high %v2457_v10, %v2461_v50  ;;  %v8422_v57 = vcombine.low %v2457_v10, %v2461_v50  ;;  %v8918_v59 = vld [vmem:[#allocation16 + $0xe4] ss:$16 sps:$4 sm:$0xff]   ;;  %v8916_v17 = vld [vmem:[#allocation16 + $0xe0] ss:$16 sps:$4 sm:$0xff]   ;;  %v10093_v3 = vpack.c.bf16 %v5779_v34, %v5779_v34 }
 0x409   :  { %5715 = vmatpush2.bf16.msra.mxu0 %v8334_v55  ;;  %v8921_v5 = vld [vmem:[#allocation16 + $0x2e4] ss:$16 sps:$4 sm:$0xff]   ;;  %v8919_v44 = vld [vmem:[#allocation16 + $0x2e0] ss:$16 sps:$4 sm:$0xff]   ;;  %v10090_v55 = vpack.c.bf16 %v5777_v38, %v5777_v38 }
 0x40a   :  { %5756 = vmatpush2.bf16.msra.mxu1 %v8462_v19  ;;  %5716 = vmatprep.subr.bf16.mxu0 %v8327_v21  ;;  %v8924_v54 = vld [vmem:[#allocation16 + $0xc4] ss:$16 sps:$4 sm:$0xff]   ;;  %v8922_v58 = vld [vmem:[#allocation16 + $0xc0] ss:$16 sps:$4 sm:$0xff]  }
 0x40b   :  { %5757 = vmatprep.subr.bf16.mxu1 %v8455_v24  ;;  %v8927_v21 = vld [vmem:[#allocation16 + $0x2c4] ss:$16 sps:$4 sm:$0xff]   ;;  %v8925_v27 = vld [vmem:[#allocation16 + $0x2c0] ss:$16 sps:$4 sm:$0xff]  }
 0x40c   :  { %v8928_v31 = vld [vmem:[#allocation16 + $0xa0] ss:$16 sps:$4 sm:$0xff]   ;;  %v8936_v33 = vld [vmem:[#allocation16 + $0x84] ss:$16 sps:$4 sm:$0xff]  }
 0x40d   :  { %5717 = vmatpush2.bf16.msra.mxu0 %v8326_v60  ;;  %v8930_v60 = vld [vmem:[#allocation16 + $0xa4] ss:$16 sps:$4 sm:$0xff]   ;;  %v8931_v32 = vld [vmem:[#allocation16 + $0x2a0] ss:$16 sps:$4 sm:$0xff]  }
 0x40e   :  { %5758 = vmatpush2.bf16.msra.mxu1 %v8454_v61  ;;  %5718 = vmatprep.subr.bf16.mxu0 %v8319_v62  ;;  %v8933_v62 = vld [vmem:[#allocation16 + $0x2a4] ss:$16 sps:$4 sm:$0xff]   ;;  %v8940_v48 = vld [vmem:[#allocation16 + $0x60] ss:$16 sps:$4 sm:$0xff]  }
 0x40f   :  { %5759 = vmatprep.subr.bf16.mxu1 %v8447_v28  ;;  %v8942_v51 = vld [vmem:[#allocation16 + $0x64] ss:$16 sps:$4 sm:$0xff]   ;;  %v8943_v37 = vld [vmem:[#allocation16 + $0x260] ss:$16 sps:$4 sm:$0xff]  }
 0x410   :  { %v8945_v40 = vld [vmem:[#allocation16 + $0x264] ss:$16 sps:$4 sm:$0xff]   ;;  %v8952_v10 = vld [vmem:[#allocation16 + $0x20] ss:$16 sps:$4 sm:$0xff]  }
 0x411   :  { %5719 = vmatpush2.bf16.msra.mxu0 %v8318_v20  ;;  %v8954_v56 = vld [vmem:[#allocation16 + $0x24] ss:$16 sps:$4 sm:$0xff]   ;;  %v8955_v50 = vld [vmem:[#allocation16 + $0x220] ss:$16 sps:$4 sm:$0xff]  }
 0x412   :  { %5760 = vmatpush2.bf16.msra.mxu1 %v8446_v35  ;;  %5720 = vmatprep.subr.bf16.mxu0 %v8311_v63  ;;  %v8939_v35 = vld [vmem:[#allocation16 + $0x284] ss:$16 sps:$4 sm:$0xff]   ;;  %v8934_v63 = vld [vmem:[#allocation16 + $0x80] ss:$16 sps:$4 sm:$0xff]  }
 0x413   :  { %5761 = vmatprep.subr.bf16.mxu1 %v8439_v2  ;;  %v8937_v2 = vld [vmem:[#allocation16 + $0x280] ss:$16 sps:$4 sm:$0xff]   ;;  %v8957_v39 = vld [vmem:[#allocation16 + $0x224] ss:$16 sps:$4 sm:$0xff]  }
 0x414   :  { %v8960_v42 = vld [vmem:[#allocation16 + $0x4] ss:$16 sps:$4 sm:$0xff]   ;;  %v8970_v38 = vld [vmem:[#allocation16 + $0x1c0] ss:$16 sps:$4 sm:$0xff]  }
 0x415   :  { %5721 = vmatpush2.bf16.msra.mxu0 %v8310_v0  ;;  %v8948_v0 = vld [vmem:[#allocation16 + $0x44] ss:$16 sps:$4 sm:$0xff]   ;;  %v8973_v34 = vld [vmem:[#allocation16 + $0x3c0] ss:$16 sps:$4 sm:$0xff]  }
 0x416   :  { %5762 = vmatpush2.bf16.msra.mxu1 %v8438_v49  ;;  %5722 = vmatprep.subr.bf16.mxu0 %v8303_v52  ;;  %v8951_v49 = vld [vmem:[#allocation16 + $0x244] ss:$16 sps:$4 sm:$0xff]   ;;  %v8946_v52 = vld [vmem:[#allocation16 + $0x40] ss:$16 sps:$4 sm:$0xff]  }
 0x417   :  { %5763 = vmatprep.subr.bf16.mxu1 %v8431_v41  ;;  %v8949_v41 = vld [vmem:[#allocation16 + $0x240] ss:$16 sps:$4 sm:$0xff]   ;;  %v8969_v1 = vld [vmem:[#allocation16 + $0x3e4] ss:$16 sps:$4 sm:$0xff]  }
 0x419   :  { %5723 = vmatpush2.bf16.msra.mxu0 %v8302_v43  ;;  %v8963_v43 = vld [vmem:[#allocation16 + $0x204] ss:$16 sps:$4 sm:$0xff]  }
 0x41a   :  { %5764 = vmatpush2.bf16.msra.mxu1 %v8430_v45  ;;  %5724 = vmatprep.subr.bf16.mxu0 %v8295_v46  ;;  %v8958_v45 = vld [vmem:[#allocation16] ss:$16 sps:$4 sm:$0xff]  }
 0x41b   :  { %5765 = vmatprep.subr.bf16.mxu1 %v8423_v47  ;;  %v8961_v46 = vld [vmem:[#allocation16 + $0x200] ss:$16 sps:$4 sm:$0xff]   ;;  %v8966_v47 = vld [vmem:[#allocation16 + $0x1e4] ss:$16 sps:$4 sm:$0xff]  }
 0x41d   :  { %5725 = vmatpush2.bf16.msra.mxu0 %v8294_v4  ;;  %v8964_v4 = vld [vmem:[#allocation16 + $0x1e0] ss:$16 sps:$4 sm:$0xff]  }
 0x41e   :  { %5766 = vmatpush2.bf16.msra.mxu1 %v8422_v57  ;;  %7350 = vmatprep.subr.bf16.mxu0 %v8918_v59  ;;  %v8967_v57 = vld [vmem:[#allocation16 + $0x3e0] ss:$16 sps:$4 sm:$0xff]   ;;  %v8972_v59 = vld [vmem:[#allocation16 + $0x1c4] ss:$16 sps:$4 sm:$0xff]  }
 0x41f   :  { %7391 = vmatprep.subr.bf16.mxu1 %v8921_v5  ;;  %v8975_v5 = vld [vmem:[#allocation16 + $0x3c4] ss:$16 sps:$4 sm:$0xff]  }
 0x420   :  { %v5482_v19 = vpop.f32.mrf.mxu0  ;;  %5727 = vmatmul.mubr.bf16.vlgmr.msra.gmra.mxu0 %v10023_v13 }
 0x421   :  { %v5483_v24 = vadd.f32 %v5482_v19, %v2539_v16  ;;  %v5523_v25 = vpop.f32.mrf.mxu1  ;;  %5768 = vmatmul.mubr.bf16.vlgmr.msra.gmra.mxu1 %v10025_v15  ;;  %7351 = vmatpush1.bf16.msra.mxu0 %v8916_v17  ;;  %v8978_v16 = vld [vmem:[#allocation16 + $0x1a4] ss:$16 sps:$4 sm:$0xff]  }
 0x422   :  { %7382 = vmatprep.mubr.bf16.mxu0 %v10090_v55  ;;  %7392 = vmatpush1.bf16.msra.mxu1 %v8919_v44  ;;  %v10097_v26 = vpop.f32.mrf.mxu0  ;;  %v8981_v17 = vld [vmem:[#allocation16 + $0x3a4] ss:$16 sps:$4 sm:$0xff]   ;;  %v8976_v44 = vld [vmem:[#allocation16 + $0x1a0] ss:$16 sps:$4 sm:$0xff]  }
 0x423   :  { %v10099_v61 = vadd.f32 %v5523_v25, %v5483_v24  ;;  %7423 = vmatprep.mubr.bf16.mxu1 %v10093_v3  ;;  %v10102_v13 = vpop.f32.mrf.mxu1  ;;  %7352 = vmatprep.subr.bf16.mxu0 %v8924_v54  ;;  %v8979_v54 = vld [vmem:[#allocation16 + $0x3a0] ss:$16 sps:$4 sm:$0xff]   ;;  %v8984_v19 = vld [vmem:[#allocation16 + $0x184] ss:$16 sps:$4 sm:$0xff]  }
 0x424   :  { %v5486_v28 = vpop.f32.mrf.mxu0  ;;  %7393 = vmatprep.subr.bf16.mxu1 %v8927_v21  ;;  %v8987_v21 = vld [vmem:[#allocation16 + $0x384] ss:$16 sps:$4 sm:$0xff]   ;;  %v8982_v24 = vld [vmem:[#allocation16 + $0x180] ss:$16 sps:$4 sm:$0xff]  }
 0x425   :  { %v5527_v15 = vpop.f32.mrf.mxu1  ;;  %7353 = vmatpush1.bf16.msra.mxu0 %v8922_v58  ;;  %v8985_v25 = vld [vmem:[#allocation16 + $0x380] ss:$16 sps:$4 sm:$0xff]   ;;  %v8990_v58 = vld [vmem:[#allocation16 + $0x164] ss:$16 sps:$4 sm:$0xff]  }
 0x426   :  { %7394 = vmatpush1.bf16.msra.mxu1 %v8925_v27  ;;  %v5487_v29 = vpop.f32.mrf.mxu0  ;;  %7354 = vmatprep.subr.bf16.mxu0 %v8930_v60  ;;  %v8993_v27 = vld [vmem:[#allocation16 + $0x364] ss:$16 sps:$4 sm:$0xff]   ;;  %v8988_v60 = vld [vmem:[#allocation16 + $0x160] ss:$16 sps:$4 sm:$0xff]  }
 0x427   :  { %v5528_v20 = vpop.f32.mrf.mxu1  ;;  %7395 = vmatprep.subr.bf16.mxu1 %v8933_v62  ;;  %v8991_v62 = vld [vmem:[#allocation16 + $0x360] ss:$16 sps:$4 sm:$0xff]   ;;  %v8996_v28 = vld [vmem:[#allocation16 + $0x144] ss:$16 sps:$4 sm:$0xff]  }
 0x428   :  { %v8999_v15 = vld [vmem:[#allocation16 + $0x344] ss:$16 sps:$4 sm:$0xff]   ;;  %v8997_v29 = vld [vmem:[#allocation16 + $0x340] ss:$16 sps:$4 sm:$0xff]  }
 0x429   :  { %7355 = vmatpush1.bf16.msra.mxu0 %v8928_v31  ;;  %v8994_v31 = vld [vmem:[#allocation16 + $0x140] ss:$16 sps:$4 sm:$0xff]  }
 0x42a   :  { %7396 = vmatpush1.bf16.msra.mxu1 %v8931_v32  ;;  %7356 = vmatprep.subr.bf16.mxu0 %v8936_v33  ;;  %v9002_v32 = vld [vmem:[#allocation16 + $0x124] ss:$16 sps:$4 sm:$0xff]   ;;  %v9000_v20 = vld [vmem:[#allocation16 + $0x120] ss:$16 sps:$4 sm:$0xff]  }
 0x42b   :  { %7397 = vmatprep.subr.bf16.mxu1 %v8939_v35  ;;  %v9005_v33 = vld [vmem:[#allocation16 + $0x324] ss:$16 sps:$4 sm:$0xff]   ;;  %v9003_v35 = vld [vmem:[#allocation16 + $0x320] ss:$16 sps:$4 sm:$0xff]  }
 0x42d   :  { %7357 = vmatpush1.bf16.msra.mxu0 %v8934_v63  ;;  %v9008_v63 = vld [vmem:[#allocation16 + $0x104] ss:$16 sps:$4 sm:$0xff]  }
 0x42e   :  { %7398 = vmatpush1.bf16.msra.mxu1 %v8937_v2  ;;  %7358 = vmatprep.subr.bf16.mxu0 %v8942_v51  ;;  %v9011_v2 = vld [vmem:[#allocation16 + $0x304] ss:$16 sps:$4 sm:$0xff]   ;;  %v2543_v51 = vrot.slane %v10086_v14, %v1964_v53 }
 0x42f   :  { %7399 = vmatprep.subr.bf16.mxu1 %v8945_v40  ;;  %v9006_v40 = vld [vmem:[#allocation16 + $0x100] ss:$16 sps:$4 sm:$0xff]   ;;  %v9017_v53 = vld [vmem:[#allocation16 + $0x4c4] ss:$16 sps:$4 sm:$0xff]  }
 0x431   :  { %7359 = vmatpush1.bf16.msra.mxu0 %v8940_v48  ;;  %v5776_v48 = vmax.f32 %v10053_v23, 0.0  ;;  %v9077_v23 = vld [vmem:[#allocation16 + $0x6c4] ss:$16 sps:$4 sm:$0xff]  }
 0x432   :  { %7400 = vmatpush1.bf16.msra.mxu1 %v8943_v37  ;;  %7360 = vmatprep.subr.bf16.mxu0 %v8948_v0  ;;  %v9009_v37 = vld [vmem:[#allocation16 + $0x300] ss:$16 sps:$4 sm:$0xff]   ;;  %v9014_v0 = vld [vmem:[#allocation16 + $0x4e4] ss:$16 sps:$4 sm:$0xff]  }
 0x433   :  { %7401 = vmatprep.subr.bf16.mxu1 %v8951_v49  ;;  %v5778_v49 = vmax.f32 %v10077_v36, 0.0 }
 0x435   :  { %7361 = vmatpush1.bf16.msra.mxu0 %v8946_v52  ;;  %v9071_v52 = vld [vmem:[#allocation16 + $0x6e4] ss:$16 sps:$4 sm:$0xff]  }
 0x436   :  { %7402 = vmatpush1.bf16.msra.mxu1 %v8949_v41  ;;  %7362 = vmatprep.subr.bf16.mxu0 %v8954_v56  ;;  %v5485_v41 = vadd.f32 %v10097_v26, %v2543_v51  ;;  %v9012_v56 = vld [vmem:[#allocation16 + $0x4e0] ss:$16 sps:$4 sm:$0xff]  }
 0x437   :  { %7403 = vmatprep.subr.bf16.mxu1 %v8957_v39  ;;  %v10110_v39 = vpack.c.bf16 %v5776_v48, %v5776_v48  ;;  %v9015_v26 = vld [vmem:[#allocation16 + $0x4c0] ss:$16 sps:$4 sm:$0xff]  }
 0x438   :  { %v5526_v36 = vadd.f32 %v10102_v13, %v5485_v41  ;;  %v9018_v13 = vld [vmem:[#allocation16 + $0x4a0] ss:$16 sps:$4 sm:$0xff]   ;;  %v9125_v41 = vld [vmem:[#allocation16 + $0x7c4] ss:$16 sps:$4 sm:$0xff]  }
 0x439   :  { %7363 = vmatpush1.bf16.msra.mxu0 %v8952_v10  ;;  %v9069_v10 = vld [vmem:[#allocation16 + $0x6e0] ss:$16 sps:$4 sm:$0xff]  }
 0x43a   :  { %7404 = vmatpush1.bf16.msra.mxu1 %v8955_v50  ;;  %7364 = vmatprep.subr.bf16.mxu0 %v8960_v42  ;;  %v10112_v50 = vpack.c.bf16 %v5778_v49, %v5778_v49  ;;  %v9033_v51 = vld [vmem:[#allocation16 + $0x400] ss:$16 sps:$4 sm:$0xff]   ;;  %v9041_v49 = vld [vmem:[#allocation16 + $0x5c4] ss:$16 sps:$4 sm:$0xff]  }
 0x43b   :  { %7405 = vmatprep.subr.bf16.mxu1 %v8963_v43  ;;  %v9111_v48 = vld [vmem:[#allocation16 + $0x600] ss:$16 sps:$4 sm:$0xff]  }
 0x43d   :  { %7365 = vmatpush1.bf16.msra.mxu0 %v8958_v45 }
 0x43e   :  { %7406 = vmatpush1.bf16.msra.mxu1 %v8961_v46  ;;  %7366 = vmatprep.subr.bf16.mxu0 %v8966_v47  ;;  %v9020_v46 = vld [vmem:[#allocation16 + $0x4a4] ss:$16 sps:$4 sm:$0xff]   ;;  %v9075_v47 = vld [vmem:[#allocation16 + $0x6c0] ss:$16 sps:$4 sm:$0xff]  }
 0x43f   :  { %7407 = vmatprep.subr.bf16.mxu1 %v8969_v1 }
 0x441   :  { %7367 = vmatpush2.bf16.msra.mxu0 %v8964_v4 }
 0x442   :  { %7408 = vmatpush2.bf16.msra.mxu1 %v8967_v57  ;;  %7368 = vmatprep.subr.bf16.mxu0 %v8972_v59  ;;  %v9083_v57 = vld [vmem:[#allocation16 + $0x6a4] ss:$16 sps:$4 sm:$0xff]  }
 0x443   :  { %7409 = vmatprep.subr.bf16.mxu1 %v8975_v5 }
 0x445   :  { %7369 = vmatpush2.bf16.msra.mxu0 %v8970_v38 }
 0x446   :  { %7410 = vmatpush2.bf16.msra.mxu1 %v8973_v34  ;;  %7370 = vmatprep.subr.bf16.mxu0 %v8978_v16  ;;  %v9023_v16 = vld [vmem:[#allocation16 + $0x484] ss:$16 sps:$4 sm:$0xff]  }
 0x447   :  { %7411 = vmatprep.subr.bf16.mxu1 %v8981_v17  ;;  %v9081_v17 = vld [vmem:[#allocation16 + $0x6a0] ss:$16 sps:$4 sm:$0xff]  }
 0x449   :  { %7371 = vmatpush2.bf16.msra.mxu0 %v8976_v44 }
 0x44a   :  { %7412 = vmatpush2.bf16.msra.mxu1 %v8979_v54  ;;  %7372 = vmatprep.subr.bf16.mxu0 %v8984_v19  ;;  %v9089_v19 = vld [vmem:[#allocation16 + $0x684] ss:$16 sps:$4 sm:$0xff]  }
 0x44b   :  { %7413 = vmatprep.subr.bf16.mxu1 %v8987_v21 }
 0x44d   :  { %7373 = vmatpush2.bf16.msra.mxu0 %v8982_v24  ;;  %v9021_v24 = vld [vmem:[#allocation16 + $0x480] ss:$16 sps:$4 sm:$0xff]  }
 0x44e   :  { %7414 = vmatpush2.bf16.msra.mxu1 %v8985_v25  ;;  %7374 = vmatprep.subr.bf16.mxu0 %v8990_v58  ;;  %v9026_v25 = vld [vmem:[#allocation16 + $0x464] ss:$16 sps:$4 sm:$0xff]   ;;  %v9087_v58 = vld [vmem:[#allocation16 + $0x680] ss:$16 sps:$4 sm:$0xff]  }
 0x44f   :  { %7415 = vmatprep.subr.bf16.mxu1 %v8993_v27  ;;  %v9095_v27 = vld [vmem:[#allocation16 + $0x664] ss:$16 sps:$4 sm:$0xff]  }
 0x451   :  { %7375 = vmatpush2.bf16.msra.mxu0 %v8988_v60  ;;  %v9024_v60 = vld [vmem:[#allocation16 + $0x460] ss:$16 sps:$4 sm:$0xff]  }
 0x452   :  { %7416 = vmatpush2.bf16.msra.mxu1 %v8991_v62  ;;  %7376 = vmatprep.subr.bf16.mxu0 %v8996_v28  ;;  %v9029_v62 = vld [vmem:[#allocation16 + $0x444] ss:$16 sps:$4 sm:$0xff]   ;;  %v9093_v28 = vld [vmem:[#allocation16 + $0x660] ss:$16 sps:$4 sm:$0xff]  }
 0x453   :  { %7417 = vmatprep.subr.bf16.mxu1 %v8999_v15  ;;  %v9101_v15 = vld [vmem:[#allocation16 + $0x644] ss:$16 sps:$4 sm:$0xff]  }
 0x455   :  { %7377 = vmatpush2.bf16.msra.mxu0 %v8994_v31  ;;  %v9027_v31 = vld [vmem:[#allocation16 + $0x440] ss:$16 sps:$4 sm:$0xff]  }
 0x456   :  { %7418 = vmatpush2.bf16.msra.mxu1 %v8997_v29  ;;  %7378 = vmatprep.subr.bf16.mxu0 %v9002_v32  ;;  %v9032_v29 = vld [vmem:[#allocation16 + $0x424] ss:$16 sps:$4 sm:$0xff]   ;;  %v9099_v32 = vld [vmem:[#allocation16 + $0x640] ss:$16 sps:$4 sm:$0xff]  }
 0x457   :  { %7419 = vmatprep.subr.bf16.mxu1 %v9005_v33  ;;  %v9107_v33 = vld [vmem:[#allocation16 + $0x624] ss:$16 sps:$4 sm:$0xff]  }
 0x459   :  { %7379 = vmatpush2.bf16.msra.mxu0 %v9000_v20  ;;  %v9030_v20 = vld [vmem:[#allocation16 + $0x420] ss:$16 sps:$4 sm:$0xff]  }
 0x45a   :  { %7420 = vmatpush2.bf16.msra.mxu1 %v9003_v35  ;;  %7380 = vmatprep.subr.bf16.mxu0 %v9008_v63  ;;  %v9035_v35 = vld [vmem:[#allocation16 + $0x404] ss:$16 sps:$4 sm:$0xff]   ;;  %v9105_v63 = vld [vmem:[#allocation16 + $0x620] ss:$16 sps:$4 sm:$0xff]  }
 0x45b   :  { %7421 = vmatprep.subr.bf16.mxu1 %v9011_v2  ;;  %v9113_v2 = vld [vmem:[#allocation16 + $0x604] ss:$16 sps:$4 sm:$0xff]  }
 0x45d   :  { %7381 = vmatpush2.bf16.msra.mxu0 %v9006_v40  ;;  %v9038_v40 = vld [vmem:[#allocation16 + $0x5e4] ss:$16 sps:$4 sm:$0xff]  }
 0x45e   :  { %7422 = vmatpush2.bf16.msra.mxu1 %v9009_v37  ;;  %7432 = vmatprep.subr.bf16.mxu0 %v9014_v0  ;;  %v9119_v37 = vld [vmem:[#allocation16 + $0x7e4] ss:$16 sps:$4 sm:$0xff]   ;;  %v9036_v0 = vld [vmem:[#allocation16 + $0x5e0] ss:$16 sps:$4 sm:$0xff]  }
 0x45f   :  { %7473 = vmatprep.subr.bf16.mxu1 %v9071_v52  ;;  %v9117_v52 = vld [vmem:[#allocation16 + $0x7e0] ss:$16 sps:$4 sm:$0xff]  }
 0x460   :  { %v10114_v42 = vpop.f32.mrf.mxu0  ;;  %7383 = vmatmul.mubr.bf16.vlgmr.msra.gmra.mxu0 %v10110_v39 }
 0x461   :  { %v10118_v43 = vpop.f32.mrf.mxu1  ;;  %7424 = vmatmul.mubr.bf16.vlgmr.msra.gmra.mxu1 %v10112_v50  ;;  %7433 = vmatpush1.bf16.msra.mxu0 %v9012_v56  ;;  %v9039_v56 = vld [vmem:[#allocation16 + $0x5c0] ss:$16 sps:$4 sm:$0xff]  }
 0x462   :  { %v5566_v45 = vpop.f32.mrf.mxu0  ;;  %7434 = vmatprep.subr.bf16.mxu0 %v9017_v53  ;;  %7474 = vmatpush1.bf16.msra.mxu1 %v9069_v10  ;;  %v9044_v53 = vld [vmem:[#allocation16 + $0x5a4] ss:$16 sps:$4 sm:$0xff]   ;;  %v9123_v10 = vld [vmem:[#allocation16 + $0x7c0] ss:$16 sps:$4 sm:$0xff]  }
 0x463   :  { %v5567_v1 = vadd.f32 %v5566_v45, %v5526_v36  ;;  %v5607_v4 = vpop.f32.mrf.mxu1  ;;  %7475 = vmatprep.subr.bf16.mxu1 %v9077_v23  ;;  %v9131_v23 = vld [vmem:[#allocation16 + $0x7a4] ss:$16 sps:$4 sm:$0xff]   ;;  %v9042_v36 = vld [vmem:[#allocation16 + $0x5a0] ss:$16 sps:$4 sm:$0xff]  }
 0x464   :  { %v5568_v59 = vpop.f32.mrf.mxu0  ;;  %v9129_v45 = vld [vmem:[#allocation16 + $0x7a0] ss:$16 sps:$4 sm:$0xff]  }
 0x465   :  { %v5608_v5 = vadd.f32 %v5607_v4, %v5567_v1  ;;  %v5609_v38 = vpop.f32.mrf.mxu1  ;;  %7435 = vmatpush1.bf16.msra.mxu0 %v9015_v26  ;;  %v9047_v26 = vld [vmem:[#allocation16 + $0x584] ss:$16 sps:$4 sm:$0xff]   ;;  %v9135_v4 = vld [vmem:[#allocation16 + $0x780] ss:$16 sps:$4 sm:$0xff]  }
 0x466   :  { %v5569_v34 = vpop.f32.mrf.mxu0  ;;  %7436 = vmatprep.subr.bf16.mxu0 %v9020_v46  ;;  %7476 = vmatpush1.bf16.msra.mxu1 %v9075_v47  ;;  %v9137_v46 = vld [vmem:[#allocation16 + $0x784] ss:$16 sps:$4 sm:$0xff]   ;;  %v9045_v47 = vld [vmem:[#allocation16 + $0x580] ss:$16 sps:$4 sm:$0xff]  }
 0x467   :  { %v5781_v44 = vmax.f32 %v5608_v5, 0.0  ;;  %v5610_v54 = vpop.f32.mrf.mxu1  ;;  %7477 = vmatprep.subr.bf16.mxu1 %v9083_v57  ;;  %v9050_v1 = vld [vmem:[#allocation16 + $0x564] ss:$16 sps:$4 sm:$0xff]   ;;  %v9048_v59 = vld [vmem:[#allocation16 + $0x560] ss:$16 sps:$4 sm:$0xff]  }
 0x468   :  { %v9143_v57 = vld [vmem:[#allocation16 + $0x764] ss:$16 sps:$4 sm:$0xff]   ;;  %v9141_v38 = vld [vmem:[#allocation16 + $0x760] ss:$16 sps:$4 sm:$0xff]  }
 0x469   :  { %v10121_v21 = vpack.c.bf16 %v5781_v44, %v5781_v44  ;;  %7437 = vmatpush1.bf16.msra.mxu0 %v9018_v13  ;;  %v9053_v5 = vld [vmem:[#allocation16 + $0x544] ss:$16 sps:$4 sm:$0xff]   ;;  %v9051_v34 = vld [vmem:[#allocation16 + $0x540] ss:$16 sps:$4 sm:$0xff]  }
 0x46a   :  { %7438 = vmatprep.subr.bf16.mxu0 %v9023_v16  ;;  %7478 = vmatpush1.bf16.msra.mxu1 %v9081_v17  ;;  %v9149_v13 = vld [vmem:[#allocation16 + $0x744] ss:$16 sps:$4 sm:$0xff]   ;;  %v5565_v16 = vadd.f32 %v10114_v42, %v10099_v61  ;;  %v9147_v44 = vld [vmem:[#allocation16 + $0x740] ss:$16 sps:$4 sm:$0xff]   ;;  %v9062_v61 = vld [vmem:[#allocation16 + $0xec] ss:$16 sps:$4 sm:$0xff]  }
 0x46b   :  { %7464 = vmatprep.mubr.bf16.mxu0 %v10121_v21  ;;  %7479 = vmatprep.subr.bf16.mxu1 %v9089_v19  ;;  %v9056_v17 = vld [vmem:[#allocation16 + $0x524] ss:$16 sps:$4 sm:$0xff]   ;;  %v9054_v19 = vld [vmem:[#allocation16 + $0x520] ss:$16 sps:$4 sm:$0xff]  }
 0x46c   :  { %v9155_v54 = vld [vmem:[#allocation16 + $0x724] ss:$16 sps:$4 sm:$0xff]   ;;  %v9159_v42 = vld [vmem:[#allocation16 + $0x700] ss:$16 sps:$4 sm:$0xff]  }
 0x46d   :  { %7439 = vmatpush1.bf16.msra.mxu0 %v9021_v24  ;;  %v5606_v24 = vadd.f32 %v10118_v43, %v5565_v16  ;;  %v9065_v43 = vld [vmem:[#allocation16 + $0xcc] ss:$16 sps:$4 sm:$0xff]  }
 0x46e   :  { %7440 = vmatprep.subr.bf16.mxu0 %v9026_v25  ;;  %7480 = vmatpush1.bf16.msra.mxu1 %v9087_v58  ;;  %v9059_v25 = vld [vmem:[#allocation16 + $0x504] ss:$16 sps:$4 sm:$0xff]   ;;  %v9153_v58 = vld [vmem:[#allocation16 + $0x720] ss:$16 sps:$4 sm:$0xff]   ;;  %v9140_v16 = vld [vmem:[#allocation16 + $0x12c] ss:$16 sps:$4 sm:$0xff]  }
 0x46f   :  { %7481 = vmatprep.subr.bf16.mxu1 %v9095_v27  ;;  %v9161_v27 = vld [vmem:[#allocation16 + $0x704] ss:$16 sps:$4 sm:$0xff]  }
 0x471   :  { %7441 = vmatpush1.bf16.msra.mxu0 %v9024_v60  ;;  %v9057_v60 = vld [vmem:[#allocation16 + $0x500] ss:$16 sps:$4 sm:$0xff]  }
 0x472   :  { %7442 = vmatprep.subr.bf16.mxu0 %v9029_v62  ;;  %7482 = vmatpush1.bf16.msra.mxu1 %v9093_v28  ;;  %v5780_v62 = vmax.f32 %v5606_v24, 0.0  ;;  %v9167_v28 = vld [vmem:[#allocation16 + $0x2ec] ss:$16 sps:$4 sm:$0xff]   ;;  %v9144_v24 = vld [vmem:[#allocation16 + $0x108] ss:$16 sps:$4 sm:$0xff]  }
 0x473   :  { %7483 = vmatprep.subr.bf16.mxu1 %v9101_v15  ;;  %v9060_v15 = vld [vmem:[#allocation16 + $0xe8] ss:$16 sps:$4 sm:$0xff]  }
 0x475   :  { %7443 = vmatpush1.bf16.msra.mxu0 %v9027_v31  ;;  %v10127_v31 = vpack.c.bf16 %v5780_v62, %v5780_v62  ;;  %v9158_v62 = vld [vmem:[#allocation16 + $0x4cc] ss:$16 sps:$4 sm:$0xff]  }
 0x476   :  { %7444 = vmatprep.subr.bf16.mxu0 %v9032_v29  ;;  %7484 = vmatpush1.bf16.msra.mxu1 %v9099_v32 }
 0x477   :  { %7485 = vmatprep.subr.bf16.mxu1 %v9107_v33  ;;  %v9063_v33 = vld [vmem:[#allocation16 + $0xc8] ss:$16 sps:$4 sm:$0xff]  }
 0x479   :  { %7445 = vmatpush1.bf16.msra.mxu0 %v9030_v20 }
 0x47a   :  { %7446 = vmatprep.subr.bf16.mxu0 %v9035_v35  ;;  %7486 = vmatpush1.bf16.msra.mxu1 %v9105_v63  ;;  %v9068_v35 = vld [vmem:[#allocation16 + $0xac] ss:$16 sps:$4 sm:$0xff]  }
 0x47b   :  { %7487 = vmatprep.subr.bf16.mxu1 %v9113_v2 }
 0x47d   :  { %7447 = vmatpush1.bf16.msra.mxu0 %v9033_v51 }
 0x47e   :  { %7448 = vmatprep.subr.bf16.mxu0 %v9038_v40  ;;  %7488 = vmatpush1.bf16.msra.mxu1 %v9111_v48  ;;  %v9066_v40 = vld [vmem:[#allocation16 + $0xa8] ss:$16 sps:$4 sm:$0xff]  }
 0x47f   :  { %7489 = vmatprep.subr.bf16.mxu1 %v9119_v37  ;;  %v9074_v37 = vld [vmem:[#allocation16 + $0x8c] ss:$16 sps:$4 sm:$0xff]  }
 0x481   :  { %7449 = vmatpush2.bf16.msra.mxu0 %v9036_v0 }
 0x482   :  { %7450 = vmatprep.subr.bf16.mxu0 %v9041_v49  ;;  %7490 = vmatpush2.bf16.msra.mxu1 %v9117_v52  ;;  %v9072_v49 = vld [vmem:[#allocation16 + $0x88] ss:$16 sps:$4 sm:$0xff]   ;;  %v9080_v52 = vld [vmem:[#allocation16 + $0x6c] ss:$16 sps:$4 sm:$0xff]  }
 0x483   :  { %7491 = vmatprep.subr.bf16.mxu1 %v9125_v41  ;;  %v9086_v41 = vld [vmem:[#allocation16 + $0x4c] ss:$16 sps:$4 sm:$0xff]  }
 0x485   :  { %7451 = vmatpush2.bf16.msra.mxu0 %v9039_v56  ;;  %v9084_v56 = vld [vmem:[#allocation16 + $0x48] ss:$16 sps:$4 sm:$0xff]  }
 0x486   :  { %7452 = vmatprep.subr.bf16.mxu0 %v9044_v53  ;;  %7492 = vmatpush2.bf16.msra.mxu1 %v9123_v10  ;;  %v9092_v53 = vld [vmem:[#allocation16 + $0x2c] ss:$16 sps:$4 sm:$0xff]   ;;  %v9090_v10 = vld [vmem:[#allocation16 + $0x28] ss:$16 sps:$4 sm:$0xff]  }
 0x487   :  { %7493 = vmatprep.subr.bf16.mxu1 %v9131_v23  ;;  %v9098_v23 = vld [vmem:[#allocation16 + $0xc] ss:$16 sps:$4 sm:$0xff]  }
 0x489   :  { %7453 = vmatpush2.bf16.msra.mxu0 %v9042_v36  ;;  %v9096_v36 = vld [vmem:[#allocation16 + $0x8] ss:$16 sps:$4 sm:$0xff]  }
 0x48a   :  { %7454 = vmatprep.subr.bf16.mxu0 %v9047_v26  ;;  %7494 = vmatpush2.bf16.msra.mxu1 %v9129_v45  ;;  %v9104_v26 = vld [vmem:[#allocation16 + $0x1ec] ss:$16 sps:$4 sm:$0xff]   ;;  %v9102_v45 = vld [vmem:[#allocation16 + $0x1e8] ss:$16 sps:$4 sm:$0xff]  }
 0x48b   :  { %7495 = vmatprep.subr.bf16.mxu1 %v9137_v46  ;;  %v9110_v46 = vld [vmem:[#allocation16 + $0x1cc] ss:$16 sps:$4 sm:$0xff]  }
 0x48d   :  { %7455 = vmatpush2.bf16.msra.mxu0 %v9045_v47  ;;  %v9108_v47 = vld [vmem:[#allocation16 + $0x1c8] ss:$16 sps:$4 sm:$0xff]  }
 0x48e   :  { %7456 = vmatprep.subr.bf16.mxu0 %v9050_v1  ;;  %7496 = vmatpush2.bf16.msra.mxu1 %v9135_v4  ;;  %v9116_v1 = vld [vmem:[#allocation16 + $0x1ac] ss:$16 sps:$4 sm:$0xff]   ;;  %v9114_v4 = vld [vmem:[#allocation16 + $0x1a8] ss:$16 sps:$4 sm:$0xff]  }
 0x48f   :  { %7497 = vmatprep.subr.bf16.mxu1 %v9143_v57  ;;  %v9122_v57 = vld [vmem:[#allocation16 + $0x18c] ss:$16 sps:$4 sm:$0xff]  }
 0x491   :  { %7457 = vmatpush2.bf16.msra.mxu0 %v9048_v59  ;;  %v9120_v59 = vld [vmem:[#allocation16 + $0x188] ss:$16 sps:$4 sm:$0xff]  }
 0x492   :  { %7458 = vmatprep.subr.bf16.mxu0 %v9053_v5  ;;  %7498 = vmatpush2.bf16.msra.mxu1 %v9141_v38  ;;  %v9128_v5 = vld [vmem:[#allocation16 + $0x16c] ss:$16 sps:$4 sm:$0xff]   ;;  %v9126_v38 = vld [vmem:[#allocation16 + $0x168] ss:$16 sps:$4 sm:$0xff]  }
 0x493   :  { %7499 = vmatprep.subr.bf16.mxu1 %v9149_v13  ;;  %v9134_v13 = vld [vmem:[#allocation16 + $0x14c] ss:$16 sps:$4 sm:$0xff]  }
 0x495   :  { %7459 = vmatpush2.bf16.msra.mxu0 %v9051_v34  ;;  %v9132_v34 = vld [vmem:[#allocation16 + $0x148] ss:$16 sps:$4 sm:$0xff]  }
 0x496   :  { %7460 = vmatprep.subr.bf16.mxu0 %v9056_v17  ;;  %7500 = vmatpush2.bf16.msra.mxu1 %v9147_v44  ;;  %v9138_v17 = vld [vmem:[#allocation16 + $0x128] ss:$16 sps:$4 sm:$0xff]   ;;  %v9146_v44 = vld [vmem:[#allocation16 + $0x10c] ss:$16 sps:$4 sm:$0xff]  }
 0x497   :  { %7501 = vmatprep.subr.bf16.mxu1 %v9155_v54  ;;  %v2547_v54 = vrot.slane %v10086_v14, %v10013_v22 }
 0x499   :  { %7461 = vmatpush2.bf16.msra.mxu0 %v9054_v19  ;;  %v2551_v19 = vrot.slane %v10086_v14, %v1972_v30 }
 0x49a   :  { %7462 = vmatprep.subr.bf16.mxu0 %v9059_v25  ;;  %7502 = vmatpush2.bf16.msra.mxu1 %v9153_v58  ;;  %v9152_v25 = vld [vmem:[#allocation16 + $0x4ec] ss:$16 sps:$4 sm:$0xff]  }
 0x49b   :  { %7503 = vmatprep.subr.bf16.mxu1 %v9161_v27 }
 0x49d   :  { %7463 = vmatpush2.bf16.msra.mxu0 %v9057_v60  ;;  %v9150_v60 = vld [vmem:[#allocation16 + $0x4e8] ss:$16 sps:$4 sm:$0xff]  }
 0x49e   :  { %7514 = vmatprep.subr.bf16.mxu0 %v9062_v61  ;;  %7504 = vmatpush2.bf16.msra.mxu1 %v9159_v42 }
 0x49f   :  { %7555 = vmatprep.subr.bf16.mxu1 %v9167_v28  ;;  %v9156_v28 = vld [vmem:[#allocation16 + $0x4c8] ss:$16 sps:$4 sm:$0xff]  }
 0x4a0   :  { %v10129_v29 = vpop.f32.mrf.mxu0  ;;  %7465 = vmatmul.mubr.bf16.vlgmr.msra.gmra.mxu0 %v10127_v31 }
 0x4a1   :  { %v10132_v32 = vpop.f32.mrf.mxu1  ;;  %7515 = vmatpush1.bf16.msra.mxu0 %v9060_v15  ;;  %7546 = vmatprep.mubr.bf16.mxu0 %v10090_v55  ;;  %v9078_v55 = vld [vmem:[#allocation16 + $0x68] ss:$16 sps:$4 sm:$0xff]   ;;  %v5647_v58 = vadd.f32 %v10129_v29, %v2547_v54 }
 0x4a2   :  { %v10135_v20 = vpop.f32.mrf.mxu0  ;;  %7516 = vmatprep.subr.bf16.mxu0 %v9065_v43  ;;  %v9164_v43 = vld [vmem:[#allocation16 + $0x4ac] ss:$16 sps:$4 sm:$0xff]   ;;  %v9204_v54 = vld [vmem:[#allocation16 + $0x5c8] ss:$16 sps:$4 sm:$0xff]  }
 0x4a3   :  { %v10137_v63 = vpop.f32.mrf.mxu1  ;;  %v5649_v27 = vadd.f32 %v10135_v20, %v2551_v19  ;;  %v5688_v61 = vadd.f32 %v10132_v32, %v5647_v58  ;;  %v9209_v19 = vld [vmem:[#allocation16 + $0x20c] ss:$16 sps:$4 sm:$0xff]   ;;  %v9210_v58 = vld [vmem:[#allocation16 + $0x5a8] ss:$16 sps:$4 sm:$0xff]  }
 0x4a4   :  { %v5650_v2 = vpop.f32.mrf.mxu0 }
 0x4a5   :  { %v5691_v51 = vpop.f32.mrf.mxu1  ;;  %7517 = vmatpush1.bf16.msra.mxu0 %v9063_v33  ;;  %v5690_v7 = vadd.f32 %v10137_v63, %v5649_v27  ;;  %v9170_v63 = vld [vmem:[#allocation16 + $0x48c] ss:$16 sps:$4 sm:$0xff]  }
 0x4a6   :  { %v5651_v48 = vpop.f32.mrf.mxu0  ;;  %7518 = vmatprep.subr.bf16.mxu0 %v9068_v35  ;;  %v9162_v51 = vld [vmem:[#allocation16 + $0x4a8] ss:$16 sps:$4 sm:$0xff]   ;;  %v9215_v27 = vld [vmem:[#allocation16 + $0x3ec] ss:$16 sps:$4 sm:$0xff]  }
 0x4a7   :  { %v5692_v0 = vpop.f32.mrf.mxu1 }
 0x4a9   :  { %7519 = vmatpush1.bf16.msra.mxu0 %v9066_v40 }
 0x4aa   :  { %7520 = vmatprep.subr.bf16.mxu0 %v9074_v37 }
 0x4ad   :  { %7521 = vmatpush1.bf16.msra.mxu0 %v9072_v49 }
 0x4ae   :  { %7522 = vmatprep.subr.bf16.mxu0 %v9080_v52  ;;  %v9168_v52 = vld [vmem:[#allocation16 + $0x488] ss:$16 sps:$4 sm:$0xff]  }
 0x4b1   :  { %7523 = vmatpush1.bf16.msra.mxu0 %v9078_v55  ;;  %v9173_v55 = vld [vmem:[#allocation16 + $0x2cc] ss:$16 sps:$4 sm:$0xff]  }
 0x4b2   :  { %7524 = vmatprep.subr.bf16.mxu0 %v9086_v41  ;;  %v9176_v41 = vld [vmem:[#allocation16 + $0x46c] ss:$16 sps:$4 sm:$0xff]  }
 0x4b5   :  { %7525 = vmatpush1.bf16.msra.mxu0 %v9084_v56  ;;  %v9171_v56 = vld [vmem:[#allocation16 + $0x2c8] ss:$16 sps:$4 sm:$0xff]  }
 0x4b6   :  { %7526 = vmatprep.subr.bf16.mxu0 %v9092_v53  ;;  %v9174_v53 = vld [vmem:[#allocation16 + $0x468] ss:$16 sps:$4 sm:$0xff]  }
 0x4b9   :  { %7527 = vmatpush1.bf16.msra.mxu0 %v9090_v10  ;;  %v9179_v10 = vld [vmem:[#allocation16 + $0x2ac] ss:$16 sps:$4 sm:$0xff]  }
 0x4ba   :  { %7528 = vmatprep.subr.bf16.mxu0 %v9098_v23  ;;  %v9182_v23 = vld [vmem:[#allocation16 + $0x44c] ss:$16 sps:$4 sm:$0xff]  }
 0x4bd   :  { %7529 = vmatpush1.bf16.msra.mxu0 %v9096_v36  ;;  %v9177_v36 = vld [vmem:[#allocation16 + $0x2a8] ss:$16 sps:$4 sm:$0xff]  }
 0x4be   :  { %7530 = vmatprep.subr.bf16.mxu0 %v9104_v26  ;;  %v9180_v26 = vld [vmem:[#allocation16 + $0x448] ss:$16 sps:$4 sm:$0xff]  }
 0x4c1   :  { %7531 = vmatpush2.bf16.msra.mxu0 %v9102_v45  ;;  %v9185_v45 = vld [vmem:[#allocation16 + $0x28c] ss:$16 sps:$4 sm:$0xff]  }
 0x4c2   :  { %7532 = vmatprep.subr.bf16.mxu0 %v9110_v46  ;;  %v9188_v46 = vld [vmem:[#allocation16 + $0x42c] ss:$16 sps:$4 sm:$0xff]  }
 0x4c5   :  { %7533 = vmatpush2.bf16.msra.mxu0 %v9108_v47  ;;  %v9183_v47 = vld [vmem:[#allocation16 + $0x288] ss:$16 sps:$4 sm:$0xff]  }
 0x4c6   :  { %7534 = vmatprep.subr.bf16.mxu0 %v9116_v1  ;;  %v9191_v1 = vld [vmem:[#allocation16 + $0x26c] ss:$16 sps:$4 sm:$0xff]  }
 0x4c9   :  { %7535 = vmatpush2.bf16.msra.mxu0 %v9114_v4  ;;  %v9194_v4 = vld [vmem:[#allocation16 + $0x40c] ss:$16 sps:$4 sm:$0xff]  }
 0x4ca   :  { %7536 = vmatprep.subr.bf16.mxu0 %v9122_v57  ;;  %v9189_v57 = vld [vmem:[#allocation16 + $0x268] ss:$16 sps:$4 sm:$0xff]  }
 0x4cd   :  { %7537 = vmatpush2.bf16.msra.mxu0 %v9120_v59  ;;  %v9192_v59 = vld [vmem:[#allocation16 + $0x408] ss:$16 sps:$4 sm:$0xff]  }
 0x4ce   :  { %7538 = vmatprep.subr.bf16.mxu0 %v9128_v5  ;;  %v9197_v5 = vld [vmem:[#allocation16 + $0x24c] ss:$16 sps:$4 sm:$0xff]  }
 0x4d1   :  { %7539 = vmatpush2.bf16.msra.mxu0 %v9126_v38  ;;  %v9200_v38 = vld [vmem:[#allocation16 + $0x5ec] ss:$16 sps:$4 sm:$0xff]  }
 0x4d2   :  { %7540 = vmatprep.subr.bf16.mxu0 %v9134_v13  ;;  %v9195_v13 = vld [vmem:[#allocation16 + $0x248] ss:$16 sps:$4 sm:$0xff]  }
 0x4d5   :  { %7541 = vmatpush2.bf16.msra.mxu0 %v9132_v34  ;;  %v9198_v34 = vld [vmem:[#allocation16 + $0x5e8] ss:$16 sps:$4 sm:$0xff]  }
 0x4d6   :  { %7542 = vmatprep.subr.bf16.mxu0 %v9140_v16  ;;  %v9203_v16 = vld [vmem:[#allocation16 + $0x22c] ss:$16 sps:$4 sm:$0xff]  }
 0x4d9   :  { %7543 = vmatpush2.bf16.msra.mxu0 %v9138_v17  ;;  %v9206_v17 = vld [vmem:[#allocation16 + $0x5cc] ss:$16 sps:$4 sm:$0xff]  }
 0x4da   :  { %7544 = vmatprep.subr.bf16.mxu0 %v9146_v44  ;;  %v9201_v44 = vld [vmem:[#allocation16 + $0x228] ss:$16 sps:$4 sm:$0xff]  }
 0x4dd   :  { %7545 = vmatpush2.bf16.msra.mxu0 %v9144_v24  ;;  %v9212_v24 = vld [vmem:[#allocation16 + $0x5ac] ss:$16 sps:$4 sm:$0xff]  }
 0x4de   :  { %7596 = vmatprep.subr.bf16.mxu0 %v9152_v25  ;;  %v9207_v25 = vld [vmem:[#allocation16 + $0x208] ss:$16 sps:$4 sm:$0xff]  }
 0x4e0   :  { %v5728_v42 = vpop.f32.mrf.mxu0  ;;  %7547 = vmatmul.mubr.bf16.vlgmr.msra.gmra.mxu0 %v10110_v39 }
 0x4e1   :  { %v5729_v30 = vadd.f32 %v5728_v42, %v5688_v61  ;;  %v5769_v14 = vpop.f32.mrf.mxu1  ;;  %7597 = vmatpush1.bf16.msra.mxu0 %v9150_v60  ;;  %7628 = vmatprep.mubr.bf16.mxu0 %v10121_v21  ;;  %v9165_v21 = vld [vmem:[#allocation16 + $0x2e8] ss:$16 sps:$4 sm:$0xff]   ;;  %v9218_v60 = vld [vmem:[#allocation16 + $0x58c] ss:$16 sps:$4 sm:$0xff]  }
 0x4e2   :  { %v5730_v15 = vpop.f32.mrf.mxu0  ;;  %7598 = vmatprep.subr.bf16.mxu0 %v9158_v62  ;;  %v9213_v62 = vld [vmem:[#allocation16 + $0x3e8] ss:$16 sps:$4 sm:$0xff]   ;;  %v9221_v42 = vld [vmem:[#allocation16 + $0x3cc] ss:$16 sps:$4 sm:$0xff]  }
 0x4e3   :  { %v5770_v29 = vadd.f32 %v5769_v14, %v5729_v30  ;;  %v5731_v33 = vadd.f32 %v5730_v15, %v5690_v7  ;;  %v5771_v20 = vpop.f32.mrf.mxu1  ;;  %v9216_v61 = vld [vmem:[#allocation16 + $0x588] ss:$16 sps:$4 sm:$0xff]   ;;  %v9224_v7 = vld [vmem:[#allocation16 + $0x56c] ss:$16 sps:$4 sm:$0xff]  }
 0x4e4   :  { %v5732_v35 = vpop.f32.mrf.mxu0  ;;  %v9219_v30 = vld [vmem:[#allocation16 + $0x3c8] ss:$16 sps:$4 sm:$0xff]   ;;  %v9230_v15 = vld [vmem:[#allocation16 + $0x54c] ss:$16 sps:$4 sm:$0xff]  }
 0x4e5   :  { %v5772_v2 = vadd.f32 %v5771_v20, %v5731_v33  ;;  %v5773_v32 = vpop.f32.mrf.mxu1  ;;  %7599 = vmatpush1.bf16.msra.mxu0 %v9156_v28  ;;  %v5782_v39 = vmax.f32 %v5770_v29, 0.0  ;;  %v9222_v14 = vld [vmem:[#allocation16 + $0x568] ss:$16 sps:$4 sm:$0xff]   ;;  %v9227_v28 = vld [vmem:[#allocation16 + $0x3ac] ss:$16 sps:$4 sm:$0xff]  }
 0x4e6   :  { %v5733_v40 = vpop.f32.mrf.mxu0  ;;  %7600 = vmatprep.subr.bf16.mxu0 %v9164_v43  ;;  %v9225_v43 = vld [vmem:[#allocation16 + $0x3a8] ss:$16 sps:$4 sm:$0xff]   ;;  %v9233_v33 = vld [vmem:[#allocation16 + $0x38c] ss:$16 sps:$4 sm:$0xff]  }
 0x4e7   :  { %v5783_v48 = vmax.f32 %v5772_v2, 0.0  ;;  %v5774_v37 = vpop.f32.mrf.mxu1  ;;  %v10152_v49 = vpack.c.bf16 %v5782_v39, %v5782_v39  ;;  %v9228_v29 = vld [vmem:[#allocation16 + $0x548] ss:$16 sps:$4 sm:$0xff]   ;;  %v9236_v20 = vld [vmem:[#allocation16 + $0x52c] ss:$16 sps:$4 sm:$0xff]  }
 0x4e8   :  { %v9231_v35 = vld [vmem:[#allocation16 + $0x388] ss:$16 sps:$4 sm:$0xff]   ;;  %v9239_v32 = vld [vmem:[#allocation16 + $0x36c] ss:$16 sps:$4 sm:$0xff]  }
 0x4e9   :  { %v10150_v0 = vpack.c.bf16 %v5783_v48, %v5783_v48  ;;  %7601 = vmatpush1.bf16.msra.mxu0 %v9162_v51  ;;  %v9234_v2 = vld [vmem:[#allocation16 + $0x528] ss:$16 sps:$4 sm:$0xff]   ;;  %v9242_v51 = vld [vmem:[#allocation16 + $0x50c] ss:$16 sps:$4 sm:$0xff]   ;;  %v10157_v48 = vld [vmem:[#allocation17] sm:$0xf] }
 0x4ea   :  { %7602 = vmatprep.subr.bf16.mxu0 %v9170_v63  ;;  %v9237_v39 = vld [vmem:[#allocation16 + $0x368] ss:$16 sps:$4 sm:$0xff]   ;;  %v9245_v63 = vld [vmem:[#allocation16 + $0x34c] ss:$16 sps:$4 sm:$0xff]  }
 0x4eb   :  { %7505 = vmatprep.mubr.bf16.mxu1 %v10150_v0  ;;  %v9240_v40 = vld [vmem:[#allocation16 + $0x508] ss:$16 sps:$4 sm:$0xff]  }
 0x4ec   :  { %7506 = vmatmul.mubr.bf16.vlgmr.msra.gmra.mxu1 %v10152_v49  ;;  %v9243_v37 = vld [vmem:[#allocation16 + $0x348] ss:$16 sps:$4 sm:$0xff]  }
 0x4ed   :  { %7556 = vmatpush1.bf16.msra.mxu1 %v9165_v21  ;;  %7587 = vmatprep.mubr.bf16.mxu1 %v10093_v3  ;;  %v9186_v3 = vld [vmem:[#allocation16 + $0x428] ss:$16 sps:$4 sm:$0xff]   ;;  %v6053_v21 = vrot.slane %v10157_v48, %v9948_v8 }
 0x4ee   :  { %7603 = vmatpush1.bf16.msra.mxu0 %v9168_v52  ;;  %7557 = vmatprep.subr.bf16.mxu1 %v9173_v55  ;;  %v9248_v52 = vld [vmem:[#allocation16 + $0x32c] ss:$16 sps:$4 sm:$0xff]   ;;  %v6057_v55 = vrot.slane %v10157_v48, %v9956_v11  ;;  %v9249_v11 = vld [vmem:[#allocation16 + $0x308] ss:$16 sps:$4 sm:$0xff]  }
 0x4ef   :  { %7604 = vmatprep.subr.bf16.mxu0 %v9176_v41 }
 0x4f1   :  { %7558 = vmatpush1.bf16.msra.mxu1 %v9171_v56 }
 0x4f2   :  { %7605 = vmatpush1.bf16.msra.mxu0 %v9174_v53  ;;  %7559 = vmatprep.subr.bf16.mxu1 %v9179_v10  ;;  %v9246_v10 = vld [vmem:[#allocation16 + $0x328] ss:$16 sps:$4 sm:$0xff]  }
 0x4f3   :  { %7606 = vmatprep.subr.bf16.mxu0 %v9182_v23 }
 0x4f5   :  { %7560 = vmatpush1.bf16.msra.mxu1 %v9177_v36  ;;  %v9251_v36 = vld [vmem:[#allocation16 + $0x30c] ss:$16 sps:$4 sm:$0xff]  }
 0x4f6   :  { %7607 = vmatpush1.bf16.msra.mxu0 %v9180_v26  ;;  %7561 = vmatprep.subr.bf16.mxu1 %v9185_v45 }
 0x4f7   :  { %7608 = vmatprep.subr.bf16.mxu0 %v9188_v46 }
 0x4f9   :  { %7562 = vmatpush1.bf16.msra.mxu1 %v9183_v47 }
 0x4fa   :  { %7609 = vmatpush1.bf16.msra.mxu0 %v9186_v3  ;;  %7563 = vmatprep.subr.bf16.mxu1 %v9191_v1 }
 0x4fb   :  { %7610 = vmatprep.subr.bf16.mxu0 %v9194_v4 }
 0x4fd   :  { %7564 = vmatpush1.bf16.msra.mxu1 %v9189_v57  ;;  %v9254_v57 = vld [vmem:[#allocation16 + $0x6ec] ss:$16 sps:$4 sm:$0xff]  }
 0x4fe   :  { %7611 = vmatpush1.bf16.msra.mxu0 %v9192_v59  ;;  %7565 = vmatprep.subr.bf16.mxu1 %v9197_v5  ;;  %v9257_v5 = vld [vmem:[#allocation16 + $0x6cc] ss:$16 sps:$4 sm:$0xff]  }
 0x4ff   :  { %7612 = vmatprep.subr.bf16.mxu0 %v9200_v38  ;;  %v9255_v38 = vld [vmem:[#allocation16 + $0x6c8] ss:$16 sps:$4 sm:$0xff]  }
 0x501   :  { %7566 = vmatpush1.bf16.msra.mxu1 %v9195_v13  ;;  %v9260_v13 = vld [vmem:[#allocation16 + $0x6ac] ss:$16 sps:$4 sm:$0xff]  }
 0x502   :  { %7613 = vmatpush2.bf16.msra.mxu0 %v9198_v34  ;;  %7567 = vmatprep.subr.bf16.mxu1 %v9203_v16  ;;  %v9258_v34 = vld [vmem:[#allocation16 + $0x6a8] ss:$16 sps:$4 sm:$0xff]   ;;  %v9263_v16 = vld [vmem:[#allocation16 + $0x68c] ss:$16 sps:$4 sm:$0xff]  }
 0x503   :  { %7614 = vmatprep.subr.bf16.mxu0 %v9206_v17  ;;  %v9261_v17 = vld [vmem:[#allocation16 + $0x688] ss:$16 sps:$4 sm:$0xff]  }
 0x505   :  { %7568 = vmatpush1.bf16.msra.mxu1 %v9201_v44  ;;  %v9266_v44 = vld [vmem:[#allocation16 + $0x66c] ss:$16 sps:$4 sm:$0xff]  }
 0x506   :  { %7615 = vmatpush2.bf16.msra.mxu0 %v9204_v54  ;;  %7569 = vmatprep.subr.bf16.mxu1 %v9209_v19  ;;  %v9264_v54 = vld [vmem:[#allocation16 + $0x668] ss:$16 sps:$4 sm:$0xff]   ;;  %v9269_v19 = vld [vmem:[#allocation16 + $0x64c] ss:$16 sps:$4 sm:$0xff]  }
 0x507   :  { %7616 = vmatprep.subr.bf16.mxu0 %v9212_v24  ;;  %v9272_v24 = vld [vmem:[#allocation16 + $0x62c] ss:$16 sps:$4 sm:$0xff]  }
 0x509   :  { %7570 = vmatpush1.bf16.msra.mxu1 %v9207_v25  ;;  %v9275_v25 = vld [vmem:[#allocation16 + $0x60c] ss:$16 sps:$4 sm:$0xff]  }
 0x50a   :  { %7617 = vmatpush2.bf16.msra.mxu0 %v9210_v58  ;;  %7571 = vmatprep.subr.bf16.mxu1 %v9215_v27  ;;  %v9273_v58 = vld [vmem:[#allocation16 + $0x608] ss:$16 sps:$4 sm:$0xff]   ;;  %v9278_v27 = vld [vmem:[#allocation16 + $0x7ec] ss:$16 sps:$4 sm:$0xff]  }
 0x50b   :  { %7618 = vmatprep.subr.bf16.mxu0 %v9218_v60  ;;  %v9276_v60 = vld [vmem:[#allocation16 + $0x7e8] ss:$16 sps:$4 sm:$0xff]  }
 0x50d   :  { %7572 = vmatpush2.bf16.msra.mxu1 %v9213_v62  ;;  %v9281_v62 = vld [vmem:[#allocation16 + $0x7cc] ss:$16 sps:$4 sm:$0xff]  }
 0x50e   :  { %7619 = vmatpush2.bf16.msra.mxu0 %v9216_v61  ;;  %7573 = vmatprep.subr.bf16.mxu1 %v9221_v42  ;;  %v9279_v61 = vld [vmem:[#allocation16 + $0x7c8] ss:$16 sps:$4 sm:$0xff]   ;;  %v9284_v42 = vld [vmem:[#allocation16 + $0x7ac] ss:$16 sps:$4 sm:$0xff]  }
 0x50f   :  { %7620 = vmatprep.subr.bf16.mxu0 %v9224_v7  ;;  %v9282_v7 = vld [vmem:[#allocation16 + $0x7a8] ss:$16 sps:$4 sm:$0xff]  }
 0x511   :  { %7574 = vmatpush2.bf16.msra.mxu1 %v9219_v30  ;;  %v9287_v30 = vld [vmem:[#allocation16 + $0x78c] ss:$16 sps:$4 sm:$0xff]  }
 0x512   :  { %7621 = vmatpush2.bf16.msra.mxu0 %v9222_v14  ;;  %7575 = vmatprep.subr.bf16.mxu1 %v9227_v28  ;;  %v9285_v14 = vld [vmem:[#allocation16 + $0x788] ss:$16 sps:$4 sm:$0xff]   ;;  %v9290_v28 = vld [vmem:[#allocation16 + $0x76c] ss:$16 sps:$4 sm:$0xff]  }
 0x513   :  { %7622 = vmatprep.subr.bf16.mxu0 %v9230_v15  ;;  %v9288_v15 = vld [vmem:[#allocation16 + $0x768] ss:$16 sps:$4 sm:$0xff]  }
 0x515   :  { %7576 = vmatpush2.bf16.msra.mxu1 %v9225_v43  ;;  %v9293_v43 = vld [vmem:[#allocation16 + $0x74c] ss:$16 sps:$4 sm:$0xff]  }
 0x516   :  { %7623 = vmatpush2.bf16.msra.mxu0 %v9228_v29  ;;  %7577 = vmatprep.subr.bf16.mxu1 %v9233_v33  ;;  %v9291_v29 = vld [vmem:[#allocation16 + $0x748] ss:$16 sps:$4 sm:$0xff]   ;;  %v9296_v33 = vld [vmem:[#allocation16 + $0x72c] ss:$16 sps:$4 sm:$0xff]  }
 0x517   :  { %7624 = vmatprep.subr.bf16.mxu0 %v9236_v20 }
 0x519   :  { %7578 = vmatpush2.bf16.msra.mxu1 %v9231_v35 }
 0x51a   :  { %7625 = vmatpush2.bf16.msra.mxu0 %v9234_v2  ;;  %7579 = vmatprep.subr.bf16.mxu1 %v9239_v32  ;;  %v9294_v2 = vld [vmem:[#allocation16 + $0x728] ss:$16 sps:$4 sm:$0xff]  }
 0x51b   :  { %7626 = vmatprep.subr.bf16.mxu0 %v9242_v51  ;;  %v9299_v51 = vld [vmem:[#allocation16 + $0x70c] ss:$16 sps:$4 sm:$0xff]  }
 0x51d   :  { %7580 = vmatpush2.bf16.msra.mxu1 %v9237_v39 }
 0x51e   :  { %7627 = vmatpush2.bf16.msra.mxu0 %v9240_v40  ;;  %7581 = vmatprep.subr.bf16.mxu1 %v9245_v63  ;;  %v9297_v63 = vld [vmem:[#allocation16 + $0x708] ss:$16 sps:$4 sm:$0xff]  }
 0x520   :  { %v7384_v41 = vpop.f32.mrf.mxu0 }
 0x521   :  { %v7385_v56 = vadd.f32 %v7384_v41, %v6053_v21  ;;  %v7425_v53 = vpop.f32.mrf.mxu1  ;;  %7582 = vmatpush2.bf16.msra.mxu1 %v9243_v37  ;;  %7629 = vmatmul.mubr.bf16.vlgmr.msra.gmra.mxu0 %v10127_v31  ;;  %v9252_v31 = vld [vmem:[#allocation16 + $0x6e8] ss:$16 sps:$4 sm:$0xff]   ;;  %v7682_v41 = vld [vmem:[#allocation19] sm:$0xf] }
 0x522   :  { %v7386_v23 = vpop.f32.mrf.mxu0  ;;  %7583 = vmatprep.subr.bf16.mxu1 %v9248_v52 }
 0x523   :  { %v10164_v26 = vadd.f32 %v7425_v53, %v7385_v56  ;;  %v7387_v45 = vadd.f32 %v7386_v23, %v6057_v55  ;;  %v7427_v46 = vpop.f32.mrf.mxu1  ;;  %v7683_v53 = vunpack.c.l.bf16 %v7682_v41 }
 0x524   :  { %v7388_v47 = vpop.f32.mrf.mxu0 }
 0x525   :  { %v10166_v3 = vadd.f32 %v7427_v46, %v7387_v45  ;;  %v7429_v1 = vpop.f32.mrf.mxu1  ;;  %7584 = vmatpush2.bf16.msra.mxu1 %v9246_v10  ;;  %v7688_v10 = vrot.slane %v7683_v53, %v9948_v8  ;;  %v7692_v23 = vrot.slane %v7683_v53, %v9951_v9 }
 0x526   :  { %v7389_v4 = vpop.f32.mrf.mxu0  ;;  %7585 = vmatprep.subr.bf16.mxu1 %v9251_v36 }
 0x527   :  { %v7430_v59 = vpop.f32.mrf.mxu1  ;;  %v7708_v47 = vrot.slane %v7688_v10, %v9948_v8  ;;  %v7712_v1 = vrot.slane %v7692_v23, %v9948_v8 }
 0x529   :  { %7586 = vmatpush2.bf16.msra.mxu1 %v9249_v11 }
 0x52a   :  { %7637 = vmatprep.subr.bf16.mxu1 %v9254_v57 }
 0x52c   :  { %7588 = vmatmul.mubr.bf16.vlgmr.msra.gmra.mxu1 %v10112_v50  ;;  %v9267_v50 = vld [vmem:[#allocation16 + $0x648] ss:$16 sps:$4 sm:$0xff]  }
 0x52d   :  { %7638 = vmatpush1.bf16.msra.mxu1 %v9252_v31  ;;  %7669 = vmatprep.mubr.bf16.mxu1 %v10150_v0  ;;  %v9270_v0 = vld [vmem:[#allocation16 + $0x628] ss:$16 sps:$4 sm:$0xff]  }
 0x52e   :  { %7639 = vmatprep.subr.bf16.mxu1 %v9257_v5 }
 0x531   :  { %7640 = vmatpush1.bf16.msra.mxu1 %v9255_v38 }
 0x532   :  { %7641 = vmatprep.subr.bf16.mxu1 %v9260_v13 }
 0x535   :  { %7642 = vmatpush1.bf16.msra.mxu1 %v9258_v34  ;;  %v6061_v34 = vrot.slane %v10157_v48, %v9951_v9 }
 0x536   :  { %7643 = vmatprep.subr.bf16.mxu1 %v9263_v16 }
 0x539   :  { %7644 = vmatpush1.bf16.msra.mxu1 %v9261_v17  ;;  %v6065_v17 = vrot.slane %v10157_v48, %v9959_v12 }
 0x53a   :  { %7645 = vmatprep.subr.bf16.mxu1 %v9266_v44 }
 0x53d   :  { %7646 = vmatpush1.bf16.msra.mxu1 %v9264_v54 }
 0x53e   :  { %7647 = vmatprep.subr.bf16.mxu1 %v9269_v19 }
 0x541   :  { %7648 = vmatpush1.bf16.msra.mxu1 %v9267_v50 }
 0x542   :  { %7649 = vmatprep.subr.bf16.mxu1 %v9272_v24 }
 0x545   :  { %7650 = vmatpush1.bf16.msra.mxu1 %v9270_v0 }
 0x546   :  { %7651 = vmatprep.subr.bf16.mxu1 %v9275_v25 }
 0x549   :  { %7652 = vmatpush1.bf16.msra.mxu1 %v9273_v58 }
 0x54a   :  { %7653 = vmatprep.subr.bf16.mxu1 %v9278_v27 }
 0x54d   :  { %7654 = vmatpush2.bf16.msra.mxu1 %v9276_v60 }
 0x54e   :  { %7655 = vmatprep.subr.bf16.mxu1 %v9281_v62  ;;  %v7696_v62 = vrot.slane %v7683_v53, %v10010_v18  ;;  %v8736_v18 = vld [vmem:[#allocation2] ss:$0 sm:$0xff] }
 0x551   :  { %7656 = vmatpush2.bf16.msra.mxu1 %v9279_v61  ;;  %v7700_v61 = vrot.slane %v7683_v53, %v10013_v22 }
 0x552   :  { %7657 = vmatprep.subr.bf16.mxu1 %v9284_v42 }
 0x555   :  { %7658 = vmatpush2.bf16.msra.mxu1 %v9282_v7  ;;  %v7716_v7 = vrot.slane %v7696_v62, %v9948_v8 }
 0x556   :  { %7659 = vmatprep.subr.bf16.mxu1 %v9287_v30 }
 0x559   :  { %7660 = vmatpush2.bf16.msra.mxu1 %v9285_v14  ;;  %v7720_v14 = vrot.slane %v7700_v61, %v9948_v8  ;;  %v7739_v8 = vand.u32 127, %v1942_v6 }
 0x55a   :  { %7661 = vmatprep.subr.bf16.mxu1 %v9290_v28 }
 0x55b   :  { %vm7740_vm3 = vcmp.eq.s32.totalorder %v7739_v8, 0 }
 0x55d   :  { %7662 = vmatpush2.bf16.msra.mxu1 %v9288_v15 }
 0x55e   :  { %7663 = vmatprep.subr.bf16.mxu1 %v9293_v43 }
 0x560   :  { %v7466_v20 = vpop.f32.mrf.mxu0 }
 0x561   :  { %v7467_v35 = vadd.f32 %v7466_v20, %v10164_v26  ;;  %7664 = vmatpush2.bf16.msra.mxu1 %v9291_v29 }
 0x562   :  { %v7468_v32 = vpop.f32.mrf.mxu0  ;;  %7665 = vmatprep.subr.bf16.mxu1 %v9296_v33 }
 0x563   :  { %v7469_v39 = vadd.f32 %v7468_v32, %v10166_v3 }
 0x564   :  { %v7470_v40 = vpop.f32.mrf.mxu0 }
 0x565   :  { %7666 = vmatpush2.bf16.msra.mxu1 %v9294_v2 }
 0x566   :  { %v7471_v37 = vpop.f32.mrf.mxu0  ;;  %7667 = vmatprep.subr.bf16.mxu1 %v9299_v51 }
 0x569   :  { %7668 = vmatpush2.bf16.msra.mxu1 %v9297_v63 }
 0x56c   :  { %7670 = vmatmul.mubr.bf16.vlgmr.msra.gmra.mxu1 %v10152_v49 }
 0x5a0   :  { %v7548_v21 = vpop.f32.mrf.mxu0 }
 0x5a1   :  { %v7549_v44 = vadd.f32 %v7548_v21, %v6061_v34 }
 0x5a2   :  { %v7550_v52 = vpop.f32.mrf.mxu0 }
 0x5a3   :  { %v7551_v19 = vadd.f32 %v7550_v52, %v6065_v17 }
 0x5a4   :  { %v7552_v55 = vpop.f32.mrf.mxu0 }
 0x5a6   :  { %v7553_v56 = vpop.f32.mrf.mxu0 }
 0x5ac   :  { %v7507_v36 = vpop.f32.mrf.mxu1 }
 0x5ad   :  { %v7508_v26 = vadd.f32 %v7507_v36, %v7467_v35 }
 0x5ae   :  { %v7509_v45 = vpop.f32.mrf.mxu1 }
 0x5af   :  { %v7678_v46 = vmax.f32 %v7508_v26, 0.0  ;;  %v7510_v3 = vadd.f32 %v7509_v45, %v7469_v39 }
 0x5b0   :  { %v7511_v49 = vpop.f32.mrf.mxu1 }
 0x5b1   :  { %v7679_v11 = vmax.f32 %v7510_v3, 0.0  ;;  %v7721_v57 = vmul.f32 %v7708_v47, %v7678_v46 }
 0x5b2   :  { %v7512_v4 = vpop.f32.mrf.mxu1 }
 0x5b3   :  { %v7722_v59 = vmul.f32 %v7712_v1, %v7679_v11 }
 0x5b5   :  { %v7725_v31 = vadd.f32 %v7722_v59, %v7721_v57 }
 0x5e1   :  { %v7630_v5 = vpop.f32.mrf.mxu0 }
 0x5e3   :  { %v7632_v38 = vpop.f32.mrf.mxu0 }
 0x5e5   :  { %v7634_v13 = vpop.f32.mrf.mxu0 }
 0x5e7   :  { %v7635_v16 = vpop.f32.mrf.mxu0 }
 0x5ec   :  { %v7589_v54 = vpop.f32.mrf.mxu1 }
 0x5ed   :  { %v7590_v50 = vadd.f32 %v7589_v54, %v7549_v44 }
 0x5ee   :  { %v7591_v24 = vpop.f32.mrf.mxu1 }
 0x5ef   :  { %v7592_v0 = vadd.f32 %v7591_v24, %v7551_v19  ;;  %v7631_v25 = vadd.f32 %v7630_v5, %v7590_v50 }
 0x5f0   :  { %v7593_v58 = vpop.f32.mrf.mxu1 }
 0x5f1   :  { %v7633_v27 = vadd.f32 %v7632_v38, %v7592_v0 }
 0x5f2   :  { %v7594_v60 = vpop.f32.mrf.mxu1 }
 0x62c   :  { %v7671_v42 = vpop.f32.mrf.mxu1 }
 0x62d   :  { %v7672_v9 = vadd.f32 %v7671_v42, %v7631_v25 }
 0x62e   :  { %v7673_v30 = vpop.f32.mrf.mxu1 }
 0x62f   :  { %v7680_v12 = vmax.f32 %v7672_v9, 0.0  ;;  %v7674_v48 = vadd.f32 %v7673_v30, %v7633_v27 }
 0x630   :  { %v7675_v28 = vpop.f32.mrf.mxu1 }
 0x631   :  { %v7723_v15 = vmul.f32 %v7716_v7, %v7680_v12  ;;  %v7681_v43 = vmax.f32 %v7674_v48, 0.0 }
 0x632   :  { %v7676_v29 = vpop.f32.mrf.mxu1 }
 0x633   :  { %v7724_v33 = vmul.f32 %v7720_v14, %v7681_v43  ;;  %v7726_v20 = vadd.f32 %v7725_v31, %v7723_v15 }
 0x635   :  { %v7727_v35 = vadd.f32 %v7726_v20, %v7724_v33 }
 0x637   :  { %7728 = vadd.xlane.f32.xlu0 %v7727_v35 }
 0x6c0   :  { %v7729_v2 = vpop.xlane.xlu0 %7728 }
 0x6c1   :  { %v7737_v22 = vadd.f32 %v8736_v18, %v7729_v2 }
 0x6c3   :  { %v7741_v32 = vmax.f32 %v7737_v22, 0.0  ;;  %v8737_v51 = vmul.f32 -1.442695, %v7737_v22 }
 0x6c5   :  { %9300 = vpow2.f32 %v8737_v51  ;;  %7750 = vperm.xlu0 %8842, %v7741_v32  }
 0x6d2   :  { %v9301_v39 = vpop.eup %9300 }
 0x6d3   :  { %v7745_v40 = vadd.f32 1.0, %v9301_v39 }
 0x6d5   :  { %9302 = vrcp.f32 %v7745_v40 }
 0x6e2   :  { %v9303_v63 = vpop.eup %9302 }
 0x6e3   :  { %7755 = vperm.xlu1 %8843, %v9303_v63  }
 0x740   :  { %v7751_v37 = vpop.permute.xlu0 %7750 }
 0x75e   :  { %v7756_v21 = vpop.permute.xlu1 %7755 }
 0x75f   :  { %v7758_v52 = vsel %vm7740_vm3, %v7751_v37, %v7756_v21 }
 0x760   :  { %7760 = vst.msk [vmem:[%s10202_s13] sm:$0xff] %vm7759_vm4, %v7758_v52 }
 0x761   :  { %7765 = vsyncpa [#allocation4], 1 }
 0x762   :  { %7766 = vsyncpa [#allocation6], 1 }
 0x763   :  { %7767 = vsyncpa [#allocation9], 1 }
 0x764   :  { %7768 = vsyncpa [#allocation12], 1 }
 0x765   :  { %7769 = vsyncpa [#allocation15], 1 }
 0x766   :  { %7770 = vsyncpa [#allocation18], 1 }

</bundles_post_ra>
